<compile_context>
chip_gen: v5e
topology: v5e:2x2
jax: 0.10.0
libtpu: 0.0.40
codegen_flags: <defaults>
</compile_context>

<pallas_src>
import functools

import jax
import jax.numpy as jnp
from jax.experimental import pallas as pl
from jax.experimental.pallas import tpu as pltpu


def _round_up(x, m):
    return ((x + m - 1) // m) * m


# ----------------------------- Pallas kernels -----------------------------

def _fused_linear_kernel(*refs, has_ln, has_res, gelu, eps):
    """[optional LN] -> x @ w + b -> [optional exact-erf GELU] -> [optional residual add]."""
    idx = 0
    x_ref = refs[idx]; idx += 1
    if has_ln:
        g_ref = refs[idx]; bln_ref = refs[idx + 1]; idx += 2
    w_ref = refs[idx]; idx += 1
    b_ref = refs[idx]; idx += 1
    if has_res:
        res_ref = refs[idx]; idx += 1
    o_ref = refs[idx]

    x = x_ref[...]
    if has_ln:
        mu = jnp.mean(x, axis=-1, keepdims=True)
        xc = x - mu
        var = jnp.mean(xc * xc, axis=-1, keepdims=True)
        x = xc * jax.lax.rsqrt(var + eps) * g_ref[...] + bln_ref[...]

    acc = jnp.dot(
        x.astype(jnp.bfloat16),
        w_ref[...].astype(jnp.bfloat16),
        preferred_element_type=jnp.float32,
    ) + b_ref[...]

    if gelu:
        # exact erf-GELU (matches torch nn.GELU default); erf lands in the EUP slot.
        acc = 0.5 * acc * (1.0 + jax.lax.erf(acc * 0.7071067811865476))
    if has_res:
        acc = acc + res_ref[...]
    o_ref[...] = acc


def fused_linear(x, w, b, *, ln=None, residual=None, gelu=False, tm=256):
    """x: (M, K), w: (K, N), b: (N,) -> (M, N) with optional fused LN / GELU / residual.

    Row-tiled with a cdiv grid (ragged last block handled by Pallas masked stores —
    no host-side padding copies).  Matmul operands are bf16 on the MXU, fp32 accumulate.
    """
    M, K = x.shape
    N = w.shape[1]
    tm = max(8, min(tm, _round_up(M, 8)))          # multiple of 8, no bigger than needed
    grid = (pl.cdiv(M, tm),)
    has_ln = ln is not None
    has_res = residual is not None

    kernel = functools.partial(
        _fused_linear_kernel,
        has_ln=has_ln, has_res=has_res, gelu=gelu,
        eps=(ln[2] if has_ln else 0.0),
    )

    in_specs = [pl.BlockSpec((tm, K), lambda i: (i, 0))]
    args = [x]
    if has_ln:
        g, bln, _ = ln
        in_specs += [pl.BlockSpec((1, K), lambda i: (0, 0)),
                     pl.BlockSpec((1, K), lambda i: (0, 0))]
        args += [g.reshape(1, K), bln.reshape(1, K)]
    in_specs += [pl.BlockSpec((K, N), lambda i: (0, 0)),
                 pl.BlockSpec((1, N), lambda i: (0, 0))]
    args += [w, b.reshape(1, N)]
    if has_res:
        in_specs.append(pl.BlockSpec((tm, N), lambda i: (i, 0)))
        args.append(residual)

    return pl.pallas_call(
        kernel,
        out_shape=jax.ShapeDtypeStruct((M, N), jnp.float32),
        grid=grid,
        in_specs=in_specs,
        out_specs=pl.BlockSpec((tm, N), lambda i: (i, 0)),
        compiler_params=pltpu.CompilerParams(dimension_semantics=("parallel",)),
    )(*args)


def _layernorm_kernel(x_ref, g_ref, b_ref, o_ref, *, eps):
    x = x_ref[...]
    mu = jnp.mean(x, axis=-1, keepdims=True)
    xc = x - mu
    var = jnp.mean(xc * xc, axis=-1, keepdims=True)
    o_ref[...] = xc * jax.lax.rsqrt(var + eps) * g_ref[...] + b_ref[...]


def layernorm(x, g, b, *, eps=1e-6, tm=256):
    """Standalone layernorm over the last dim (used only for the final LN)."""
    M, D = x.shape
    tm = max(8, min(tm, _round_up(M, 8)))
    return pl.pallas_call(
        functools.partial(_layernorm_kernel, eps=eps),
        out_shape=jax.ShapeDtypeStruct((M, D), jnp.float32),
        grid=(pl.cdiv(M, tm),),
        in_specs=[
            pl.BlockSpec((tm, D), lambda i: (i, 0)),
            pl.BlockSpec((1, D), lambda i: (0, 0)),
            pl.BlockSpec((1, D), lambda i: (0, 0)),
        ],
        out_specs=pl.BlockSpec((tm, D), lambda i: (i, 0)),
        compiler_params=pltpu.CompilerParams(dimension_semantics=("parallel",)),
    )(x, g.reshape(1, D), b.reshape(1, D))


def _attention_kernel(q_ref, k_ref, v_ref, o_ref, *, scale):
    # q/k/v blocks: (BHt, S, Dh).  q pre-scaled; bf16 MXU inputs, fp32 accumulation.
    q = (q_ref[...] * scale).astype(jnp.bfloat16)
    k = k_ref[...].astype(jnp.bfloat16)
    v = v_ref[...].astype(jnp.bfloat16)
    s = jnp.einsum('bqd,bkd->bqk', q, k, preferred_element_type=jnp.float32)
    s = s - jnp.max(s, axis=-1, keepdims=True)          # numerically-stable softmax
    p = jnp.exp(s)
    denom = jnp.sum(p, axis=-1, keepdims=True)
    ctx = jnp.einsum('bqk,bkd->bqd', p.astype(jnp.bfloat16), v,
                     preferred_element_type=jnp.float32)
    # normalize the (S, Dh) context instead of the (S, S) probabilities; EUP reciprocal.
    o_ref[...] = ctx * pl.reciprocal(denom, approx=True)


def attention_core(q, k, v, scale):
    """q, k, v: (BH, S, Dh) -> softmax(q k^T * scale) v, gridded over BH in chunks."""
    BH, S, Dh = q.shape
    bht = next(c for c in (16, 8, 4, 2, 1) if BH % c == 0)
    return pl.pallas_call(
        functools.partial(_attention_kernel, scale=scale),
        out_shape=jax.ShapeDtypeStruct((BH, S, Dh), jnp.float32),
        grid=(BH // bht,),
        in_specs=[pl.BlockSpec((bht, S, Dh), lambda i: (i, 0, 0))] * 3,
        out_specs=pl.BlockSpec((bht, S, Dh), lambda i: (i, 0, 0)),
        compiler_params=pltpu.CompilerParams(dimension_semantics=("parallel",)),
    )(q, k, v)


def _meanpool_kernel(x_ref, o_ref):
    o_ref[...] = jnp.mean(x_ref[...], axis=1, keepdims=True)


def mean_pool_tokens(x):
    """x: (B, S, D) -> mean over token dim (the VideoEncoder .mean(dim=1)), gridded over B."""
    B, S, D = x.shape
    out = pl.pallas_call(
        _meanpool_kernel,
        out_shape=jax.ShapeDtypeStruct((B, 1, D), jnp.float32),
        grid=(B,),
        in_specs=[pl.BlockSpec((1, S, D), lambda i: (i, 0, 0))],
        out_specs=pl.BlockSpec((1, 1, D), lambda i: (i, 0, 0)),
        compiler_params=pltpu.CompilerParams(dimension_semantics=("parallel",)),
    )(x)
    return out[:, 0, :]


# ----------------------------- model glue (plain JAX) -----------------------------

def multihead_attention(x_flat, B_, S, p, ln_g, ln_b, num_heads, *, eps=1e-6):
    """TimesformerAttention with the pre-attention LayerNorm fused into the QKV matmul."""
    D = p["proj_w"].shape[0]
    hd = D // num_heads
    scale = float(hd) ** -0.5
    qkv = fused_linear(x_flat, p["qkv_w"], p["qkv_b"], ln=(ln_g, ln_b, eps))  # (B_*S, 3D)
    # TODO(synk): head split/merge transposes stay in XLA; lane-slicing the fused qkv slab
    # in-kernel would need Dh to be a 128-lane multiple.
    qkv = qkv.reshape(B_, S, 3, num_heads, hd).transpose(2, 0, 3, 1, 4)       # (3,B_,H,S,hd)
    q = qkv[0].reshape(B_ * num_heads, S, hd)
    k = qkv[1].reshape(B_ * num_heads, S, hd)
    v = qkv[2].reshape(B_ * num_heads, S, hd)
    ctx = attention_core(q, k, v, scale)                                      # (B_*H,S,hd)
    ctx = ctx.reshape(B_, num_heads, S, hd).transpose(0, 2, 1, 3).reshape(B_ * S, D)
    return fused_linear(ctx, p["proj_w"], p["proj_b"])                        # (B_*S, D)


def timesformer_embeddings(pixel_values, p, *, patch_size):
    """pixel_values: (B, T, C, H, W) -> (B, 1 + N*T, D)  (patch-major, frame-minor)."""
    B, T, C, H, W = pixel_values.shape
    P = patch_size
    nh, nw = H // P, W // P
    N = nh * nw
    D = p["cls_token"].shape[-1]
    # strided conv == unfold + matmul
    x = pixel_values.reshape(B * T, C, nh, P, nw, P)
    x = x.transpose(0, 2, 4, 1, 3, 5).reshape(B * T * N, C * P * P)
    patch = fused_linear(x, p["patch_w"], p["patch_b"]).reshape(B * T, N, D)
    cls = jnp.broadcast_to(p["cls_token"], (B * T, 1, D))
    emb = jnp.concatenate([cls, patch], axis=1) + p["pos_emb"]         # (B*T, 1+N, D)
    # time embeddings (divided space-time path)
    cls_tokens = emb[:B, 0:1, :]                                       # HF indexing quirk
    e = emb[:, 1:, :].reshape(B, T, N, D).transpose(0, 2, 1, 3).reshape(B * N, T, D)
    e = e + p["time_emb"]                                              # (1, T, D) broadcast
    e = e.reshape(B, N * T, D)
    return jnp.concatenate([cls_tokens, e], axis=1)                    # (B, 1+N*T, D)


def timesformer_layer(hs, p, *, B, ph, pw, T, num_heads, eps=1e-6):
    """One TimesformerLayer with divided space-time attention (inference)."""
    D = hs.shape[-1]
    N = ph * pw

    # --- temporal attention (LN fused into QKV; residual fused into temporal dense) ---
    temporal_flat = hs[:, 1:, :].reshape(-1, D)                        # (B*N*T, D)
    t_attn = multihead_attention(temporal_flat, B * N, T, p["t_attn"],
                                 p["t_ln_g"], p["t_ln_b"], num_heads, eps=eps)
    temporal_embedding = fused_linear(
        t_attn, p["t_dense_w"], p["t_dense_b"], residual=temporal_flat
    ).reshape(B, N * T, D)

    # --- spatial attention ---
    init_cls = hs[:, 0:1, :]                                           # (B, 1, D)
    cls_tok = jnp.repeat(init_cls, T, axis=1).reshape(B * T, 1, D)
    spatial = temporal_embedding.reshape(B, ph, pw, T, D).transpose(0, 3, 1, 2, 4)
    spatial = spatial.reshape(B * T, N, D)
    spatial = jnp.concatenate([cls_tok, spatial], axis=1)              # (B*T, 1+N, D)
    s_attn = multihead_attention(spatial.reshape(-1, D), B * T, 1 + N, p["s_attn"],
                                 p["ln_before_g"], p["ln_before_b"], num_heads, eps=eps)
    s_attn = s_attn.reshape(B * T, 1 + N, D)
    cls_out = s_attn[:, 0, :].reshape(B, T, D).mean(axis=1, keepdims=True)
    res_s = s_attn[:, 1:, :].reshape(B, T, ph, pw, D).transpose(0, 2, 3, 1, 4)
    res_s = res_s.reshape(B, N * T, D)

    # TODO(synk): cls handling / space-time re-ordering (concats + transposes) kept in
    # XLA glue; they reorder across the token axis and have no rectangular BlockSpec.
    hidden = (
        jnp.concatenate([init_cls, temporal_embedding], axis=1)
        + jnp.concatenate([cls_out, res_s], axis=1)
    )                                                                  # (B, 1+N*T, D)

    # --- MLP: LN + fc1 + exact-erf GELU fused; residual fused into fc2 ---
    S = hidden.shape[1]
    h_flat = hidden.reshape(-1, D)
    h2 = fused_linear(h_flat, p["fc1_w"], p["fc1_b"],
                      ln=(p["ln_after_g"], p["ln_after_b"], eps), gelu=True)
    out = fused_linear(h2, p["fc2_w"], p["fc2_b"], residual=h_flat)
    return out.reshape(B, S, D)


def video_encoder_forward(video_frames, params, cfg):
    """VideoEncoder.forward: permute (B,C,T,H,W)->(B,T,C,H,W), TimeSformer, mean over tokens."""
    B, C, T, H, W = video_frames.shape
    x = jnp.transpose(video_frames, (0, 2, 1, 3, 4))
    hs = timesformer_embeddings(x, params["emb"], patch_size=cfg["patch_size"])
    ph = pw = cfg["image_size"] // cfg["patch_size"]
    for lp in params["layers"]:
        hs = timesformer_layer(hs, lp, B=B, ph=ph, pw=pw, T=T, num_heads=cfg["num_heads"])
    D = hs.shape[-1]
    hs = layernorm(
        hs.reshape(-1, D), params["final_ln_g"], params["final_ln_b"]
    ).reshape(hs.shape)
    return mean_pool_tokens(hs)                                        # (B, D)


# ----------------------------- deterministic init -----------------------------

def init_params(key, cfg):
    D, I = cfg["hidden"], cfg["intermediate"]
    C, P, T = 3, cfg["patch_size"], cfg["num_frames"]
    nh = cfg["image_size"] // P
    N = nh * nh
    ks = iter(jax.random.split(key, 512))

    def nrm(shape, s=0.02):
        return (s * jax.random.normal(next(ks), shape)).astype(jnp.float32)

    def wmat(shape):
        # matmul weights stored bf16: native MXU input dtype + half the DMA bytes.
        return nrm(shape).astype(jnp.bfloat16)

    emb = dict(
        patch_w=wmat((C * P * P, D)), patch_b=nrm((D,)),
        cls_token=nrm((1, 1, D)),
        pos_emb=nrm((1, 1 + N, D)),
        time_emb=nrm((1, T, D)),
    )
    layers = []
    for _ in range(cfg["layers"]):
        layers.append(dict(
            t_ln_g=jnp.ones((D,), jnp.float32), t_ln_b=jnp.zeros((D,), jnp.float32),
            t_attn=dict(qkv_w=wmat((D, 3 * D)), qkv_b=nrm((3 * D,)),
                        proj_w=wmat((D, D)), proj_b=nrm((D,))),
            t_dense_w=wmat((D, D)), t_dense_b=nrm((D,)),
            ln_before_g=jnp.ones((D,), jnp.float32), ln_before_b=jnp.zeros((D,), jnp.float32),
            s_attn=dict(qkv_w=wmat((D, 3 * D)), qkv_b=nrm((3 * D,)),
                        proj_w=wmat((D, D)), proj_b=nrm((D,))),
            ln_after_g=jnp.ones((D,), jnp.float32), ln_after_b=jnp.zeros((D,), jnp.float32),
            fc1_w=wmat((D, I)), fc1_b=nrm((I,)),
            fc2_w=wmat((I, D)), fc2_b=nrm((D,)),
        ))
    return dict(
        emb=emb, layers=layers,
        final_ln_g=jnp.ones((D,), jnp.float32),
        final_ln_b=jnp.zeros((D,), jnp.float32),
    )


# ----------------------------- main -----------------------------

if __name__ == "__main__":
    # Small config consistent with the module (scaled-down TimesformerConfig).
    cfg = dict(num_frames=4, image_size=16, patch_size=8,
               hidden=32, intermediate=64, layers=2, num_heads=4)

    key = jax.random.PRNGKey(0)
    pkey, xkey = jax.random.split(key)
    params = init_params(pkey, cfg)

    B = 2
    video = jax.random.normal(
        xkey, (B, 3, cfg["num_frames"], cfg["image_size"], cfg["image_size"]),
        dtype=jnp.float32,
    )  # PyTorch layout: (B, C, T, H, W)

    fwd = jax.jit(lambda v, p: video_encoder_forward(v, p, cfg))
    out = jax.block_until_ready(fwd(video, params))

    assert out.shape == (B, cfg["hidden"]), out.shape
    assert bool(jnp.all(jnp.isfinite(out)))
    print("KERNEL_OK")
</pallas_src>

<mosaic_0001>
module attributes {stable_mosaic.version = 11 : i64} {
  func.func @_fused_linear_kernel(%arg0: i32, %arg1: memref<32x192xf32, #tpu.memory_space<vmem>>, %arg2: memref<192x32xbf16, #tpu.memory_space<vmem>>, %arg3: memref<1x32xf32, #tpu.memory_space<vmem>>, %arg4: memref<32x32xf32, #tpu.memory_space<vmem>>) attributes {dimension_semantics = [#tpu.dimension_semantics<parallel>], iteration_bounds = array<i64: 1>, scalar_prefetch = 0 : i64, scratch_operands = 0 : i64, tpu.core_type = #tpu.core_type<tc>, window_params = [{transform_indices = @transform_0, window_bounds = array<i64: 32, 192>}, {pipeline_mode = #tpu.pipeline_mode<synchronous>, transform_indices = @transform_1, window_bounds = array<i64: 192, 32>}, {pipeline_mode = #tpu.pipeline_mode<synchronous>, transform_indices = @transform_2, window_bounds = array<i64: 1, 32>}, {transform_indices = @transform_3, window_bounds = array<i64: 32, 32>}]} {
    %c0 = arith.constant 0 : index
    %c0_0 = arith.constant 0 : index
    %0 = vector.load %arg1[%c0, %c0_0] : memref<32x192xf32, #tpu.memory_space<vmem>>, vector<32x192xf32>
    %1 = arith.truncf %0 : vector<32x192xf32> to vector<32x192xbf16>
    %c0_1 = arith.constant 0 : index
    %c0_2 = arith.constant 0 : index
    %2 = vector.load %arg2[%c0_1, %c0_2] : memref<192x32xbf16, #tpu.memory_space<vmem>>, vector<192x32xbf16>
    %cst = arith.constant dense<0.000000e+00> : vector<32x32xf32>
    %3 = tpu.matmul %1, %2, %cst {dimension_numbers = #tpu.dot_dimension_numbers<[1], [0], [0], [1], [0, 0, 1, 1], [], []>} : vector<32x192xbf16>, vector<192x32xbf16>, vector<32x32xf32> -> vector<32x32xf32>
    %c0_3 = arith.constant 0 : index
    %c0_4 = arith.constant 0 : index
    %4 = vector.load %arg3[%c0_3, %c0_4] : memref<1x32xf32, #tpu.memory_space<vmem>>, vector<1x32xf32>
    %5 = vector.broadcast %4 : vector<1x32xf32> to vector<32x32xf32>
    %6 = arith.addf %3, %5 : vector<32x32xf32>
    %c0_5 = arith.constant 0 : index
    %c0_6 = arith.constant 0 : index
    %7 = vector.load %arg4[%c0_5, %c0_6] : memref<32x32xf32, #tpu.memory_space<vmem>>, vector<32x32xf32>
    tpu.vector_store %arg4[%c0_5, %c0_6], %6 {strides = array<i32>} : memref<32x32xf32, #tpu.memory_space<vmem>>, vector<32x32xf32>,
    return
  }
  func.func @transform_0(%arg0: i32) -> (i32, i32) {
    %c0_i32 = arith.constant 0 : i32
    %c0_i32_0 = arith.constant 0 : i32
    return %arg0, %c0_i32 : i32, i32
  }
  func.func @transform_1(%arg0: i32) -> (i32, i32) {
    %c0_i32 = arith.constant 0 : i32
    %c0_i32_0 = arith.constant 0 : i32
    %c0_i32_1 = arith.constant 0 : i32
    return %c0_i32, %c0_i32_0 : i32, i32
  }
  func.func @transform_2(%arg0: i32) -> (i32, i32) {
    %c0_i32 = arith.constant 0 : i32
    %c0_i32_0 = arith.constant 0 : i32
    %c0_i32_1 = arith.constant 0 : i32
    return %c0_i32, %c0_i32_0 : i32, i32
  }
  func.func @transform_3(%arg0: i32) -> (i32, i32) {
    %c0_i32 = arith.constant 0 : i32
    %c0_i32_0 = arith.constant 0 : i32
    return %arg0, %c0_i32 : i32, i32
  }
}

module attributes {stable_mosaic.version = 11 : i64} {
  func.func @_fused_linear_kernel(%arg0: i32, %arg1: memref<32x32xf32, #tpu.memory_space<vmem>>, %arg2: memref<1x32xf32, #tpu.memory_space<vmem>>, %arg3: memref<1x32xf32, #tpu.memory_space<vmem>>, %arg4: memref<32x96xbf16, #tpu.memory_space<vmem>>, %arg5: memref<1x96xf32, #tpu.memory_space<vmem>>, %arg6: memref<32x96xf32, #tpu.memory_space<vmem>>) attributes {dimension_semantics = [#tpu.dimension_semantics<parallel>], iteration_bounds = array<i64: 1>, scalar_prefetch = 0 : i64, scratch_operands = 0 : i64, tpu.core_type = #tpu.core_type<tc>, window_params = [{transform_indices = @transform_0, window_bounds = array<i64: 32, 32>}, {pipeline_mode = #tpu.pipeline_mode<synchronous>, transform_indices = @transform_1, window_bounds = array<i64: 1, 32>}, {pipeline_mode = #tpu.pipeline_mode<synchronous>, transform_indices = @transform_2, window_bounds = array<i64: 1, 32>}, {pipeline_mode = #tpu.pipeline_mode<synchronous>, transform_indices = @transform_3, window_bounds = array<i64: 32, 96>}, {pipeline_mode = #tpu.pipeline_mode<synchronous>, transform_indices = @transform_4, window_bounds = array<i64: 1, 96>}, {transform_indices = @transform_5, window_bounds = array<i64: 32, 96>}]} {
    %c0 = arith.constant 0 : index
    %c0_0 = arith.constant 0 : index
    %0 = vector.load %arg1[%c0, %c0_0] : memref<32x32xf32, #tpu.memory_space<vmem>>, vector<32x32xf32>
    %cst = arith.constant dense<0.000000e+00> : vector<32xf32>
    %1 = vector.multi_reduction <add>, %0, %cst [1] : vector<32x32xf32> to vector<32xf32>
    %2 = vector.shape_cast %1 : vector<32xf32> to vector<32x1xf32>
    %cst_1 = arith.constant 3.200000e+01 : f32
    %3 = vector.broadcast %cst_1 : f32 to vector<32x1xf32>
    %4 = arith.divf %2, %3 : vector<32x1xf32>
    %5 = vector.broadcast %4 : vector<32x1xf32> to vector<32x32xf32>
    %6 = arith.subf %0, %5 : vector<32x32xf32>
    %7 = arith.mulf %6, %6 : vector<32x32xf32>
    %cst_2 = arith.constant dense<0.000000e+00> : vector<32xf32>
    %8 = vector.multi_reduction <add>, %7, %cst_2 [1] : vector<32x32xf32> to vector<32xf32>
    %9 = vector.shape_cast %8 : vector<32xf32> to vector<32x1xf32>
    %cst_3 = arith.constant 3.200000e+01 : f32
    %10 = vector.broadcast %cst_3 : f32 to vector<32x1xf32>
    %11 = arith.divf %9, %10 : vector<32x1xf32>
    %cst_4 = arith.constant 9.99999997E-7 : f32
    %12 = vector.broadcast %cst_4 : f32 to vector<32x1xf32>
    %13 = arith.addf %11, %12 : vector<32x1xf32>
    %14 = math.rsqrt %13 : vector<32x1xf32>
    %15 = vector.broadcast %14 : vector<32x1xf32> to vector<32x32xf32>
    %16 = arith.mulf %6, %15 : vector<32x32xf32>
    %c0_5 = arith.constant 0 : index
    %c0_6 = arith.constant 0 : index
    %17 = vector.load %arg2[%c0_5, %c0_6] : memref<1x32xf32, #tpu.memory_space<vmem>>, vector<1x32xf32>
    %18 = vector.broadcast %17 : vector<1x32xf32> to vector<32x32xf32>
    %19 = arith.mulf %16, %18 : vector<32x32xf32>
    %c0_7 = arith.constant 0 : index
    %c0_8 = arith.constant 0 : index
    %20 = vector.load %arg3[%c0_7, %c0_8] : memref<1x32xf32, #tpu.memory_space<vmem>>, vector<1x32xf32>
    %21 = vector.broadcast %20 : vector<1x32xf32> to vector<32x32xf32>
    %22 = arith.addf %19, %21 : vector<32x32xf32>
    %23 = arith.truncf %22 : vector<32x32xf32> to vector<32x32xbf16>
    %c0_9 = arith.constant 0 : index
    %c0_10 = arith.constant 0 : index
    %24 = vector.load %arg4[%c0_9, %c0_10] : memref<32x96xbf16, #tpu.memory_space<vmem>>, vector<32x96xbf16>
    %cst_11 = arith.constant dense<0.000000e+00> : vector<32x96xf32>
    %25 = tpu.matmul %23, %24, %cst_11 {dimension_numbers = #tpu.dot_dimension_numbers<[1], [0], [0], [1], [0, 0, 1, 1], [], []>} : vector<32x32xbf16>, vector<32x96xbf16>, vector<32x96xf32> -> vector<32x96xf32>
    %c0_12 = arith.constant 0 : index
    %c0_13 = arith.constant 0 : index
    %26 = vector.load %arg5[%c0_12, %c0_13] : memref<1x96xf32, #tpu.memory_space<vmem>>, vector<1x96xf32>
    %27 = vector.broadcast %26 : vector<1x96xf32> to vector<32x96xf32>
    %28 = arith.addf %25, %27 : vector<32x96xf32>
    %c0_14 = arith.constant 0 : index
    %c0_15 = arith.constant 0 : index
    %29 = vector.load %arg6[%c0_14, %c0_15] : memref<32x96xf32, #tpu.memory_space<vmem>>, vector<32x96xf32>
    tpu.vector_store %arg6[%c0_14, %c0_15], %28 {strides = array<i32>} : memref<32x96xf32, #tpu.memory_space<vmem>>, vector<32x96xf32>,
    return
  }
  func.func @transform_0(%arg0: i32) -> (i32, i32) {
    %c0_i32 = arith.constant 0 : i32
    %c0_i32_0 = arith.constant 0 : i32
    return %arg0, %c0_i32 : i32, i32
  }
  func.func @transform_1(%arg0: i32) -> (i32, i32) {
    %c0_i32 = arith.constant 0 : i32
    %c0_i32_0 = arith.constant 0 : i32
    %c0_i32_1 = arith.constant 0 : i32
    return %c0_i32, %c0_i32_0 : i32, i32
  }
  func.func @transform_2(%arg0: i32) -> (i32, i32) {
    %c0_i32 = arith.constant 0 : i32
    %c0_i32_0 = arith.constant 0 : i32
    %c0_i32_1 = arith.constant 0 : i32
    return %c0_i32, %c0_i32_0 : i32, i32
  }
  func.func @transform_3(%arg0: i32) -> (i32, i32) {
    %c0_i32 = arith.constant 0 : i32
    %c0_i32_0 = arith.constant 0 : i32
    %c0_i32_1 = arith.constant 0 : i32
    return %c0_i32, %c0_i32_0 : i32, i32
  }
  func.func @transform_4(%arg0: i32) -> (i32, i32) {
    %c0_i32 = arith.constant 0 : i32
    %c0_i32_0 = arith.constant 0 : i32
    %c0_i32_1 = arith.constant 0 : i32
    return %c0_i32, %c0_i32_0 : i32, i32
  }
  func.func @transform_5(%arg0: i32) -> (i32, i32) {
    %c0_i32 = arith.constant 0 : i32
    %c0_i32_0 = arith.constant 0 : i32
    return %arg0, %c0_i32 : i32, i32
  }
}

module attributes {stable_mosaic.version = 11 : i64} {
  func.func @_attention_kernel(%arg0: i32, %arg1: memref<16x4x8xf32, #tpu.memory_space<vmem>>, %arg2: memref<16x4x8xf32, #tpu.memory_space<vmem>>, %arg3: memref<16x4x8xf32, #tpu.memory_space<vmem>>, %arg4: memref<16x4x8xf32, #tpu.memory_space<vmem>>) attributes {dimension_semantics = [#tpu.dimension_semantics<parallel>], iteration_bounds = array<i64: 2>, scalar_prefetch = 0 : i64, scratch_operands = 0 : i64, tpu.core_type = #tpu.core_type<tc>, window_params = [{transform_indices = @transform_0, window_bounds = array<i64: 16, 4, 8>}, {transform_indices = @transform_1, window_bounds = array<i64: 16, 4, 8>}, {transform_indices = @transform_2, window_bounds = array<i64: 16, 4, 8>}, {transform_indices = @transform_3, window_bounds = array<i64: 16, 4, 8>}]} {
    %c0 = arith.constant 0 : index
    %c0_0 = arith.constant 0 : index
    %c0_1 = arith.constant 0 : index
    %0 = vector.load %arg1[%c0, %c0_0, %c0_1] : memref<16x4x8xf32, #tpu.memory_space<vmem>>, vector<16x4x8xf32>
    %cst = arith.constant 0.353553385 : f32
    %1 = vector.broadcast %cst : f32 to vector<16x4x8xf32>
    %2 = arith.mulf %0, %1 : vector<16x4x8xf32>
    %3 = arith.truncf %2 : vector<16x4x8xf32> to vector<16x4x8xbf16>
    %c0_2 = arith.constant 0 : index
    %c0_3 = arith.constant 0 : index
    %c0_4 = arith.constant 0 : index
    %4 = vector.load %arg2[%c0_2, %c0_3, %c0_4] : memref<16x4x8xf32, #tpu.memory_space<vmem>>, vector<16x4x8xf32>
    %5 = arith.truncf %4 : vector<16x4x8xf32> to vector<16x4x8xbf16>
    %c0_5 = arith.constant 0 : index
    %c0_6 = arith.constant 0 : index
    %c0_7 = arith.constant 0 : index
    %6 = vector.load %arg3[%c0_5, %c0_6, %c0_7] : memref<16x4x8xf32, #tpu.memory_space<vmem>>, vector<16x4x8xf32>
    %7 = arith.truncf %6 : vector<16x4x8xf32> to vector<16x4x8xbf16>
    "tpu.trace_start"() <{level = 10 : i32, message = "bqd,bkd->bqk"}> : () -> ()
    %cst_8 = arith.constant dense<0.000000e+00> : vector<16x4x4xf32>
    %8 = tpu.matmul %3, %5, %cst_8 {dimension_numbers = #tpu.dot_dimension_numbers<[2], [2], [1], [1], [0, 0, 0, 1, 1, 1], [0], [0]>} : vector<16x4x8xbf16>, vector<16x4x8xbf16>, vector<16x4x4xf32> -> vector<16x4x4xf32>
    "tpu.trace_stop"() : () -> ()
    %cst_9 = arith.constant dense<0xFF800000> : vector<16x4xf32>
    %9 = vector.multi_reduction <maximumf>, %8, %cst_9 [2] : vector<16x4x4xf32> to vector<16x4xf32>
    %10 = vector.shape_cast %9 : vector<16x4xf32> to vector<16x4x1xf32>
    %11 = vector.broadcast %10 : vector<16x4x1xf32> to vector<16x4x4xf32>
    %12 = arith.subf %8, %11 : vector<16x4x4xf32>
    %13 = math.exp %12 : vector<16x4x4xf32>
    %cst_10 = arith.constant dense<0.000000e+00> : vector<16x4xf32>
    %14 = vector.multi_reduction <add>, %13, %cst_10 [2] : vector<16x4x4xf32> to vector<16x4xf32>
    %15 = vector.shape_cast %14 : vector<16x4xf32> to vector<16x4x1xf32>
    %16 = arith.truncf %13 : vector<16x4x4xf32> to vector<16x4x4xbf16>
    "tpu.trace_start"() <{level = 10 : i32, message = "bqk,bkd->bqd"}> : () -> ()
    %cst_11 = arith.constant dense<0.000000e+00> : vector<16x4x8xf32>
    %17 = tpu.matmul %16, %7, %cst_11 {dimension_numbers = #tpu.dot_dimension_numbers<[2], [1], [1], [2], [0, 0, 0, 1, 1, 2], [0], [0]>} : vector<16x4x4xbf16>, vector<16x4x8xbf16>, vector<16x4x8xf32> -> vector<16x4x8xf32>
    "tpu.trace_stop"() : () -> ()
    %18 = tpu.reciprocal %15 {approx = true} : vector<16x4x1xf32> -> vector<16x4x1xf32>
    %19 = vector.broadcast %18 : vector<16x4x1xf32> to vector<16x4x8xf32>
    %20 = arith.mulf %17, %19 : vector<16x4x8xf32>
    %c0_12 = arith.constant 0 : index
    %c0_13 = arith.constant 0 : index
    %c0_14 = arith.constant 0 : index
    %21 = vector.load %arg4[%c0_12, %c0_13, %c0_14] : memref<16x4x8xf32, #tpu.memory_space<vmem>>, vector<16x4x8xf32>
    tpu.vector_store %arg4[%c0_12, %c0_13, %c0_14], %20 {strides = array<i32>} : memref<16x4x8xf32, #tpu.memory_space<vmem>>, vector<16x4x8xf32>,
    return
  }
  func.func @transform_0(%arg0: i32) -> (i32, i32, i32) {
    %c0_i32 = arith.constant 0 : i32
    %c0_i32_0 = arith.constant 0 : i32
    %c0_i32_1 = arith.constant 0 : i32
    return %arg0, %c0_i32, %c0_i32_0 : i32, i32, i32
  }
  func.func @transform_1(%arg0: i32) -> (i32, i32, i32) {
    %c0_i32 = arith.constant 0 : i32
    %c0_i32_0 = arith.constant 0 : i32
    %c0_i32_1 = arith.constant 0 : i32
    return %arg0, %c0_i32, %c0_i32_0 : i32, i32, i32
  }
  func.func @transform_2(%arg0: i32) -> (i32, i32, i32) {
    %c0_i32 = arith.constant 0 : i32
    %c0_i32_0 = arith.constant 0 : i32
    %c0_i32_1 = arith.constant 0 : i32
    return %arg0, %c0_i32, %c0_i32_0 : i32, i32, i32
  }
  func.func @transform_3(%arg0: i32) -> (i32, i32, i32) {
    %c0_i32 = arith.constant 0 : i32
    %c0_i32_0 = arith.constant 0 : i32
    %c0_i32_1 = arith.constant 0 : i32
    return %arg0, %c0_i32, %c0_i32_0 : i32, i32, i32
  }
}

module attributes {stable_mosaic.version = 11 : i64} {
  func.func @_fused_linear_kernel(%arg0: i32, %arg1: memref<32x32xf32, #tpu.memory_space<vmem>>, %arg2: memref<32x32xbf16, #tpu.memory_space<vmem>>, %arg3: memref<1x32xf32, #tpu.memory_space<vmem>>, %arg4: memref<32x32xf32, #tpu.memory_space<vmem>>) attributes {dimension_semantics = [#tpu.dimension_semantics<parallel>], iteration_bounds = array<i64: 1>, scalar_prefetch = 0 : i64, scratch_operands = 0 : i64, tpu.core_type = #tpu.core_type<tc>, window_params = [{transform_indices = @transform_0, window_bounds = array<i64: 32, 32>}, {pipeline_mode = #tpu.pipeline_mode<synchronous>, transform_indices = @transform_1, window_bounds = array<i64: 32, 32>}, {pipeline_mode = #tpu.pipeline_mode<synchronous>, transform_indices = @transform_2, window_bounds = array<i64: 1, 32>}, {transform_indices = @transform_3, window_bounds = array<i64: 32, 32>}]} {
    %c0 = arith.constant 0 : index
    %c0_0 = arith.constant 0 : index
    %0 = vector.load %arg1[%c0, %c0_0] : memref<32x32xf32, #tpu.memory_space<vmem>>, vector<32x32xf32>
    %1 = arith.truncf %0 : vector<32x32xf32> to vector<32x32xbf16>
    %c0_1 = arith.constant 0 : index
    %c0_2 = arith.constant 0 : index
    %2 = vector.load %arg2[%c0_1, %c0_2] : memref<32x32xbf16, #tpu.memory_space<vmem>>, vector<32x32xbf16>
    %cst = arith.constant dense<0.000000e+00> : vector<32x32xf32>
    %3 = tpu.matmul %1, %2, %cst {dimension_numbers = #tpu.dot_dimension_numbers<[1], [0], [0], [1], [0, 0, 1, 1], [], []>} : vector<32x32xbf16>, vector<32x32xbf16>, vector<32x32xf32> -> vector<32x32xf32>
    %c0_3 = arith.constant 0 : index
    %c0_4 = arith.constant 0 : index
    %4 = vector.load %arg3[%c0_3, %c0_4] : memref<1x32xf32, #tpu.memory_space<vmem>>, vector<1x32xf32>
    %5 = vector.broadcast %4 : vector<1x32xf32> to vector<32x32xf32>
    %6 = arith.addf %3, %5 : vector<32x32xf32>
    %c0_5 = arith.constant 0 : index
    %c0_6 = arith.constant 0 : index
    %7 = vector.load %arg4[%c0_5, %c0_6] : memref<32x32xf32, #tpu.memory_space<vmem>>, vector<32x32xf32>
    tpu.vector_store %arg4[%c0_5, %c0_6], %6 {strides = array<i32>} : memref<32x32xf32, #tpu.memory_space<vmem>>, vector<32x32xf32>,
    return
  }
  func.func @transform_0(%arg0: i32) -> (i32, i32) {
    %c0_i32 = arith.constant 0 : i32
    %c0_i32_0 = arith.constant 0 : i32
    return %arg0, %c0_i32 : i32, i32
  }
  func.func @transform_1(%arg0: i32) -> (i32, i32) {
    %c0_i32 = arith.constant 0 : i32
    %c0_i32_0 = arith.constant 0 : i32
    %c0_i32_1 = arith.constant 0 : i32
    return %c0_i32, %c0_i32_0 : i32, i32
  }
  func.func @transform_2(%arg0: i32) -> (i32, i32) {
    %c0_i32 = arith.constant 0 : i32
    %c0_i32_0 = arith.constant 0 : i32
    %c0_i32_1 = arith.constant 0 : i32
    return %c0_i32, %c0_i32_0 : i32, i32
  }
  func.func @transform_3(%arg0: i32) -> (i32, i32) {
    %c0_i32 = arith.constant 0 : i32
    %c0_i32_0 = arith.constant 0 : i32
    return %arg0, %c0_i32 : i32, i32
  }
}

module attributes {stable_mosaic.version = 11 : i64} {
  func.func @_fused_linear_kernel(%arg0: i32, %arg1: memref<32x32xf32, #tpu.memory_space<vmem>>, %arg2: memref<32x32xbf16, #tpu.memory_space<vmem>>, %arg3: memref<1x32xf32, #tpu.memory_space<vmem>>, %arg4: memref<32x32xf32, #tpu.memory_space<vmem>>, %arg5: memref<32x32xf32, #tpu.memory_space<vmem>>) attributes {dimension_semantics = [#tpu.dimension_semantics<parallel>], iteration_bounds = array<i64: 1>, scalar_prefetch = 0 : i64, scratch_operands = 0 : i64, tpu.core_type = #tpu.core_type<tc>, window_params = [{transform_indices = @transform_0, window_bounds = array<i64: 32, 32>}, {pipeline_mode = #tpu.pipeline_mode<synchronous>, transform_indices = @transform_1, window_bounds = array<i64: 32, 32>}, {pipeline_mode = #tpu.pipeline_mode<synchronous>, transform_indices = @transform_2, window_bounds = array<i64: 1, 32>}, {transform_indices = @transform_3, window_bounds = array<i64: 32, 32>}, {transform_indices = @transform_4, window_bounds = array<i64: 32, 32>}]} {
    %c0 = arith.constant 0 : index
    %c0_0 = arith.constant 0 : index
    %0 = vector.load %arg1[%c0, %c0_0] : memref<32x32xf32, #tpu.memory_space<vmem>>, vector<32x32xf32>
    %1 = arith.truncf %0 : vector<32x32xf32> to vector<32x32xbf16>
    %c0_1 = arith.constant 0 : index
    %c0_2 = arith.constant 0 : index
    %2 = vector.load %arg2[%c0_1, %c0_2] : memref<32x32xbf16, #tpu.memory_space<vmem>>, vector<32x32xbf16>
    %cst = arith.constant dense<0.000000e+00> : vector<32x32xf32>
    %3 = tpu.matmul %1, %2, %cst {dimension_numbers = #tpu.dot_dimension_numbers<[1], [0], [0], [1], [0, 0, 1, 1], [], []>} : vector<32x32xbf16>, vector<32x32xbf16>, vector<32x32xf32> -> vector<32x32xf32>
    %c0_3 = arith.constant 0 : index
    %c0_4 = arith.constant 0 : index
    %4 = vector.load %arg3[%c0_3, %c0_4] : memref<1x32xf32, #tpu.memory_space<vmem>>, vector<1x32xf32>
    %5 = vector.broadcast %4 : vector<1x32xf32> to vector<32x32xf32>
    %6 = arith.addf %3, %5 : vector<32x32xf32>
    %c0_5 = arith.constant 0 : index
    %c0_6 = arith.constant 0 : index
    %7 = vector.load %arg4[%c0_5, %c0_6] : memref<32x32xf32, #tpu.memory_space<vmem>>, vector<32x32xf32>
    %8 = arith.addf %6, %7 : vector<32x32xf32>
    %c0_7 = arith.constant 0 : index
    %c0_8 = arith.constant 0 : index
    %9 = vector.load %arg5[%c0_7, %c0_8] : memref<32x32xf32, #tpu.memory_space<vmem>>, vector<32x32xf32>
    tpu.vector_store %arg5[%c0_7, %c0_8], %8 {strides = array<i32>} : memref<32x32xf32, #tpu.memory_space<vmem>>, vector<32x32xf32>,
    return
  }
  func.func @transform_0(%arg0: i32) -> (i32, i32) {
    %c0_i32 = arith.constant 0 : i32
    %c0_i32_0 = arith.constant 0 : i32
    return %arg0, %c0_i32 : i32, i32
  }
  func.func @transform_1(%arg0: i32) -> (i32, i32) {
    %c0_i32 = arith.constant 0 : i32
    %c0_i32_0 = arith.constant 0 : i32
    %c0_i32_1 = arith.constant 0 : i32
    return %c0_i32, %c0_i32_0 : i32, i32
  }
  func.func @transform_2(%arg0: i32) -> (i32, i32) {
    %c0_i32 = arith.constant 0 : i32
    %c0_i32_0 = arith.constant 0 : i32
    %c0_i32_1 = arith.constant 0 : i32
    return %c0_i32, %c0_i32_0 : i32, i32
  }
  func.func @transform_3(%arg0: i32) -> (i32, i32) {
    %c0_i32 = arith.constant 0 : i32
    %c0_i32_0 = arith.constant 0 : i32
    return %arg0, %c0_i32 : i32, i32
  }
  func.func @transform_4(%arg0: i32) -> (i32, i32) {
    %c0_i32 = arith.constant 0 : i32
    %c0_i32_0 = arith.constant 0 : i32
    return %arg0, %c0_i32 : i32, i32
  }
}

module attributes {stable_mosaic.version = 11 : i64} {
  func.func @_fused_linear_kernel(%arg0: i32, %arg1: memref<40x32xf32, #tpu.memory_space<vmem>>, %arg2: memref<1x32xf32, #tpu.memory_space<vmem>>, %arg3: memref<1x32xf32, #tpu.memory_space<vmem>>, %arg4: memref<32x96xbf16, #tpu.memory_space<vmem>>, %arg5: memref<1x96xf32, #tpu.memory_space<vmem>>, %arg6: memref<40x96xf32, #tpu.memory_space<vmem>>) attributes {dimension_semantics = [#tpu.dimension_semantics<parallel>], iteration_bounds = array<i64: 1>, scalar_prefetch = 0 : i64, scratch_operands = 0 : i64, tpu.core_type = #tpu.core_type<tc>, window_params = [{transform_indices = @transform_0, window_bounds = array<i64: 40, 32>}, {pipeline_mode = #tpu.pipeline_mode<synchronous>, transform_indices = @transform_1, window_bounds = array<i64: 1, 32>}, {pipeline_mode = #tpu.pipeline_mode<synchronous>, transform_indices = @transform_2, window_bounds = array<i64: 1, 32>}, {pipeline_mode = #tpu.pipeline_mode<synchronous>, transform_indices = @transform_3, window_bounds = array<i64: 32, 96>}, {pipeline_mode = #tpu.pipeline_mode<synchronous>, transform_indices = @transform_4, window_bounds = array<i64: 1, 96>}, {transform_indices = @transform_5, window_bounds = array<i64: 40, 96>}]} {
    %c0 = arith.constant 0 : index
    %c0_0 = arith.constant 0 : index
    %0 = vector.load %arg1[%c0, %c0_0] : memref<40x32xf32, #tpu.memory_space<vmem>>, vector<40x32xf32>
    %cst = arith.constant dense<0.000000e+00> : vector<40xf32>
    %1 = vector.multi_reduction <add>, %0, %cst [1] : vector<40x32xf32> to vector<40xf32>
    %2 = vector.shape_cast %1 : vector<40xf32> to vector<40x1xf32>
    %cst_1 = arith.constant 3.200000e+01 : f32
    %3 = vector.broadcast %cst_1 : f32 to vector<40x1xf32>
    %4 = arith.divf %2, %3 : vector<40x1xf32>
    %5 = vector.broadcast %4 : vector<40x1xf32> to vector<40x32xf32>
    %6 = arith.subf %0, %5 : vector<40x32xf32>
    %7 = arith.mulf %6, %6 : vector<40x32xf32>
    %cst_2 = arith.constant dense<0.000000e+00> : vector<40xf32>
    %8 = vector.multi_reduction <add>, %7, %cst_2 [1] : vector<40x32xf32> to vector<40xf32>
    %9 = vector.shape_cast %8 : vector<40xf32> to vector<40x1xf32>
    %cst_3 = arith.constant 3.200000e+01 : f32
    %10 = vector.broadcast %cst_3 : f32 to vector<40x1xf32>
    %11 = arith.divf %9, %10 : vector<40x1xf32>
    %cst_4 = arith.constant 9.99999997E-7 : f32
    %12 = vector.broadcast %cst_4 : f32 to vector<40x1xf32>
    %13 = arith.addf %11, %12 : vector<40x1xf32>
    %14 = math.rsqrt %13 : vector<40x1xf32>
    %15 = vector.broadcast %14 : vector<40x1xf32> to vector<40x32xf32>
    %16 = arith.mulf %6, %15 : vector<40x32xf32>
    %c0_5 = arith.constant 0 : index
    %c0_6 = arith.constant 0 : index
    %17 = vector.load %arg2[%c0_5, %c0_6] : memref<1x32xf32, #tpu.memory_space<vmem>>, vector<1x32xf32>
    %18 = vector.broadcast %17 : vector<1x32xf32> to vector<40x32xf32>
    %19 = arith.mulf %16, %18 : vector<40x32xf32>
    %c0_7 = arith.constant 0 : index
    %c0_8 = arith.constant 0 : index
    %20 = vector.load %arg3[%c0_7, %c0_8] : memref<1x32xf32, #tpu.memory_space<vmem>>, vector<1x32xf32>
    %21 = vector.broadcast %20 : vector<1x32xf32> to vector<40x32xf32>
    %22 = arith.addf %19, %21 : vector<40x32xf32>
    %23 = arith.truncf %22 : vector<40x32xf32> to vector<40x32xbf16>
    %c0_9 = arith.constant 0 : index
    %c0_10 = arith.constant 0 : index
    %24 = vector.load %arg4[%c0_9, %c0_10] : memref<32x96xbf16, #tpu.memory_space<vmem>>, vector<32x96xbf16>
    %cst_11 = arith.constant dense<0.000000e+00> : vector<40x96xf32>
    %25 = tpu.matmul %23, %24, %cst_11 {dimension_numbers = #tpu.dot_dimension_numbers<[1], [0], [0], [1], [0, 0, 1, 1], [], []>} : vector<40x32xbf16>, vector<32x96xbf16>, vector<40x96xf32> -> vector<40x96xf32>
    %c0_12 = arith.constant 0 : index
    %c0_13 = arith.constant 0 : index
    %26 = vector.load %arg5[%c0_12, %c0_13] : memref<1x96xf32, #tpu.memory_space<vmem>>, vector<1x96xf32>
    %27 = vector.broadcast %26 : vector<1x96xf32> to vector<40x96xf32>
    %28 = arith.addf %25, %27 : vector<40x96xf32>
    %c0_14 = arith.constant 0 : index
    %c0_15 = arith.constant 0 : index
    %29 = vector.load %arg6[%c0_14, %c0_15] : memref<40x96xf32, #tpu.memory_space<vmem>>, vector<40x96xf32>
    tpu.vector_store %arg6[%c0_14, %c0_15], %28 {strides = array<i32>} : memref<40x96xf32, #tpu.memory_space<vmem>>, vector<40x96xf32>,
    return
  }
  func.func @transform_0(%arg0: i32) -> (i32, i32) {
    %c0_i32 = arith.constant 0 : i32
    %c0_i32_0 = arith.constant 0 : i32
    return %arg0, %c0_i32 : i32, i32
  }
  func.func @transform_1(%arg0: i32) -> (i32, i32) {
    %c0_i32 = arith.constant 0 : i32
    %c0_i32_0 = arith.constant 0 : i32
    %c0_i32_1 = arith.constant 0 : i32
    return %c0_i32, %c0_i32_0 : i32, i32
  }
  func.func @transform_2(%arg0: i32) -> (i32, i32) {
    %c0_i32 = arith.constant 0 : i32
    %c0_i32_0 = arith.constant 0 : i32
    %c0_i32_1 = arith.constant 0 : i32
    return %c0_i32, %c0_i32_0 : i32, i32
  }
  func.func @transform_3(%arg0: i32) -> (i32, i32) {
    %c0_i32 = arith.constant 0 : i32
    %c0_i32_0 = arith.constant 0 : i32
    %c0_i32_1 = arith.constant 0 : i32
    return %c0_i32, %c0_i32_0 : i32, i32
  }
  func.func @transform_4(%arg0: i32) -> (i32, i32) {
    %c0_i32 = arith.constant 0 : i32
    %c0_i32_0 = arith.constant 0 : i32
    %c0_i32_1 = arith.constant 0 : i32
    return %c0_i32, %c0_i32_0 : i32, i32
  }
  func.func @transform_5(%arg0: i32) -> (i32, i32) {
    %c0_i32 = arith.constant 0 : i32
    %c0_i32_0 = arith.constant 0 : i32
    return %arg0, %c0_i32 : i32, i32
  }
}

module attributes {stable_mosaic.version = 11 : i64} {
  func.func @_attention_kernel(%arg0: i32, %arg1: memref<16x5x8xf32, #tpu.memory_space<vmem>>, %arg2: memref<16x5x8xf32, #tpu.memory_space<vmem>>, %arg3: memref<16x5x8xf32, #tpu.memory_space<vmem>>, %arg4: memref<16x5x8xf32, #tpu.memory_space<vmem>>) attributes {dimension_semantics = [#tpu.dimension_semantics<parallel>], iteration_bounds = array<i64: 2>, scalar_prefetch = 0 : i64, scratch_operands = 0 : i64, tpu.core_type = #tpu.core_type<tc>, window_params = [{transform_indices = @transform_0, window_bounds = array<i64: 16, 5, 8>}, {transform_indices = @transform_1, window_bounds = array<i64: 16, 5, 8>}, {transform_indices = @transform_2, window_bounds = array<i64: 16, 5, 8>}, {transform_indices = @transform_3, window_bounds = array<i64: 16, 5, 8>}]} {
    %c0 = arith.constant 0 : index
    %c0_0 = arith.constant 0 : index
    %c0_1 = arith.constant 0 : index
    %0 = vector.load %arg1[%c0, %c0_0, %c0_1] : memref<16x5x8xf32, #tpu.memory_space<vmem>>, vector<16x5x8xf32>
    %cst = arith.constant 0.353553385 : f32
    %1 = vector.broadcast %cst : f32 to vector<16x5x8xf32>
    %2 = arith.mulf %0, %1 : vector<16x5x8xf32>
    %3 = arith.truncf %2 : vector<16x5x8xf32> to vector<16x5x8xbf16>
    %c0_2 = arith.constant 0 : index
    %c0_3 = arith.constant 0 : index
    %c0_4 = arith.constant 0 : index
    %4 = vector.load %arg2[%c0_2, %c0_3, %c0_4] : memref<16x5x8xf32, #tpu.memory_space<vmem>>, vector<16x5x8xf32>
    %5 = arith.truncf %4 : vector<16x5x8xf32> to vector<16x5x8xbf16>
    %c0_5 = arith.constant 0 : index
    %c0_6 = arith.constant 0 : index
    %c0_7 = arith.constant 0 : index
    %6 = vector.load %arg3[%c0_5, %c0_6, %c0_7] : memref<16x5x8xf32, #tpu.memory_space<vmem>>, vector<16x5x8xf32>
    %7 = arith.truncf %6 : vector<16x5x8xf32> to vector<16x5x8xbf16>
    "tpu.trace_start"() <{level = 10 : i32, message = "bqd,bkd->bqk"}> : () -> ()
    %cst_8 = arith.constant dense<0.000000e+00> : vector<16x5x5xf32>
    %8 = tpu.matmul %3, %5, %cst_8 {dimension_numbers = #tpu.dot_dimension_numbers<[2], [2], [1], [1], [0, 0, 0, 1, 1, 1], [0], [0]>} : vector<16x5x8xbf16>, vector<16x5x8xbf16>, vector<16x5x5xf32> -> vector<16x5x5xf32>
    "tpu.trace_stop"() : () -> ()
    %cst_9 = arith.constant dense<0xFF800000> : vector<16x5xf32>
    %9 = vector.multi_reduction <maximumf>, %8, %cst_9 [2] : vector<16x5x5xf32> to vector<16x5xf32>
    %10 = vector.shape_cast %9 : vector<16x5xf32> to vector<16x5x1xf32>
    %11 = vector.broadcast %10 : vector<16x5x1xf32> to vector<16x5x5xf32>
    %12 = arith.subf %8, %11 : vector<16x5x5xf32>
    %13 = math.exp %12 : vector<16x5x5xf32>
    %cst_10 = arith.constant dense<0.000000e+00> : vector<16x5xf32>
    %14 = vector.multi_reduction <add>, %13, %cst_10 [2] : vector<16x5x5xf32> to vector<16x5xf32>
    %15 = vector.shape_cast %14 : vector<16x5xf32> to vector<16x5x1xf32>
    %16 = arith.truncf %13 : vector<16x5x5xf32> to vector<16x5x5xbf16>
    "tpu.trace_start"() <{level = 10 : i32, message = "bqk,bkd->bqd"}> : () -> ()
    %cst_11 = arith.constant dense<0.000000e+00> : vector<16x5x8xf32>
    %17 = tpu.matmul %16, %7, %cst_11 {dimension_numbers = #tpu.dot_dimension_numbers<[2], [1], [1], [2], [0, 0, 0, 1, 1, 2], [0], [0]>} : vector<16x5x5xbf16>, vector<16x5x8xbf16>, vector<16x5x8xf32> -> vector<16x5x8xf32>
    "tpu.trace_stop"() : () -> ()
    %18 = tpu.reciprocal %15 {approx = true} : vector<16x5x1xf32> -> vector<16x5x1xf32>
    %19 = vector.broadcast %18 : vector<16x5x1xf32> to vector<16x5x8xf32>
    %20 = arith.mulf %17, %19 : vector<16x5x8xf32>
    %c0_12 = arith.constant 0 : index
    %c0_13 = arith.constant 0 : index
    %c0_14 = arith.constant 0 : index
    %21 = vector.load %arg4[%c0_12, %c0_13, %c0_14] : memref<16x5x8xf32, #tpu.memory_space<vmem>>, vector<16x5x8xf32>
    tpu.vector_store %arg4[%c0_12, %c0_13, %c0_14], %20 {strides = array<i32>} : memref<16x5x8xf32, #tpu.memory_space<vmem>>, vector<16x5x8xf32>,
    return
  }
  func.func @transform_0(%arg0: i32) -> (i32, i32, i32) {
    %c0_i32 = arith.constant 0 : i32
    %c0_i32_0 = arith.constant 0 : i32
    %c0_i32_1 = arith.constant 0 : i32
    return %arg0, %c0_i32, %c0_i32_0 : i32, i32, i32
  }
  func.func @transform_1(%arg0: i32) -> (i32, i32, i32) {
    %c0_i32 = arith.constant 0 : i32
    %c0_i32_0 = arith.constant 0 : i32
    %c0_i32_1 = arith.constant 0 : i32
    return %arg0, %c0_i32, %c0_i32_0 : i32, i32, i32
  }
  func.func @transform_2(%arg0: i32) -> (i32, i32, i32) {
    %c0_i32 = arith.constant 0 : i32
    %c0_i32_0 = arith.constant 0 : i32
    %c0_i32_1 = arith.constant 0 : i32
    return %arg0, %c0_i32, %c0_i32_0 : i32, i32, i32
  }
  func.func @transform_3(%arg0: i32) -> (i32, i32, i32) {
    %c0_i32 = arith.constant 0 : i32
    %c0_i32_0 = arith.constant 0 : i32
    %c0_i32_1 = arith.constant 0 : i32
    return %arg0, %c0_i32, %c0_i32_0 : i32, i32, i32
  }
}

module attributes {stable_mosaic.version = 11 : i64} {
  func.func @_fused_linear_kernel(%arg0: i32, %arg1: memref<40x32xf32, #tpu.memory_space<vmem>>, %arg2: memref<32x32xbf16, #tpu.memory_space<vmem>>, %arg3: memref<1x32xf32, #tpu.memory_space<vmem>>, %arg4: memref<40x32xf32, #tpu.memory_space<vmem>>) attributes {dimension_semantics = [#tpu.dimension_semantics<parallel>], iteration_bounds = array<i64: 1>, scalar_prefetch = 0 : i64, scratch_operands = 0 : i64, tpu.core_type = #tpu.core_type<tc>, window_params = [{transform_indices = @transform_0, window_bounds = array<i64: 40, 32>}, {pipeline_mode = #tpu.pipeline_mode<synchronous>, transform_indices = @transform_1, window_bounds = array<i64: 32, 32>}, {pipeline_mode = #tpu.pipeline_mode<synchronous>, transform_indices = @transform_2, window_bounds = array<i64: 1, 32>}, {transform_indices = @transform_3, window_bounds = array<i64: 40, 32>}]} {
    %c0 = arith.constant 0 : index
    %c0_0 = arith.constant 0 : index
    %0 = vector.load %arg1[%c0, %c0_0] : memref<40x32xf32, #tpu.memory_space<vmem>>, vector<40x32xf32>
    %1 = arith.truncf %0 : vector<40x32xf32> to vector<40x32xbf16>
    %c0_1 = arith.constant 0 : index
    %c0_2 = arith.constant 0 : index
    %2 = vector.load %arg2[%c0_1, %c0_2] : memref<32x32xbf16, #tpu.memory_space<vmem>>, vector<32x32xbf16>
    %cst = arith.constant dense<0.000000e+00> : vector<40x32xf32>
    %3 = tpu.matmul %1, %2, %cst {dimension_numbers = #tpu.dot_dimension_numbers<[1], [0], [0], [1], [0, 0, 1, 1], [], []>} : vector<40x32xbf16>, vector<32x32xbf16>, vector<40x32xf32> -> vector<40x32xf32>
    %c0_3 = arith.constant 0 : index
    %c0_4 = arith.constant 0 : index
    %4 = vector.load %arg3[%c0_3, %c0_4] : memref<1x32xf32, #tpu.memory_space<vmem>>, vector<1x32xf32>
    %5 = vector.broadcast %4 : vector<1x32xf32> to vector<40x32xf32>
    %6 = arith.addf %3, %5 : vector<40x32xf32>
    %c0_5 = arith.constant 0 : index
    %c0_6 = arith.constant 0 : index
    %7 = vector.load %arg4[%c0_5, %c0_6] : memref<40x32xf32, #tpu.memory_space<vmem>>, vector<40x32xf32>
    tpu.vector_store %arg4[%c0_5, %c0_6], %6 {strides = array<i32>} : memref<40x32xf32, #tpu.memory_space<vmem>>, vector<40x32xf32>,
    return
  }
  func.func @transform_0(%arg0: i32) -> (i32, i32) {
    %c0_i32 = arith.constant 0 : i32
    %c0_i32_0 = arith.constant 0 : i32
    return %arg0, %c0_i32 : i32, i32
  }
  func.func @transform_1(%arg0: i32) -> (i32, i32) {
    %c0_i32 = arith.constant 0 : i32
    %c0_i32_0 = arith.constant 0 : i32
    %c0_i32_1 = arith.constant 0 : i32
    return %c0_i32, %c0_i32_0 : i32, i32
  }
  func.func @transform_2(%arg0: i32) -> (i32, i32) {
    %c0_i32 = arith.constant 0 : i32
    %c0_i32_0 = arith.constant 0 : i32
    %c0_i32_1 = arith.constant 0 : i32
    return %c0_i32, %c0_i32_0 : i32, i32
  }
  func.func @transform_3(%arg0: i32) -> (i32, i32) {
    %c0_i32 = arith.constant 0 : i32
    %c0_i32_0 = arith.constant 0 : i32
    return %arg0, %c0_i32 : i32, i32
  }
}

module attributes {stable_mosaic.version = 11 : i64} {
  func.func @_fused_linear_kernel(%arg0: i32, %arg1: memref<40x32xf32, #tpu.memory_space<vmem>>, %arg2: memref<1x32xf32, #tpu.memory_space<vmem>>, %arg3: memref<1x32xf32, #tpu.memory_space<vmem>>, %arg4: memref<32x64xbf16, #tpu.memory_space<vmem>>, %arg5: memref<1x64xf32, #tpu.memory_space<vmem>>, %arg6: memref<40x64xf32, #tpu.memory_space<vmem>>) attributes {dimension_semantics = [#tpu.dimension_semantics<parallel>], iteration_bounds = array<i64: 1>, scalar_prefetch = 0 : i64, scratch_operands = 0 : i64, tpu.core_type = #tpu.core_type<tc>, window_params = [{transform_indices = @transform_0, window_bounds = array<i64: 40, 32>}, {pipeline_mode = #tpu.pipeline_mode<synchronous>, transform_indices = @transform_1, window_bounds = array<i64: 1, 32>}, {pipeline_mode = #tpu.pipeline_mode<synchronous>, transform_indices = @transform_2, window_bounds = array<i64: 1, 32>}, {pipeline_mode = #tpu.pipeline_mode<synchronous>, transform_indices = @transform_3, window_bounds = array<i64: 32, 64>}, {pipeline_mode = #tpu.pipeline_mode<synchronous>, transform_indices = @transform_4, window_bounds = array<i64: 1, 64>}, {transform_indices = @transform_5, window_bounds = array<i64: 40, 64>}]} {
    %c0 = arith.constant 0 : index
    %c0_0 = arith.constant 0 : index
    %0 = vector.load %arg1[%c0, %c0_0] : memref<40x32xf32, #tpu.memory_space<vmem>>, vector<40x32xf32>
    %cst = arith.constant dense<0.000000e+00> : vector<40xf32>
    %1 = vector.multi_reduction <add>, %0, %cst [1] : vector<40x32xf32> to vector<40xf32>
    %2 = vector.shape_cast %1 : vector<40xf32> to vector<40x1xf32>
    %cst_1 = arith.constant 3.200000e+01 : f32
    %3 = vector.broadcast %cst_1 : f32 to vector<40x1xf32>
    %4 = arith.divf %2, %3 : vector<40x1xf32>
    %5 = vector.broadcast %4 : vector<40x1xf32> to vector<40x32xf32>
    %6 = arith.subf %0, %5 : vector<40x32xf32>
    %7 = arith.mulf %6, %6 : vector<40x32xf32>
    %cst_2 = arith.constant dense<0.000000e+00> : vector<40xf32>
    %8 = vector.multi_reduction <add>, %7, %cst_2 [1] : vector<40x32xf32> to vector<40xf32>
    %9 = vector.shape_cast %8 : vector<40xf32> to vector<40x1xf32>
    %cst_3 = arith.constant 3.200000e+01 : f32
    %10 = vector.broadcast %cst_3 : f32 to vector<40x1xf32>
    %11 = arith.divf %9, %10 : vector<40x1xf32>
    %cst_4 = arith.constant 9.99999997E-7 : f32
    %12 = vector.broadcast %cst_4 : f32 to vector<40x1xf32>
    %13 = arith.addf %11, %12 : vector<40x1xf32>
    %14 = math.rsqrt %13 : vector<40x1xf32>
    %15 = vector.broadcast %14 : vector<40x1xf32> to vector<40x32xf32>
    %16 = arith.mulf %6, %15 : vector<40x32xf32>
    %c0_5 = arith.constant 0 : index
    %c0_6 = arith.constant 0 : index
    %17 = vector.load %arg2[%c0_5, %c0_6] : memref<1x32xf32, #tpu.memory_space<vmem>>, vector<1x32xf32>
    %18 = vector.broadcast %17 : vector<1x32xf32> to vector<40x32xf32>
    %19 = arith.mulf %16, %18 : vector<40x32xf32>
    %c0_7 = arith.constant 0 : index
    %c0_8 = arith.constant 0 : index
    %20 = vector.load %arg3[%c0_7, %c0_8] : memref<1x32xf32, #tpu.memory_space<vmem>>, vector<1x32xf32>
    %21 = vector.broadcast %20 : vector<1x32xf32> to vector<40x32xf32>
    %22 = arith.addf %19, %21 : vector<40x32xf32>
    %23 = arith.truncf %22 : vector<40x32xf32> to vector<40x32xbf16>
    %c0_9 = arith.constant 0 : index
    %c0_10 = arith.constant 0 : index
    %24 = vector.load %arg4[%c0_9, %c0_10] : memref<32x64xbf16, #tpu.memory_space<vmem>>, vector<32x64xbf16>
    %cst_11 = arith.constant dense<0.000000e+00> : vector<40x64xf32>
    %25 = tpu.matmul %23, %24, %cst_11 {dimension_numbers = #tpu.dot_dimension_numbers<[1], [0], [0], [1], [0, 0, 1, 1], [], []>} : vector<40x32xbf16>, vector<32x64xbf16>, vector<40x64xf32> -> vector<40x64xf32>
    %c0_12 = arith.constant 0 : index
    %c0_13 = arith.constant 0 : index
    %26 = vector.load %arg5[%c0_12, %c0_13] : memref<1x64xf32, #tpu.memory_space<vmem>>, vector<1x64xf32>
    %27 = vector.broadcast %26 : vector<1x64xf32> to vector<40x64xf32>
    %28 = arith.addf %25, %27 : vector<40x64xf32>
    %cst_14 = arith.constant 5.000000e-01 : f32
    %29 = vector.broadcast %cst_14 : f32 to vector<40x64xf32>
    %30 = arith.mulf %29, %28 : vector<40x64xf32>
    %cst_15 = arith.constant 0.707106769 : f32
    %31 = vector.broadcast %cst_15 : f32 to vector<40x64xf32>
    %32 = arith.mulf %28, %31 : vector<40x64xf32>
    %33 = math.erf %32 : vector<40x64xf32>
    %cst_16 = arith.constant 1.000000e+00 : f32
    %34 = vector.broadcast %cst_16 : f32 to vector<40x64xf32>
    %35 = arith.addf %34, %33 : vector<40x64xf32>
    %36 = arith.mulf %30, %35 : vector<40x64xf32>
    %c0_17 = arith.constant 0 : index
    %c0_18 = arith.constant 0 : index
    %37 = vector.load %arg6[%c0_17, %c0_18] : memref<40x64xf32, #tpu.memory_space<vmem>>, vector<40x64xf32>
    tpu.vector_store %arg6[%c0_17, %c0_18], %36 {strides = array<i32>} : memref<40x64xf32, #tpu.memory_space<vmem>>, vector<40x64xf32>,
    return
  }
  func.func @transform_0(%arg0: i32) -> (i32, i32) {
    %c0_i32 = arith.constant 0 : i32
    %c0_i32_0 = arith.constant 0 : i32
    return %arg0, %c0_i32 : i32, i32
  }
  func.func @transform_1(%arg0: i32) -> (i32, i32) {
    %c0_i32 = arith.constant 0 : i32
    %c0_i32_0 = arith.constant 0 : i32
    %c0_i32_1 = arith.constant 0 : i32
    return %c0_i32, %c0_i32_0 : i32, i32
  }
  func.func @transform_2(%arg0: i32) -> (i32, i32) {
    %c0_i32 = arith.constant 0 : i32
    %c0_i32_0 = arith.constant 0 : i32
    %c0_i32_1 = arith.constant 0 : i32
    return %c0_i32, %c0_i32_0 : i32, i32
  }
  func.func @transform_3(%arg0: i32) -> (i32, i32) {
    %c0_i32 = arith.constant 0 : i32
    %c0_i32_0 = arith.constant 0 : i32
    %c0_i32_1 = arith.constant 0 : i32
    return %c0_i32, %c0_i32_0 : i32, i32
  }
  func.func @transform_4(%arg0: i32) -> (i32, i32) {
    %c0_i32 = arith.constant 0 : i32
    %c0_i32_0 = arith.constant 0 : i32
    %c0_i32_1 = arith.constant 0 : i32
    return %c0_i32, %c0_i32_0 : i32, i32
  }
  func.func @transform_5(%arg0: i32) -> (i32, i32) {
    %c0_i32 = arith.constant 0 : i32
    %c0_i32_0 = arith.constant 0 : i32
    return %arg0, %c0_i32 : i32, i32
  }
}

module attributes {stable_mosaic.version = 11 : i64} {
  func.func @_fused_linear_kernel(%arg0: i32, %arg1: memref<40x64xf32, #tpu.memory_space<vmem>>, %arg2: memref<64x32xbf16, #tpu.memory_space<vmem>>, %arg3: memref<1x32xf32, #tpu.memory_space<vmem>>, %arg4: memref<40x32xf32, #tpu.memory_space<vmem>>, %arg5: memref<40x32xf32, #tpu.memory_space<vmem>>) attributes {dimension_semantics = [#tpu.dimension_semantics<parallel>], iteration_bounds = array<i64: 1>, scalar_prefetch = 0 : i64, scratch_operands = 0 : i64, tpu.core_type = #tpu.core_type<tc>, window_params = [{transform_indices = @transform_0, window_bounds = array<i64: 40, 64>}, {pipeline_mode = #tpu.pipeline_mode<synchronous>, transform_indices = @transform_1, window_bounds = array<i64: 64, 32>}, {pipeline_mode = #tpu.pipeline_mode<synchronous>, transform_indices = @transform_2, window_bounds = array<i64: 1, 32>}, {transform_indices = @transform_3, window_bounds = array<i64: 40, 32>}, {transform_indices = @transform_4, window_bounds = array<i64: 40, 32>}]} {
    %c0 = arith.constant 0 : index
    %c0_0 = arith.constant 0 : index
    %0 = vector.load %arg1[%c0, %c0_0] : memref<40x64xf32, #tpu.memory_space<vmem>>, vector<40x64xf32>
    %1 = arith.truncf %0 : vector<40x64xf32> to vector<40x64xbf16>
    %c0_1 = arith.constant 0 : index
    %c0_2 = arith.constant 0 : index
    %2 = vector.load %arg2[%c0_1, %c0_2] : memref<64x32xbf16, #tpu.memory_space<vmem>>, vector<64x32xbf16>
    %cst = arith.constant dense<0.000000e+00> : vector<40x32xf32>
    %3 = tpu.matmul %1, %2, %cst {dimension_numbers = #tpu.dot_dimension_numbers<[1], [0], [0], [1], [0, 0, 1, 1], [], []>} : vector<40x64xbf16>, vector<64x32xbf16>, vector<40x32xf32> -> vector<40x32xf32>
    %c0_3 = arith.constant 0 : index
    %c0_4 = arith.constant 0 : index
    %4 = vector.load %arg3[%c0_3, %c0_4] : memref<1x32xf32, #tpu.memory_space<vmem>>, vector<1x32xf32>
    %5 = vector.broadcast %4 : vector<1x32xf32> to vector<40x32xf32>
    %6 = arith.addf %3, %5 : vector<40x32xf32>
    %c0_5 = arith.constant 0 : index
    %c0_6 = arith.constant 0 : index
    %7 = vector.load %arg4[%c0_5, %c0_6] : memref<40x32xf32, #tpu.memory_space<vmem>>, vector<40x32xf32>
    %8 = arith.addf %6, %7 : vector<40x32xf32>
    %c0_7 = arith.constant 0 : index
    %c0_8 = arith.constant 0 : index
    %9 = vector.load %arg5[%c0_7, %c0_8] : memref<40x32xf32, #tpu.memory_space<vmem>>, vector<40x32xf32>
    tpu.vector_store %arg5[%c0_7, %c0_8], %8 {strides = array<i32>} : memref<40x32xf32, #tpu.memory_space<vmem>>, vector<40x32xf32>,
    return
  }
  func.func @transform_0(%arg0: i32) -> (i32, i32) {
    %c0_i32 = arith.constant 0 : i32
    %c0_i32_0 = arith.constant 0 : i32
    return %arg0, %c0_i32 : i32, i32
  }
  func.func @transform_1(%arg0: i32) -> (i32, i32) {
    %c0_i32 = arith.constant 0 : i32
    %c0_i32_0 = arith.constant 0 : i32
    %c0_i32_1 = arith.constant 0 : i32
    return %c0_i32, %c0_i32_0 : i32, i32
  }
  func.func @transform_2(%arg0: i32) -> (i32, i32) {
    %c0_i32 = arith.constant 0 : i32
    %c0_i32_0 = arith.constant 0 : i32
    %c0_i32_1 = arith.constant 0 : i32
    return %c0_i32, %c0_i32_0 : i32, i32
  }
  func.func @transform_3(%arg0: i32) -> (i32, i32) {
    %c0_i32 = arith.constant 0 : i32
    %c0_i32_0 = arith.constant 0 : i32
    return %arg0, %c0_i32 : i32, i32
  }
  func.func @transform_4(%arg0: i32) -> (i32, i32) {
    %c0_i32 = arith.constant 0 : i32
    %c0_i32_0 = arith.constant 0 : i32
    return %arg0, %c0_i32 : i32, i32
  }
}

module attributes {stable_mosaic.version = 11 : i64} {
  func.func @_layernorm_kernel(%arg0: i32, %arg1: memref<40x32xf32, #tpu.memory_space<vmem>>, %arg2: memref<1x32xf32, #tpu.memory_space<vmem>>, %arg3: memref<1x32xf32, #tpu.memory_space<vmem>>, %arg4: memref<40x32xf32, #tpu.memory_space<vmem>>) attributes {dimension_semantics = [#tpu.dimension_semantics<parallel>], iteration_bounds = array<i64: 1>, scalar_prefetch = 0 : i64, scratch_operands = 0 : i64, tpu.core_type = #tpu.core_type<tc>, window_params = [{transform_indices = @transform_0, window_bounds = array<i64: 40, 32>}, {pipeline_mode = #tpu.pipeline_mode<synchronous>, transform_indices = @transform_1, window_bounds = array<i64: 1, 32>}, {pipeline_mode = #tpu.pipeline_mode<synchronous>, transform_indices = @transform_2, window_bounds = array<i64: 1, 32>}, {transform_indices = @transform_3, window_bounds = array<i64: 40, 32>}]} {
    %c0 = arith.constant 0 : index
    %c0_0 = arith.constant 0 : index
    %0 = vector.load %arg1[%c0, %c0_0] : memref<40x32xf32, #tpu.memory_space<vmem>>, vector<40x32xf32>
    %cst = arith.constant dense<0.000000e+00> : vector<40xf32>
    %1 = vector.multi_reduction <add>, %0, %cst [1] : vector<40x32xf32> to vector<40xf32>
    %2 = vector.shape_cast %1 : vector<40xf32> to vector<40x1xf32>
    %cst_1 = arith.constant 3.200000e+01 : f32
    %3 = vector.broadcast %cst_1 : f32 to vector<40x1xf32>
    %4 = arith.divf %2, %3 : vector<40x1xf32>
    %5 = vector.broadcast %4 : vector<40x1xf32> to vector<40x32xf32>
    %6 = arith.subf %0, %5 : vector<40x32xf32>
    %7 = arith.mulf %6, %6 : vector<40x32xf32>
    %cst_2 = arith.constant dense<0.000000e+00> : vector<40xf32>
    %8 = vector.multi_reduction <add>, %7, %cst_2 [1] : vector<40x32xf32> to vector<40xf32>
    %9 = vector.shape_cast %8 : vector<40xf32> to vector<40x1xf32>
    %cst_3 = arith.constant 3.200000e+01 : f32
    %10 = vector.broadcast %cst_3 : f32 to vector<40x1xf32>
    %11 = arith.divf %9, %10 : vector<40x1xf32>
    %cst_4 = arith.constant 9.99999997E-7 : f32
    %12 = vector.broadcast %cst_4 : f32 to vector<40x1xf32>
    %13 = arith.addf %11, %12 : vector<40x1xf32>
    %14 = math.rsqrt %13 : vector<40x1xf32>
    %15 = vector.broadcast %14 : vector<40x1xf32> to vector<40x32xf32>
    %16 = arith.mulf %6, %15 : vector<40x32xf32>
    %c0_5 = arith.constant 0 : index
    %c0_6 = arith.constant 0 : index
    %17 = vector.load %arg2[%c0_5, %c0_6] : memref<1x32xf32, #tpu.memory_space<vmem>>, vector<1x32xf32>
    %18 = vector.broadcast %17 : vector<1x32xf32> to vector<40x32xf32>
    %19 = arith.mulf %16, %18 : vector<40x32xf32>
    %c0_7 = arith.constant 0 : index
    %c0_8 = arith.constant 0 : index
    %20 = vector.load %arg3[%c0_7, %c0_8] : memref<1x32xf32, #tpu.memory_space<vmem>>, vector<1x32xf32>
    %21 = vector.broadcast %20 : vector<1x32xf32> to vector<40x32xf32>
    %22 = arith.addf %19, %21 : vector<40x32xf32>
    %c0_9 = arith.constant 0 : index
    %c0_10 = arith.constant 0 : index
    %23 = vector.load %arg4[%c0_9, %c0_10] : memref<40x32xf32, #tpu.memory_space<vmem>>, vector<40x32xf32>
    tpu.vector_store %arg4[%c0_9, %c0_10], %22 {strides = array<i32>} : memref<40x32xf32, #tpu.memory_space<vmem>>, vector<40x32xf32>,
    return
  }
  func.func @transform_0(%arg0: i32) -> (i32, i32) {
    %c0_i32 = arith.constant 0 : i32
    %c0_i32_0 = arith.constant 0 : i32
    return %arg0, %c0_i32 : i32, i32
  }
  func.func @transform_1(%arg0: i32) -> (i32, i32) {
    %c0_i32 = arith.constant 0 : i32
    %c0_i32_0 = arith.constant 0 : i32
    %c0_i32_1 = arith.constant 0 : i32
    return %c0_i32, %c0_i32_0 : i32, i32
  }
  func.func @transform_2(%arg0: i32) -> (i32, i32) {
    %c0_i32 = arith.constant 0 : i32
    %c0_i32_0 = arith.constant 0 : i32
    %c0_i32_1 = arith.constant 0 : i32
    return %c0_i32, %c0_i32_0 : i32, i32
  }
  func.func @transform_3(%arg0: i32) -> (i32, i32) {
    %c0_i32 = arith.constant 0 : i32
    %c0_i32_0 = arith.constant 0 : i32
    return %arg0, %c0_i32 : i32, i32
  }
}

module attributes {stable_mosaic.version = 11 : i64} {
  func.func @_meanpool_kernel(%arg0: i32, %arg1: memref<1x17x32xf32, #tpu.memory_space<vmem>>, %arg2: memref<1x1x32xf32, #tpu.memory_space<vmem>>) attributes {dimension_semantics = [#tpu.dimension_semantics<parallel>], iteration_bounds = array<i64: 2>, scalar_prefetch = 0 : i64, scratch_operands = 0 : i64, tpu.core_type = #tpu.core_type<tc>, window_params = [{transform_indices = @transform_0, window_bounds = array<i64: 1, 17, 32>}, {transform_indices = @transform_1, window_bounds = array<i64: 1, 1, 32>}]} {
    %c0 = arith.constant 0 : index
    %c0_0 = arith.constant 0 : index
    %c0_1 = arith.constant 0 : index
    %0 = vector.load %arg1[%c0, %c0_0, %c0_1] : memref<1x17x32xf32, #tpu.memory_space<vmem>>, vector<1x17x32xf32>
    %cst = arith.constant dense<0.000000e+00> : vector<1x32xf32>
    %1 = vector.multi_reduction <add>, %0, %cst [1] : vector<1x17x32xf32> to vector<1x32xf32>
    %2 = vector.shape_cast %1 : vector<1x32xf32> to vector<1x1x32xf32>
    %cst_2 = arith.constant 1.700000e+01 : f32
    %3 = vector.broadcast %cst_2 : f32 to vector<1x1x32xf32>
    %4 = arith.divf %2, %3 : vector<1x1x32xf32>
    %c0_3 = arith.constant 0 : index
    %c0_4 = arith.constant 0 : index
    %c0_5 = arith.constant 0 : index
    %5 = vector.load %arg2[%c0_3, %c0_4, %c0_5] : memref<1x1x32xf32, #tpu.memory_space<vmem>>, vector<1x1x32xf32>
    tpu.vector_store %arg2[%c0_3, %c0_4, %c0_5], %4 {strides = array<i32>} : memref<1x1x32xf32, #tpu.memory_space<vmem>>, vector<1x1x32xf32>,
    return
  }
  func.func @transform_0(%arg0: i32) -> (i32, i32, i32) {
    %c0_i32 = arith.constant 0 : i32
    %c0_i32_0 = arith.constant 0 : i32
    %c0_i32_1 = arith.constant 0 : i32
    return %arg0, %c0_i32, %c0_i32_0 : i32, i32, i32
  }
  func.func @transform_1(%arg0: i32) -> (i32, i32, i32) {
    %c0_i32 = arith.constant 0 : i32
    %c0_i32_0 = arith.constant 0 : i32
    %c0_i32_1 = arith.constant 0 : i32
    return %arg0, %c0_i32, %c0_i32_0 : i32, i32, i32
  }
}

</mosaic_0001>

<bundles_post_ra>
// kernel: _lambda_.21
= control target key start
LH: loop header
LB: loop body
LE: loop exit
PB: predicated region body
PF: predicated region fallthrough
CT: control target
= control target key end

     0   :  { %vm127_vm0 = vcmask 523264   ;;  %vm172_vm1 = vcmask 261120   ;;  %s353_s1 = inlined_call_operand.vmem [shape: bf16[192,32], index: 1, kind: input, shape index: {}]   ;;  %s354_s0 = inlined_call_operand.vmem [shape: f32[32,192], index: 0, kind: input, shape index: {}]   ;;  %s355_s2 = inlined_call_operand.vmem [shape: f32[1,32], index: 2, kind: input, shape index: {}]   ;;  %s356_s3 = inlined_call_operand.vmem [shape: f32[32,32], index: 3, kind: output, shape index: {}]  }
   0x1   :  { %v238_v0 = vld [vmem:[%s353_s1 + $0x38] sm:$0xff]  ;;  %v237_v2 = vld [vmem:[%s353_s1 + $0x30] sm:$0xff]  ;;  %v236_v4 = vld [vmem:[%s353_s1 + $0x28] sm:$0xff] }
   0x2   :  { %v242_v1 = vld [vmem:[%s353_s1 + $0x58] sm:$0xff]  ;;  %134 = vmatpush.bf16.msra.mxu0 %v238_v0  ;;  %243 = vmatpush.bf16.msra.mxu2 %v238_v0  ;;  %v241_v3 = vld [vmem:[%s353_s1 + $0x50] sm:$0xff]  ;;  %v240_v5 = vld [vmem:[%s353_s1 + $0x48] sm:$0xff] }
   0x3   :  { %157 = vmatpush.bf16.msra.mxu1 %v242_v1  ;;  %v235_v6 = vld [vmem:[%s353_s1 + $0x20] sm:$0xff]  ;;  %v16_v8 = vld [vmem:[%s354_s0 + $0x8] sm:$0xff]  ;;  %v18_v9 = vld [vmem:[%s354_s0 + $0x18] sm:$0xff] }
   0x4   :  { %v239_v7 = vld [vmem:[%s353_s1 + $0x40] sm:$0xff]  ;;  %v24_v10 = vpack.c.bf16 %v18_v9, %v16_v8  ;;  %v234_v11 = vld [vmem:[%s353_s1 + $0x18] sm:$0xff]  ;;  %v233_v12 = vld [vmem:[%s353_s1 + $0x10] sm:$0xff] }
   0x5   :  { %v232_v13 = vld [vmem:[%s353_s1 + $0x8] sm:$0xff]  ;;  %v231_v14 = vld [vmem:[%s353_s1] sm:$0xff]  ;;  %v17_v16 = vld [vmem:[%s354_s0 + $0x10] sm:$0xff] }
   0x6   :  { %135 = vmatpush.bf16.msra.mxu0 %v237_v2  ;;  %244 = vmatpush.bf16.msra.mxu2 %v237_v2  ;;  %v15_v15 = vld [vmem:[%s354_s0] sm:$0xff]  ;;  %v21_v18 = vld [vmem:[%s354_s0 + $0x30] sm:$0xff]  ;;  %v20_v19 = vld [vmem:[%s354_s0 + $0x28] sm:$0xff] }
   0x7   :  { %158 = vmatpush.bf16.msra.mxu1 %v241_v3  ;;  %v19_v17 = vld [vmem:[%s354_s0 + $0x20] sm:$0xff]  ;;  %v22_v20 = vld [vmem:[%s354_s0 + $0x38] sm:$0xff]  ;;  %v23_v21 = vpack.c.bf16 %v17_v16, %v15_v15 }
   0x8   :  { %v25_v22 = vpack.c.bf16 %v21_v18, %v19_v17  ;;  %v26_v23 = vpack.c.bf16 %v22_v20, %v20_v19  ;;  %v251_v26 = vld [vmem:[%s355_s2] ss:$0 sm:$0xff] }
   0xa   :  { %136 = vmatpush.bf16.msra.mxu0 %v236_v4  ;;  %245 = vmatpush.bf16.msra.mxu2 %v236_v4 }
   0xb   :  { %159 = vmatpush.bf16.msra.mxu1 %v240_v5 }
   0xe   :  { %137 = vmatpush.bf16.msra.mxu0 %v235_v6  ;;  %246 = vmatpush.bf16.msra.mxu2 %v235_v6 }
   0xf   :  { %160 = vmatpush.bf16.msra.mxu1 %v239_v7 }
  0x12   :  { %229 = vmatmul.msk.bf16.vlgmr.msra.gmra.mxu1 %vm127_vm0, %v24_v10  ;;  %138 = vmatpush.bf16.msra.mxu0 %v234_v11 }
  0x13   :  { %247 = vmatpush.bf16.msra.mxu2 %v234_v11 }
  0x16   :  { %139 = vmatpush.bf16.msra.mxu0 %v233_v12 }
  0x17   :  { %248 = vmatpush.bf16.msra.mxu2 %v233_v12 }
  0x1a   :  { %140 = vmatpush.bf16.msra.mxu0 %v232_v13 }
  0x1b   :  { %249 = vmatpush.bf16.msra.mxu2 %v232_v13 }
  0x1e   :  { %141 = vmatpush.bf16.msra.mxu0 %v231_v14 }
  0x1f   :  { %250 = vmatpush.bf16.msra.mxu2 %v231_v14 }
  0x21   :  { %142 = vmatmul.bf16.vlgmr.msra.gmra.mxu0 %v23_v21 }
  0x22   :  { %147 = vmatmul.bf16.vlgmr.msra.gmra.mxu2 %v25_v22  ;;  %230 = vmatmul.msk.bf16.gmra.mxu1 %vm127_vm0, %v26_v23 }
  0x8f   :  { %v162_v24 = vpop.f32.mrf.mxu1 }
  0x97   :  { %v164_v25 = vpop.f32.mrf.mxu1 }
  0x9e   :  { %v143_v27 = vpop.f32.mrf.mxu0 }
  0x9f   :  { %v144_v28 = vadd.f32 %v251_v26, %v143_v27  ;;  %v167_v30 = vpop.f32.mrf.mxu1 }
  0xa1   :  { %v163_v29 = vadd.f32 %v162_v24, %v144_v28 }
  0xa3   :  { %173 = vst.msk [vmem:[%s356_s3] sm:$0xff] %vm172_vm1, %v163_v29 }
  0xa5   :  { %v148_v31 = vpop.f32.mrf.mxu2 }
  0xa6   :  { %v149_v32 = vadd.f32 %v251_v26, %v148_v31  ;;  %v145_v33 = vpop.f32.mrf.mxu0 }
  0xa7   :  { %v146_v34 = vadd.f32 %v251_v26, %v145_v33  ;;  %v169_v39 = vpop.f32.mrf.mxu1 }
  0xa8   :  { %v168_v35 = vadd.f32 %v167_v30, %v149_v32 }
  0xa9   :  { %v165_v36 = vadd.f32 %v164_v25, %v146_v34 }
  0xaa   :  { %175 = vst.msk [vmem:[%s356_s3 + $0x10] sm:$0xff] %vm172_vm1, %v168_v35 }
  0xab   :  { %174 = vst.msk [vmem:[%s356_s3 + $0x8] sm:$0xff] %vm172_vm1, %v165_v36 }
  0xad   :  { %v150_v37 = vpop.f32.mrf.mxu2 }
  0xae   :  { %v151_v38 = vadd.f32 %v251_v26, %v150_v37 }
  0xb0   :  { %v170_v40 = vadd.f32 %v169_v39, %v151_v38 }
  0xb2   :  { %176 = vst.msk [vmem:[%s356_s3 + $0x18] sm:$0xff] %vm172_vm1, %v170_v40 }

// kernel: _lambda_.22
= control target key start
LH: loop header
LB: loop body
LE: loop exit
PB: predicated region body
PF: predicated region fallthrough
CT: control target
= control target key end

     0   :  { %vm25_vm0 = vcmask 261120   ;;  %v221_v8 = vmov 32.0   ;;  %vm184_vm14 = vcmask 785408   ;;  %s321_s0 = inlined_call_operand.vmem [shape: f32[32,32], index: 0, kind: input, shape index: {}]   ;;  %s322_s1 = inlined_call_operand.vmem [shape: f32[1,32], index: 1, kind: input, shape index: {}]   ;;  %s323_s2 = inlined_call_operand.vmem [shape: f32[1,32], index: 2, kind: input, shape index: {}]   ;;  %s324_s4 = inlined_call_operand.vmem [shape: f32[1,96], index: 4, kind: input, shape index: {}]   ;;  %s325_s3 = inlined_call_operand.vmem [shape: bf16[32,96], index: 3, kind: input, shape index: {}]   ;;  %s326_s5 = inlined_call_operand.vmem [shape: f32[32,96], index: 5, kind: output, shape index: {}]  }
   0x1   :  { %v23_v0 = vld [vmem:[%s321_s0 + $0x10] sm:$0xff]  ;;  %v21_v1 = vld [vmem:[%s321_s0] sm:$0xff]  ;;  %v24_v4 = vld [vmem:[%s321_s0 + $0x18] sm:$0xff]  ;;  %211 = vrcp.f32 %v221_v8 }
   0x2   :  { %v32_v2 = vsel %vm25_vm0, %v23_v0, 0.0  ;;  %v26_v3 = vsel %vm25_vm0, %v21_v1, 0.0  ;;  %v22_v5 = vld [vmem:[%s321_s0 + $0x8] sm:$0xff]  ;;  %v35_v6 = vsel %vm25_vm0, %v24_v4, 0.0  ;;  %v203_v40 = vld [vmem:[%s325_s3] sm:$0xff] }
   0x3   :  { %33 = vadd.xlane.f32.xlu1 %v32_v2  ;;  %27 = vadd.xlane.f32.xlu0 %v26_v3  ;;  %v29_v7 = vsel %vm25_vm0, %v22_v5, 0.0  ;;  %v204_v35 = vld [vmem:[%s325_s3 + $0x8] sm:$0xff] }
   0x4   :  { %171 = vmatpush.bf16.msra.mxu0 %v204_v35  ;;  %205 = vmatpush.bf16.msra.mxu1 %v204_v35 }
   0x7   :  { %v212_v9 = vpop.eup %211 }
   0x8   :  { %v39_v10 = vmul.f32 32.0, %v212_v9  ;;  %vm43_vm1 = vweird.f32 %v212_v9  ;;  %172 = vmatpush.bf16.msra.mxu0 %v203_v40  ;;  %206 = vmatpush.bf16.msra.mxu1 %v203_v40 }
   0xa   :  { %v40_v11 = vsub.f32 1.0, %v39_v10  ;;  %v208_v10 = vld [vmem:[%s322_s1] ss:$0 sm:$0xff] }
   0xb   :  { %36 = vadd.xlane.f32.xlu1 %v35_v6  ;;  %30 = vadd.xlane.f32.xlu0 %v29_v7 }
   0xc   :  { %v41_v12 = vmul.f32 %v212_v9, %v40_v11 }
   0xe   :  { %v42_v13 = vadd.f32 %v212_v9, %v41_v12 }
  0x10   :  { %v44_v14 = vsel %vm43_vm1, %v212_v9, %v42_v13 }
  0x76   :  { %v34_v15 = vpop.xlane.xlu1 %33  ;;  %v28_v16 = vpop.xlane.xlu0 %27 }
  0x77   :  { %v47_v17 = vmul.f32 %v44_v14, %v34_v15  ;;  %v45_v18 = vmul.f32 %v44_v14, %v28_v16 }
  0x79   :  { %v268_v19 = vsub.f32 %v23_v0, %v47_v17  ;;  %v270_v20 = vsub.f32 %v21_v1, %v45_v18  ;;  %v209_v17 = vld [vmem:[%s323_s2] ss:$0 sm:$0xff] }
  0x7b   :  { %v55_v21 = vmul.f32 %v268_v19, %v268_v19  ;;  %v53_v22 = vmul.f32 %v270_v20, %v270_v20 }
  0x7d   :  { %v63_v23 = vsel %vm25_vm0, %v55_v21, 0.0  ;;  %v57_v24 = vsel %vm25_vm0, %v53_v22, 0.0 }
  0x7e   :  { %v37_v25 = vpop.xlane.xlu1 %36  ;;  %64 = vadd.xlane.f32.xlu0 %v63_v23  ;;  %58 = vadd.xlane.f32.xlu2 %v57_v24  ;;  %v31_v26 = vpop.xlane.xlu0 %30 }
  0x7f   :  { %v48_v27 = vmul.f32 %v44_v14, %v37_v25  ;;  %v46_v28 = vmul.f32 %v44_v14, %v31_v26 }
  0x81   :  { %v278_v29 = vsub.f32 %v24_v4, %v48_v27  ;;  %v280_v30 = vsub.f32 %v22_v5, %v46_v28 }
  0x83   :  { %v56_v31 = vmul.f32 %v278_v29, %v278_v29  ;;  %v54_v32 = vmul.f32 %v280_v30, %v280_v30 }
  0x85   :  { %v66_v33 = vsel %vm25_vm0, %v56_v31, 0.0  ;;  %v60_v34 = vsel %vm25_vm0, %v54_v32, 0.0 }
  0x86   :  { %67 = vadd.xlane.f32.xlu1 %v66_v33  ;;  %61 = vadd.xlane.f32.xlu2 %v60_v34 }
  0xf1   :  { %v59_v36 = vpop.xlane.xlu2 %58  ;;  %v65_v37 = vpop.xlane.xlu0 %64 }
  0xf2   :  { %v69_v38 = vmul.f32 %v59_v36, %v44_v14  ;;  %v71_v39 = vmul.f32 %v65_v37, %v44_v14 }
  0xf4   :  { %v73_v41 = vadd.f32 1e-06, %v69_v38  ;;  %v75_v42 = vadd.f32 1e-06, %v71_v39 }
  0xf6   :  { %213 = vrsqrt.f32 %v73_v41  ;;  %vm103_vm4 = vweird.f32 %v75_v42  ;;  %vm83_vm5 = vweird.f32 %v73_v41 }
  0xf7   :  { %215 = vrsqrt.f32 %v75_v42 }
  0xf9   :  { %v68_v43 = vpop.xlane.xlu1 %67  ;;  %v62_v44 = vpop.xlane.xlu2 %61 }
  0xfa   :  { %v72_v45 = vmul.f32 %v68_v43, %v44_v14  ;;  %v70_v46 = vmul.f32 %v62_v44, %v44_v14 }
  0xfc   :  { %v214_v47 = vpop.eup %213  ;;  %v76_v48 = vadd.f32 1e-06, %v72_v45  ;;  %v74_v49 = vadd.f32 1e-06, %v70_v46 }
  0xfd   :  { %v216_v50 = vpop.eup %215  ;;  %v78_v51 = vmul.f32 %v214_v47, %v73_v41  ;;  %vm84_vm3 = vweird.f32 %v214_v47 }
  0xfe   :  { %v98_v52 = vmul.f32 %v216_v50, %v75_v42  ;;  %217 = vrsqrt.f32 %v76_v48  ;;  %vm104_vm2 = vweird.f32 %v216_v50  ;;  %vm85_vm7 = vmor %vm83_vm5, %vm84_vm3  ;;  %vm113_vm10 = vweird.f32 %v76_v48 }
  0xff   :  { %v79_v53 = vmul.f32 %v214_v47, %v78_v51  ;;  %219 = vrsqrt.f32 %v74_v49  ;;  %vm105_vm6 = vmor %vm103_vm4, %vm104_vm2  ;;  %vm93_vm12 = vweird.f32 %v74_v49 }
 0x100   :  { %v99_v54 = vmul.f32 %v216_v50, %v98_v52 }
 0x101   :  { %v80_v55 = vmul.f32 0.5, %v79_v53 }
 0x102   :  { %v100_v56 = vmul.f32 0.5, %v99_v54 }
 0x103   :  { %v81_v57 = vsub.f32 1.5, %v80_v55 }
 0x104   :  { %v218_v58 = vpop.eup %217  ;;  %v101_v59 = vsub.f32 1.5, %v100_v56 }
 0x105   :  { %v220_v60 = vpop.eup %219  ;;  %v108_v61 = vmul.f32 %v218_v58, %v76_v48  ;;  %v82_v62 = vmul.f32 %v214_v47, %v81_v57  ;;  %vm114_vm8 = vweird.f32 %v218_v58 }
 0x106   :  { %v102_v63 = vmul.f32 %v216_v50, %v101_v59  ;;  %v88_v0 = vmul.f32 %v220_v60, %v74_v49  ;;  %vm94_vm9 = vweird.f32 %v220_v60  ;;  %vm115_vm11 = vmor %vm113_vm10, %vm114_vm8 }
 0x107   :  { %v109_v1 = vmul.f32 %v218_v58, %v108_v61  ;;  %v86_v5 = vsel %vm85_vm7, %v214_v47, %v82_v62  ;;  %vm95_vm13 = vmor %vm93_vm12, %vm94_vm9 }
 0x108   :  { %v89_v2 = vmul.f32 %v220_v60, %v88_v0  ;;  %v106_v3 = vsel %vm105_vm6, %v216_v50, %v102_v63  ;;  %v117_v11 = vmul.f32 %v86_v5, %v270_v20 }
 0x109   :  { %v110_v4 = vmul.f32 0.5, %v109_v1  ;;  %v119_v8 = vmul.f32 %v106_v3, %v268_v19 }
 0x10a   :  { %v90_v6 = vmul.f32 0.5, %v89_v2  ;;  %v125_v21 = vmul.f32 %v208_v10, %v117_v11 }
 0x10b   :  { %v111_v7 = vsub.f32 1.5, %v110_v4  ;;  %v127_v18 = vmul.f32 %v208_v10, %v119_v8 }
 0x10c   :  { %v91_v9 = vsub.f32 1.5, %v90_v6  ;;  %v133_v25 = vadd.f32 %v209_v17, %v125_v21 }
 0x10d   :  { %v112_v12 = vmul.f32 %v218_v58, %v111_v7  ;;  %v135_v23 = vadd.f32 %v209_v17, %v127_v18 }
 0x10e   :  { %v92_v13 = vmul.f32 %v220_v60, %v91_v9 }
 0x10f   :  { %v116_v14 = vsel %vm115_vm11, %v218_v58, %v112_v12 }
 0x110   :  { %v120_v15 = vmul.f32 %v116_v14, %v278_v29  ;;  %v96_v16 = vsel %vm95_vm13, %v220_v60, %v92_v13  ;;  %v210_v29 = vld [vmem:[%s324_s4] ss:$0 sm:$0xff] }
 0x111   :  { %v118_v19 = vmul.f32 %v96_v16, %v280_v30 }
 0x112   :  { %v128_v22 = vmul.f32 %v208_v10, %v120_v15 }
 0x113   :  { %v126_v20 = vmul.f32 %v208_v10, %v118_v19 }
 0x114   :  { %v136_v24 = vadd.f32 %v209_v17, %v128_v22 }
 0x115   :  { %v134_v26 = vadd.f32 %v209_v17, %v126_v20 }
 0x116   :  { %v138_v27 = vpack.c.bf16 %v136_v24, %v135_v23 }
 0x117   :  { %v137_v28 = vpack.c.bf16 %v134_v26, %v133_v25 }
 0x118   :  { %202 = vmatmul.msk.bf16.vlgmr.msra.gmra.mxu1 %vm25_vm0, %v138_v27 }
 0x119   :  { %201 = vmatmul.msk.bf16.vlgmr.msra.gmra.mxu0 %vm25_vm0, %v137_v28 }
 0x195   :  { %v179_v31 = vpop.f32.mrf.mxu1 }
 0x196   :  { %v174_v30 = vpop.f32.mrf.mxu0  ;;  %v180_v32 = vadd.f32 %v210_v29, %v179_v31 }
 0x197   :  { %v175_v33 = vadd.f32 %v210_v29, %v174_v30 }
 0x198   :  { %187 = vst.msk [vmem:[%s326_s5 + $0x10] sm:$0xff] %vm184_vm14, %v180_v32 }
 0x199   :  { %185 = vst.msk [vmem:[%s326_s5] sm:$0xff] %vm184_vm14, %v175_v33 }
 0x19d   :  { %v181_v34 = vpop.f32.mrf.mxu1 }
 0x19e   :  { %v176_v35 = vpop.f32.mrf.mxu0  ;;  %v182_v36 = vadd.f32 %v210_v29, %v181_v34 }
 0x19f   :  { %v177_v37 = vadd.f32 %v210_v29, %v176_v35 }
 0x1a0   :  { %188 = vst.msk [vmem:[%s326_s5 + $0x18] sm:$0xff] %vm184_vm14, %v182_v36 }
 0x1a1   :  { %186 = vst.msk [vmem:[%s326_s5 + $0x8] sm:$0xff] %vm184_vm14, %v177_v37 }

// kernel: _lambda_.24
= control target key start
LH: loop header
LB: loop body
LE: loop exit
PB: predicated region body
PF: predicated region fallthrough
CT: control target
= control target key end

     0   :  { %vm41_vm0 = vcmask 261120   ;;  %s149_s1 = inlined_call_operand.vmem [shape: bf16[32,32], index: 1, kind: input, shape index: {}]   ;;  %s150_s0 = inlined_call_operand.vmem [shape: f32[32,32], index: 0, kind: input, shape index: {}]   ;;  %s151_s2 = inlined_call_operand.vmem [shape: f32[1,32], index: 2, kind: input, shape index: {}]   ;;  %s152_s3 = inlined_call_operand.vmem [shape: f32[32,32], index: 3, kind: output, shape index: {}]  }
   0x1   :  { %v86_v0 = vld [vmem:[%s149_s1 + $0x8] sm:$0xff]  ;;  %v85_v1 = vld [vmem:[%s149_s1] sm:$0xff]  ;;  %v17_v4 = vld [vmem:[%s150_s0 + $0x10] sm:$0xff] }
   0x2   :  { %v15_v2 = vld [vmem:[%s150_s0] sm:$0xff]  ;;  %v16_v3 = vld [vmem:[%s150_s0 + $0x8] sm:$0xff]  ;;  %54 = vmatpush.bf16.msra.mxu0 %v86_v0  ;;  %87 = vmatpush.bf16.msra.mxu1 %v86_v0  ;;  %v18_v5 = vld [vmem:[%s150_s0 + $0x18] sm:$0xff] }
   0x3   :  { %v19_v6 = vpack.c.bf16 %v16_v3, %v15_v2  ;;  %v20_v7 = vpack.c.bf16 %v18_v5, %v17_v4  ;;  %v89_v8 = vld [vmem:[%s151_s2] ss:$0 sm:$0xff] }
   0x6   :  { %55 = vmatpush.bf16.msra.mxu0 %v85_v1  ;;  %88 = vmatpush.bf16.msra.mxu1 %v85_v1 }
   0x9   :  { %83 = vmatmul.msk.bf16.vlgmr.msra.gmra.mxu0 %vm41_vm0, %v19_v6  ;;  %84 = vmatmul.msk.bf16.vlgmr.msra.gmra.mxu1 %vm41_vm0, %v20_v7 }
  0x86   :  { %v57_v9 = vpop.f32.mrf.mxu0  ;;  %v62_v10 = vpop.f32.mrf.mxu1 }
  0x87   :  { %v58_v11 = vadd.f32 %v89_v8, %v57_v9  ;;  %v63_v12 = vadd.f32 %v89_v8, %v62_v10 }
  0x89   :  { %67 = vst.msk [vmem:[%s152_s3] sm:$0xff] %vm41_vm0, %v58_v11 }
  0x8a   :  { %69 = vst.msk [vmem:[%s152_s3 + $0x10] sm:$0xff] %vm41_vm0, %v63_v12 }
  0x8e   :  { %v59_v13 = vpop.f32.mrf.mxu0  ;;  %v64_v14 = vpop.f32.mrf.mxu1 }
  0x8f   :  { %v60_v15 = vadd.f32 %v89_v8, %v59_v13  ;;  %v65_v16 = vadd.f32 %v89_v8, %v64_v14 }
  0x91   :  { %68 = vst.msk [vmem:[%s152_s3 + $0x8] sm:$0xff] %vm41_vm0, %v60_v15 }
  0x92   :  { %70 = vst.msk [vmem:[%s152_s3 + $0x18] sm:$0xff] %vm41_vm0, %v65_v16 }

// kernel: _lambda_.23
= control target key start
LH: loop header
LB: loop body
LE: loop exit
PB: predicated region body
PF: predicated region fallthrough
CT: control target
= control target key end

     0   :  { %s1379_s12 = smov 0   ;;  %s1656_s0 = inlined_call_operand.vmem [shape: f32[32,4,8], index: 0, kind: input, shape index: {}]   ;;  %s1657_s1 = inlined_call_operand.vmem [shape: f32[32,4,8], index: 1, kind: input, shape index: {}]   ;;  %s1658_s2 = inlined_call_operand.vmem [shape: f32[32,4,8], index: 2, kind: input, shape index: {}]   ;;  %s1659_s3 = inlined_call_operand.vmem [shape: f32[32,4,8], index: 3, kind: output, shape index: {}]  }
   0x1 LB: > { %s1232_s13 = sadd.s32 4294967295, %s1357_s12   ;;  %p1236_p0 = scmp.ge.s32.totalorder %s1357_s12, 1  ;;  %s1357_s12 = sphi %s1379_s12, %s13_s12  }
   0x2   : > { %p160_p1 = scmp.lt.s32.totalorder %s1357_s12, 3 }
   0x4   : > { %p161_p2 = pnand %p1236_p0, %p160_p1 }
   0x5   : > { %s1237_s14 = sshll.u32 (!%p161_p2), %s1232_s13, 4 }
   0x6   : > { %164 = sbr.rel (%p161_p2) target bundleno = 486 (0x1e6), region = 32  ;;  %p195_p3 = scmp.lt.s32.totalorder (!%p161_p2), %s1237_s14, 31 }
   0xb   : > { %s1661_s14 = smov (!%p195_p3, %s1237_s14), 31  ;;  %vm331_vm0 = vcmask 64512   ;;  %vm636_vm1 = vcmask 27648   ;;  %vm801_vm2 = vcmask 1041408   ;;  %vm797_vm3 = vcmask 31744  }
   0xc   : > { %s1387_s15 = sshll.u32 %s1661_s14, 2  ;;  %vm1135_vm4 = vcmask 60416  }
   0xd   : > { %s1393_s18 = scalar_lea.vmem %s1657_s1, %s1387_s15  ;;  %s1399_s21 = scalar_lea.vmem %s1656_s0, %s1387_s15 }
   0xe   : > { %v267_v0 = vld [vmem:[%s1393_s18] sm:$0xf]  ;;  %v268_v1 = vld [vmem:[%s1393_s18 + $0x4] sm:$0xf]  ;;  %v269_v2 = vld [vmem:[%s1393_s18 + $0x8] sm:$0xf]  ;;  %s1533_s24 = scalar_lea.vmem %s1658_s2, %s1387_s15  ;;  %s1619_s27 = scalar_lea.vmem %s1659_s3, %s1387_s15 }
   0xf   : > { %v283_v3 = vpack.c.bf16 %v267_v0, %v267_v0  ;;  %v284_v4 = vpack.c.bf16 %v268_v1, %v268_v1  ;;  %v285_v5 = vpack.c.bf16 %v269_v2, %v269_v2  ;;  %v270_v6 = vld [vmem:[%s1393_s18 + $0xc] sm:$0xf]  ;;  %v219_v7 = vld [vmem:[%s1399_s21] sm:$0xf]  ;;  %v220_v8 = vld [vmem:[%s1399_s21 + $0x4] sm:$0xf] }
  0x10   : > { %v286_v9 = vpack.c.bf16 %v270_v6, %v270_v6  ;;  %v235_v10 = vmul.f32 0.35355338, %v219_v7  ;;  %v236_v11 = vmul.f32 0.35355338, %v220_v8  ;;  %v221_v12 = vld [vmem:[%s1399_s21 + $0x8] sm:$0xf] }
  0x11   : > { %v336_v13 = vsel %vm331_vm0, %v283_v3, 0  ;;  %v355_v14 = vsel %vm331_vm0, %v284_v4, 0  ;;  %v374_v15 = vsel %vm331_vm0, %v285_v5, 0  ;;  %v237_v16 = vmul.f32 0.35355338, %v221_v12 }
  0x12   : > { %345 = vmatpush.bf16.xpose.msra.mxu0 %v336_v13  ;;  %364 = vmatpush.bf16.xpose.msra.mxu1 %v355_v14  ;;  %v393_v17 = vsel %vm331_vm0, %v286_v9, 0  ;;  %v222_v18 = vld [vmem:[%s1399_s21 + $0xc] sm:$0xf]  ;;  %v273_v19 = vld [vmem:[%s1393_s18 + $0x18] sm:$0xf]  ;;  %v251_v27 = vpack.c.bf16 %v235_v10, %v235_v10  ;;  %v252_v28 = vpack.c.bf16 %v236_v11, %v236_v11 }
  0x13   : > { %383 = vmatpush.bf16.xpose.msra.mxu2 %v374_v15  ;;  %402 = vmatpush.bf16.xpose.msra.mxu3 %v393_v17  ;;  %v238_v20 = vmul.f32 0.35355338, %v222_v18  ;;  %v289_v21 = vpack.c.bf16 %v273_v19, %v273_v19  ;;  %v274_v22 = vld [vmem:[%s1393_s18 + $0x1c] sm:$0xf]  ;;  %v271_v23 = vld [vmem:[%s1393_s18 + $0x10] sm:$0xf]  ;;  %v253_v31 = vpack.c.bf16 %v237_v16, %v237_v16 }
  0x14   : > { %v290_v24 = vpack.c.bf16 %v274_v22, %v274_v22  ;;  %v287_v25 = vpack.c.bf16 %v271_v23, %v271_v23  ;;  %v272_v26 = vld [vmem:[%s1393_s18 + $0x14] sm:$0xf]  ;;  %v277_v36 = vld [vmem:[%s1393_s18 + $0x28] sm:$0xf]  ;;  %v278_v38 = vld [vmem:[%s1393_s18 + $0x2c] sm:$0xf] }
  0x15   : > { %v450_v29 = vsel %vm331_vm0, %v289_v21, 0  ;;  %v288_v30 = vpack.c.bf16 %v272_v26, %v272_v26  ;;  %v254_v32 = vpack.c.bf16 %v238_v20, %v238_v20  ;;  %v293_v37 = vpack.c.bf16 %v277_v36, %v277_v36  ;;  %v275_v39 = vld [vmem:[%s1393_s18 + $0x20] sm:$0xf]  ;;  %v276_v45 = vld [vmem:[%s1393_s18 + $0x24] sm:$0xf] }
  0x16   : > { %v469_v33 = vsel %vm331_vm0, %v290_v24, 0  ;;  %v412_v34 = vsel %vm331_vm0, %v287_v25, 0  ;;  %v294_v40 = vpack.c.bf16 %v278_v38, %v278_v38  ;;  %v291_v41 = vpack.c.bf16 %v275_v39, %v275_v39  ;;  %v223_v47 = vld [vmem:[%s1399_s21 + $0x10] sm:$0xf]  ;;  %v224_v48 = vld [vmem:[%s1399_s21 + $0x14] sm:$0xf] }
  0x17   : > { %v431_v35 = vsel %vm331_vm0, %v288_v30, 0  ;;  %v526_v42 = vsel %vm331_vm0, %v293_v37, 0  ;;  %v292_v46 = vpack.c.bf16 %v276_v45, %v276_v45  ;;  %v225_v50 = vld [vmem:[%s1399_s21 + $0x18] sm:$0xf]  ;;  %v226_v51 = vld [vmem:[%s1399_s21 + $0x1c] sm:$0xf] }
  0x18   : > { %v545_v43 = vsel %vm331_vm0, %v294_v40, 0  ;;  %v488_v44 = vsel %vm331_vm0, %v291_v41, 0  ;;  %v239_v52 = vmul.f32 0.35355338, %v223_v47  ;;  %v240_v53 = vmul.f32 0.35355338, %v224_v48 }
  0x19   : > { %1245 = vmatmul.msk.bf16.vlgmr.msra.gmra.mxu0 %vm331_vm0, %v251_v27  ;;  %1246 = vmatmul.msk.bf16.vlgmr.msra.gmra.mxu1 %vm331_vm0, %v252_v28  ;;  %v507_v49 = vsel %vm331_vm0, %v292_v46, 0  ;;  %v281_v54 = vld [vmem:[%s1393_s18 + $0x38] sm:$0xf]  ;;  %v282_v55 = vld [vmem:[%s1393_s18 + $0x3c] sm:$0xf] }
  0x1a   : > { %421 = vmatpush.bf16.xpose.msrb.mxu0 %v412_v34  ;;  %440 = vmatpush.bf16.xpose.msrb.mxu1 %v431_v35  ;;  %v241_v56 = vmul.f32 0.35355338, %v225_v50  ;;  %v242_v57 = vmul.f32 0.35355338, %v226_v51  ;;  %v279_v58 = vld [vmem:[%s1393_s18 + $0x30] sm:$0xf]  ;;  %v297_v59 = vpack.c.bf16 %v281_v54, %v281_v54  ;;  %v298_v60 = vpack.c.bf16 %v282_v55, %v282_v55 }
  0x1b   : > { %459 = vmatpush.bf16.xpose.msrb.mxu2 %v450_v29  ;;  %478 = vmatpush.bf16.xpose.msrb.mxu3 %v469_v33  ;;  %v255_v61 = vpack.c.bf16 %v239_v52, %v239_v52  ;;  %v256_v62 = vpack.c.bf16 %v240_v53, %v240_v53  ;;  %v295_v63 = vpack.c.bf16 %v279_v58, %v279_v58  ;;  %v280_v5 = vld [vmem:[%s1393_s18 + $0x34] sm:$0xf]  ;;  %v227_v8 = vld [vmem:[%s1399_s21 + $0x20] sm:$0xf]  ;;  %v228_v9 = vld [vmem:[%s1399_s21 + $0x24] sm:$0xf] }
  0x1c   : > { %1247 = vmatmul.msk.bf16.vlgmr.msra.gmra.mxu2 %vm331_vm0, %v253_v31  ;;  %1248 = vmatmul.msk.bf16.vlgmr.msra.gmra.mxu3 %vm331_vm0, %v254_v32  ;;  %v257_v0 = vpack.c.bf16 %v241_v56, %v241_v56  ;;  %v258_v1 = vpack.c.bf16 %v242_v57, %v242_v57  ;;  %v602_v2 = vsel %vm331_vm0, %v297_v59, 0  ;;  %v621_v3 = vsel %vm331_vm0, %v298_v60, 0  ;;  %v229_v10 = vld [vmem:[%s1399_s21 + $0x28] sm:$0xf]  ;;  %v230_v11 = vld [vmem:[%s1399_s21 + $0x2c] sm:$0xf] }
  0x1d   : > { %v564_v4 = vsel %vm331_vm0, %v295_v63, 0  ;;  %v296_v6 = vpack.c.bf16 %v280_v5, %v280_v5  ;;  %v243_v12 = vmul.f32 0.35355338, %v227_v8  ;;  %v244_v13 = vmul.f32 0.35355338, %v228_v9 }
  0x1e   : > { %v245_v14 = vmul.f32 0.35355338, %v229_v10  ;;  %v246_v15 = vmul.f32 0.35355338, %v230_v11  ;;  %v231_v20 = vld [vmem:[%s1399_s21 + $0x30] sm:$0xf] }
  0x1f   : > { %v583_v7 = vsel %vm331_vm0, %v296_v6, 0  ;;  %v259_v16 = vpack.c.bf16 %v243_v12, %v243_v12  ;;  %v260_v17 = vpack.c.bf16 %v244_v13, %v244_v13  ;;  %v232_v21 = vld [vmem:[%s1399_s21 + $0x34] sm:$0xf]  ;;  %v233_v22 = vld [vmem:[%s1399_s21 + $0x38] sm:$0xf] }
  0x20   : > { %v261_v18 = vpack.c.bf16 %v245_v14, %v245_v14  ;;  %v262_v19 = vpack.c.bf16 %v246_v15, %v246_v15  ;;  %v234_v23 = vld [vmem:[%s1399_s21 + $0x3c] sm:$0xf]  ;;  %v247_v24 = vmul.f32 0.35355338, %v231_v20  ;;  %v248_v25 = vmul.f32 0.35355338, %v232_v21 }
  0x21   : > { %v249_v26 = vmul.f32 0.35355338, %v233_v22  ;;  %v250_v27 = vmul.f32 0.35355338, %v234_v23  ;;  %v300_v21 = vld [vmem:[%s1533_s24 + $0x4] sm:$0xf] }
  0x22   : > { %497 = vmatpush.bf16.xpose.msra.mxu0 %v488_v44  ;;  %516 = vmatpush.bf16.xpose.msra.mxu1 %v507_v49  ;;  %v263_v28 = vpack.c.bf16 %v247_v24, %v247_v24  ;;  %v264_v29 = vpack.c.bf16 %v248_v25, %v248_v25  ;;  %v316_v23 = vpack.c.bf16 %v300_v21, %v300_v21  ;;  %v302_v24 = vld [vmem:[%s1533_s24 + $0xc] sm:$0xf]  ;;  %v308_v21 = vld [vmem:[%s1533_s24 + $0x24] sm:$0xf] }
  0x23   : > { %535 = vmatpush.bf16.xpose.msra.mxu2 %v526_v42  ;;  %554 = vmatpush.bf16.xpose.msra.mxu3 %v545_v43  ;;  %v265_v30 = vpack.c.bf16 %v249_v26, %v249_v26  ;;  %v266_v31 = vpack.c.bf16 %v250_v27, %v250_v27  ;;  %v318_v26 = vpack.c.bf16 %v302_v24, %v302_v24 }
  0x24   : > { %v822_v25 = vsel %vm801_vm2, %v316_v23, 0  ;;  %v324_v24 = vpack.c.bf16 %v308_v21, %v308_v21 }
  0x25   : > { %v860_v27 = vsel %vm801_vm2, %v318_v26, 0 }
  0x29   : > { %1249 = vmatmul.msk.bf16.vlgmr.msrb.gmra.mxu0 %vm331_vm0, %v255_v61  ;;  %1250 = vmatmul.msk.bf16.vlgmr.msrb.gmra.mxu1 %vm331_vm0, %v256_v62 }
  0x2a   : > { %573 = vmatpush.bf16.xpose.msrb.mxu0 %v564_v4  ;;  %592 = vmatpush.bf16.xpose.msrb.mxu1 %v583_v7 }
  0x2c   : > { %1251 = vmatmul.msk.bf16.vlgmr.msrb.gmra.mxu2 %vm331_vm0, %v257_v0  ;;  %1252 = vmatmul.msk.bf16.vlgmr.msrb.gmra.mxu3 %vm331_vm0, %v258_v1 }
  0x2d   : > { %611 = vmatpush.bf16.xpose.msrb.mxu2 %v602_v2  ;;  %630 = vmatpush.bf16.xpose.msrb.mxu3 %v621_v3 }
  0x39   : > { %1253 = vmatmul.msk.bf16.vlgmr.msra.gmra.mxu0 %vm331_vm0, %v259_v16  ;;  %1254 = vmatmul.msk.bf16.vlgmr.msra.gmra.mxu1 %vm331_vm0, %v260_v17  ;;  %v299_v16 = vld [vmem:[%s1533_s24] sm:$0xf] }
  0x3a   : > { %v315_v17 = vpack.c.bf16 %v299_v16, %v299_v16  ;;  %831 = vmatpush.bf16.msra.mxu1 %v822_v25 }
  0x3c   : > { %1255 = vmatmul.msk.bf16.vlgmr.msra.gmra.mxu2 %vm331_vm0, %v261_v18  ;;  %1256 = vmatmul.msk.bf16.vlgmr.msra.gmra.mxu3 %vm331_vm0, %v262_v19  ;;  %v803_v18 = vsel %vm801_vm2, %v315_v17, 0  ;;  %v301_v19 = vld [vmem:[%s1533_s24 + $0x8] sm:$0xf] }
  0x3d   : > { %812 = vmatpush.bf16.msra.mxu0 %v803_v18  ;;  %v317_v20 = vpack.c.bf16 %v301_v19, %v301_v19  ;;  %869 = vmatpush.bf16.msra.mxu3 %v860_v27  ;;  %v310_v18 = vld [vmem:[%s1533_s24 + $0x2c] sm:$0xf] }
  0x3f   : > { %v841_v22 = vsel %vm801_vm2, %v317_v20, 0  ;;  %v326_v20 = vpack.c.bf16 %v310_v18, %v310_v18 }
  0x40   : > { %850 = vmatpush.bf16.msra.mxu2 %v841_v22 }
  0x49   : > { %1257 = vmatmul.msk.bf16.vlgmr.msrb.gmra.mxu0 %vm331_vm0, %v263_v28  ;;  %1258 = vmatmul.msk.bf16.vlgmr.msrb.gmra.mxu1 %vm331_vm0, %v264_v29  ;;  %v305_v28 = vld [vmem:[%s1533_s24 + $0x18] sm:$0xf]  ;;  %v303_v29 = vld [vmem:[%s1533_s24 + $0x10] sm:$0xf] }
  0x4c   : > { %1259 = vmatmul.msk.bf16.vlgmr.msrb.gmra.mxu2 %vm331_vm0, %v265_v30  ;;  %1260 = vmatmul.msk.bf16.vlgmr.msrb.gmra.mxu3 %vm331_vm0, %v266_v31  ;;  %v321_v31 = vpack.c.bf16 %v305_v28, %v305_v28  ;;  %v974_v28 = vsel %vm801_vm2, %v324_v24, 0 }
  0x96   : > { %v1465_v32 = vpop.f32.mrf.mxu0  ;;  %v1467_v33 = vpop.f32.mrf.mxu1 }
  0x97   : > { %v637_v34 = vsel %vm636_vm1, %v1465_v32, -inf  ;;  %v640_v37 = vsel %vm636_vm1, %v1467_v33, -inf }
  0x98   : > { %638 = vmax.xlane.f32.xlu1 %v637_v34  ;;  %v319_v34 = vpack.c.bf16 %v303_v29, %v303_v29 }
  0x9e   : > { %v349_v39 = vpop.f32.mrf.mxu0  ;;  %v368_v40 = vpop.f32.mrf.mxu1 }
  0x9f   : > { %v1471_v35 = vpop.f32.mrf.mxu2  ;;  %v1473_v36 = vpop.f32.mrf.mxu3  ;;  %v917_v39 = vsel %vm801_vm2, %v321_v31, 0  ;;  %v879_v40 = vsel %vm801_vm2, %v319_v34, 0  ;;  %v1012_v34 = vsel %vm801_vm2, %v326_v20, 0 }
  0xa0   : > { %v643_v38 = vsel %vm636_vm1, %v1471_v35, -inf  ;;  %641 = vmax.xlane.f32.xlu1 %v640_v37  ;;  %v646_v41 = vsel %vm636_vm1, %v1473_v36, -inf  ;;  %926 = vmatpush.bf16.msrb.mxu2 %v917_v39  ;;  %v313_v39 = vld [vmem:[%s1533_s24 + $0x38] sm:$0xf] }
  0xa1   : > { %644 = vmax.xlane.f32.xlu0 %v643_v38  ;;  %v304_v38 = vld [vmem:[%s1533_s24 + $0x14] sm:$0xf]  ;;  %888 = vmatpush.bf16.msrb.mxu0 %v879_v40  ;;  %v311_v40 = vld [vmem:[%s1533_s24 + $0x30] sm:$0xf] }
  0xa6   : > { %v1481_v44 = vpop.f32.mrf.mxu0  ;;  %v1483_v45 = vpop.f32.mrf.mxu1 }
  0xa7   : > { %v387_v42 = vpop.f32.mrf.mxu2  ;;  %v406_v43 = vpop.f32.mrf.mxu3  ;;  %v652_v46 = vsel %vm636_vm1, %v1483_v45, -inf  ;;  %v649_v47 = vsel %vm636_vm1, %v1481_v44, -inf }
  0xa8   : > { %653 = vmax.xlane.f32.xlu1 %v652_v46  ;;  %v306_v43 = vld [vmem:[%s1533_s24 + $0x1c] sm:$0xf] }
  0xa9   : > { %647 = vmax.xlane.f32.xlu0 %v646_v41  ;;  %v320_v41 = vpack.c.bf16 %v304_v38, %v304_v38 }
  0xab   : > { %v898_v46 = vsel %vm801_vm2, %v320_v41, 0 }
  0xac   : > { %907 = vmatpush.bf16.msrb.mxu1 %v898_v46 }
  0xae   : > { %v425_v51 = vpop.f32.mrf.mxu0  ;;  %v444_v52 = vpop.f32.mrf.mxu1 }
  0xaf   : > { %v1489_v48 = vpop.f32.mrf.mxu2  ;;  %v1491_v49 = vpop.f32.mrf.mxu3 }
  0xb0   : > { %v655_v50 = vsel %vm636_vm1, %v1489_v48, -inf  ;;  %v658_v53 = vsel %vm636_vm1, %v1491_v49, -inf }
  0xb1   : > { %656 = vmax.xlane.f32.xlu2 %v655_v50  ;;  %650 = vmax.xlane.f32.xlu0 %v649_v47  ;;  %v322_v47 = vpack.c.bf16 %v306_v43, %v306_v43  ;;  %v327_v43 = vpack.c.bf16 %v311_v40, %v311_v40 }
  0xb3   : > { %v936_v51 = vsel %vm801_vm2, %v322_v47, 0 }
  0xb4   : > { %945 = vmatpush.bf16.msrb.mxu3 %v936_v51 }
  0xb6   : > { %v1497_v56 = vpop.f32.mrf.mxu0  ;;  %v1499_v57 = vpop.f32.mrf.mxu1 }
  0xb7   : > { %v463_v54 = vpop.f32.mrf.mxu2  ;;  %v482_v55 = vpop.f32.mrf.mxu3  ;;  %v661_v58 = vsel %vm636_vm1, %v1497_v56, -inf  ;;  %v664_v1 = vsel %vm636_vm1, %v1499_v57, -inf }
  0xb8   : > { %662 = vmax.xlane.f32.xlu1 %v661_v58 }
  0xb9   : > { %659 = vmax.xlane.f32.xlu2 %v658_v53 }
  0xbe   : > { %v501_v63 = vpop.f32.mrf.mxu0  ;;  %v520_v0 = vpop.f32.mrf.mxu1 }
  0xbf   : > { %v1503_v59 = vpop.f32.mrf.mxu2  ;;  %v1505_v60 = vpop.f32.mrf.mxu3  ;;  %v309_v0 = vld [vmem:[%s1533_s24 + $0x28] sm:$0xf] }
  0xc0   : > { %v667_v61 = vsel %vm636_vm1, %v1503_v59, -inf  ;;  %v670_v62 = vsel %vm636_vm1, %v1505_v60, -inf }
  0xc1   : > { %668 = vmax.xlane.f32.xlu2 %v667_v61  ;;  %671 = vmax.xlane.f32.xlu0 %v670_v62 }
  0xc6   : > { %v1513_v4 = vpop.f32.mrf.mxu0  ;;  %v1515_v5 = vpop.f32.mrf.mxu1 }
  0xc7   : > { %v539_v2 = vpop.f32.mrf.mxu2  ;;  %v558_v3 = vpop.f32.mrf.mxu3  ;;  %v673_v8 = vsel %vm636_vm1, %v1513_v4, -inf  ;;  %v676_v13 = vsel %vm636_vm1, %v1515_v5, -inf }
  0xc8   : > { %v325_v3 = vpack.c.bf16 %v309_v0, %v309_v0 }
  0xc9   : > { %665 = vmax.xlane.f32.xlu2 %v664_v1 }
  0xca   : > { %v993_v16 = vsel %vm801_vm2, %v325_v3, 0 }
  0xce   : > { %v577_v11 = vpop.f32.mrf.mxu0  ;;  %v596_v12 = vpop.f32.mrf.mxu1 }
  0xcf   : > { %v1517_v6 = vpop.f32.mrf.mxu2  ;;  %v1519_v7 = vpop.f32.mrf.mxu3 }
  0xd0   : > { %v679_v9 = vsel %vm636_vm1, %v1517_v6, -inf  ;;  %v682_v10 = vsel %vm636_vm1, %v1519_v7, -inf }
  0xd1   : > { %680 = vmax.xlane.f32.xlu0 %v679_v9  ;;  %683 = vmax.xlane.f32.xlu1 %v682_v10 }
  0xd2   : > { %674 = vmax.xlane.f32.xlu2 %v673_v8 }
  0xd7   : > { %v615_v14 = vpop.f32.mrf.mxu2  ;;  %v634_v15 = vpop.f32.mrf.mxu3 }
  0xd9   : > { %677 = vmax.xlane.f32.xlu0 %v676_v13 }
 0x10b   : > { %v639_v30 = vpop.xlane.xlu1 %638 }
 0x10c   : > { %v685_v37 = vsub.f32 %v1465_v32, %v639_v30 }
 0x10e   : > { %v701_v42 = vmul.f32 1.442695, %v685_v37 }
 0x110   : > { %1287 = vpow2.f32 %v701_v42  ;;  %v329_v42 = vpack.c.bf16 %v313_v39, %v313_v39 }
 0x113   : > { %v642_v52 = vpop.xlane.xlu1 %641 }
 0x114   : > { %v645_v50 = vpop.xlane.xlu0 %644  ;;  %v686_v53 = vsub.f32 %v1467_v33, %v642_v52 }
 0x115   : > { %v687_v32 = vsub.f32 %v1471_v35, %v645_v50  ;;  %v307_v35 = vld [vmem:[%s1533_s24 + $0x20] sm:$0xf] }
 0x116   : > { %v1288_v55 = vpop.eup %1287  ;;  %v703_v58 = vmul.f32 1.442695, %v686_v53  ;;  %v323_v33 = vpack.c.bf16 %v307_v35, %v307_v35 }
 0x117   : > { %v705_v54 = vmul.f32 1.442695, %v687_v32  ;;  %v781_v61 = vpack.c.bf16 %v1288_v55, %v1288_v55  ;;  %v733_v62 = vsel %vm636_vm1, %v1288_v55, 0.0 }
 0x118   : > { %734 = vadd.xlane.f32.xlu1 %v733_v62  ;;  %v955_v11 = vsel %vm801_vm2, %v323_v33, 0 }
 0x119   : > { %1289 = vpow2.f32 %v705_v54  ;;  %1261 = vmatmul.msk.bf16.vlgmr.msra.gmra.mxu0 %vm797_vm3, %v781_v61  ;;  %v1069_v54 = vsel %vm801_vm2, %v329_v42, 0 }
 0x11a   : > { %1291 = vpow2.f32 %v703_v58  ;;  %964 = vmatpush.bf16.msra.mxu0 %v955_v11  ;;  %v314_v58 = vld [vmem:[%s1533_s24 + $0x3c] sm:$0xf] }
 0x11b   : > { %v654_v2 = vpop.xlane.xlu1 %653  ;;  %v330_v61 = vpack.c.bf16 %v314_v58, %v314_v58 }
 0x11c   : > { %v648_v63 = vpop.xlane.xlu0 %647  ;;  %v690_v8 = vsub.f32 %v1483_v45, %v654_v2  ;;  %v312_v2 = vld [vmem:[%s1533_s24 + $0x34] sm:$0xf] }
 0x11d   : > { %v688_v1 = vsub.f32 %v1473_v36, %v648_v63  ;;  %v328_v3 = vpack.c.bf16 %v312_v2, %v312_v2 }
 0x11e   : > { %v711_v14 = vmul.f32 1.442695, %v690_v8 }
 0x11f   : > { %v1290_v9 = vpop.eup %1289  ;;  %v707_v10 = vmul.f32 1.442695, %v688_v1  ;;  %v1088_v1 = vsel %vm801_vm2, %v330_v61, 0 }
 0x120   : > { %v1292_v12 = vpop.eup %1291  ;;  %v783_v13 = vpack.c.bf16 %v1290_v9, %v1290_v9  ;;  %v739_v15 = vsel %vm636_vm1, %v1290_v9, 0.0 }
 0x121   : > { %v782_v36 = vpack.c.bf16 %v1292_v12, %v1292_v12  ;;  %1293 = vpow2.f32 %v707_v10  ;;  %740 = vadd.xlane.f32.xlu0 %v739_v15  ;;  %v736_v17 = vsel %vm636_vm1, %v1292_v12, 0.0 }
 0x122   : > { %1295 = vpow2.f32 %v711_v14  ;;  %1263 = vmatmul.msk.bf16.vlgmr.msra.gmra.mxu2 %vm797_vm3, %v783_v13  ;;  %737 = vadd.xlane.f32.xlu2 %v736_v17  ;;  %v1050_v13 = vsel %vm801_vm2, %v328_v3, 0 }
 0x123   : > { %1262 = vmatmul.msk.bf16.vlgmr.msra.gmra.mxu1 %vm797_vm3, %v782_v36  ;;  %1002 = vmatpush.bf16.msra.mxu2 %v993_v16 }
 0x124   : > { %v657_v45 = vpop.xlane.xlu2 %656  ;;  %v651_v19 = vpop.xlane.xlu0 %650  ;;  %983 = vmatpush.bf16.msra.mxu1 %v974_v28 }
 0x125   : > { %v691_v22 = vsub.f32 %v1489_v48, %v657_v45  ;;  %v689_v23 = vsub.f32 %v1481_v44, %v651_v19 }
 0x127   : > { %v1294_v25 = vpop.eup %1293  ;;  %v713_v26 = vmul.f32 1.442695, %v691_v22  ;;  %v709_v27 = vmul.f32 1.442695, %v689_v23 }
 0x128   : > { %v1296_v29 = vpop.eup %1295  ;;  %v784_v30 = vpack.c.bf16 %v1294_v25, %v1294_v25  ;;  %v742_v31 = vsel %vm636_vm1, %v1294_v25, 0.0 }
 0x129   : > { %1297 = vpow2.f32 %v713_v26  ;;  %743 = vadd.xlane.f32.xlu1 %v742_v31  ;;  %v748_v48 = vsel %vm636_vm1, %v1296_v29, 0.0  ;;  %v786_v47 = vpack.c.bf16 %v1296_v29, %v1296_v29 }
 0x12a   : > { %1299 = vpow2.f32 %v709_v27  ;;  %1264 = vmatmul.msk.bf16.vlgmr.msra.gmra.mxu3 %vm797_vm3, %v784_v30  ;;  %749 = vadd.xlane.f32.xlu0 %v748_v48 }
 0x12b   : > { %1021 = vmatpush.bf16.msra.mxu3 %v1012_v34  ;;  %v663_v38 = vpop.xlane.xlu1 %662 }
 0x12c   : > { %v660_v44 = vpop.xlane.xlu2 %659  ;;  %v693_v41 = vsub.f32 %v1497_v56, %v663_v38  ;;  %v1031_v56 = vsel %vm801_vm2, %v327_v43, 0 }
 0x12d   : > { %v692_v37 = vsub.f32 %v1491_v49, %v660_v44 }
 0x12e   : > { %v717_v52 = vmul.f32 1.442695, %v693_v41 }
 0x12f   : > { %v1298_v46 = vpop.eup %1297  ;;  %v715_v50 = vmul.f32 1.442695, %v692_v37 }
 0x130   : > { %v1300_v51 = vpop.eup %1299  ;;  %v787_v32 = vpack.c.bf16 %v1298_v46, %v1298_v46  ;;  %v751_v53 = vsel %vm636_vm1, %v1298_v46, 0.0 }
 0x131   : > { %v785_v55 = vpack.c.bf16 %v1300_v51, %v1300_v51  ;;  %1301 = vpow2.f32 %v715_v50  ;;  %752 = vadd.xlane.f32.xlu1 %v751_v53  ;;  %v745_v49 = vsel %vm636_vm1, %v1300_v51, 0.0 }
 0x132   : > { %1303 = vpow2.f32 %v717_v52  ;;  %746 = vadd.xlane.f32.xlu2 %v745_v49  ;;  %1267 = vmatmul.msk.bf16.vlgmr.msrb.gmra.mxu2 %vm797_vm3, %v787_v32 }
 0x133   : > { %1265 = vmatmul.msk.bf16.vlgmr.msrb.gmra.mxu0 %vm797_vm3, %v785_v55  ;;  %1266 = vmatmul.msk.bf16.vlgmr.msrb.gmra.mxu1 %vm797_vm3, %v786_v47 }
 0x134   : > { %v669_v62 = vpop.xlane.xlu2 %668  ;;  %v672_v63 = vpop.xlane.xlu0 %671  ;;  %1078 = vmatpush.bf16.msrb.mxu2 %v1069_v54  ;;  %1040 = vmatpush.bf16.msrb.mxu0 %v1031_v56 }
 0x135   : > { %v695_v0 = vsub.f32 %v1503_v59, %v669_v62  ;;  %v696_v35 = vsub.f32 %v1505_v60, %v672_v63  ;;  %1059 = vmatpush.bf16.msrb.mxu1 %v1050_v13 }
 0x137   : > { %v1302_v33 = vpop.eup %1301  ;;  %v721_v8 = vmul.f32 1.442695, %v695_v0  ;;  %v723_v9 = vmul.f32 1.442695, %v696_v35 }
 0x138   : > { %v1304_v10 = vpop.eup %1303  ;;  %v788_v11 = vpack.c.bf16 %v1302_v33, %v1302_v33  ;;  %v754_v12 = vsel %vm636_vm1, %v1302_v33, 0.0 }
 0x139   : > { %1305 = vpow2.f32 %v721_v8  ;;  %v757_v14 = vsel %vm636_vm1, %v1304_v10, 0.0  ;;  %v789_v45 = vpack.c.bf16 %v1304_v10, %v1304_v10 }
 0x13a   : > { %1307 = vpow2.f32 %v723_v9  ;;  %755 = vadd.xlane.f32.xlu2 %v754_v12  ;;  %1268 = vmatmul.msk.bf16.vlgmr.msrb.gmra.mxu3 %vm797_vm3, %v788_v11 }
 0x13b   : > { %758 = vadd.xlane.f32.xlu0 %v757_v14  ;;  %1097 = vmatpush.bf16.msrb.mxu3 %v1088_v1 }
 0x13c   : > { %v666_v59 = vpop.xlane.xlu2 %665 }
 0x13d   : > { %v694_v60 = vsub.f32 %v1499_v57, %v666_v59 }
 0x13f   : > { %v1306_v15 = vpop.eup %1305  ;;  %v719_v16 = vmul.f32 1.442695, %v694_v60 }
 0x140   : > { %v1308_v36 = vpop.eup %1307  ;;  %v791_v17 = vpack.c.bf16 %v1306_v15, %v1306_v15  ;;  %v763_v18 = vsel %vm636_vm1, %v1306_v15, 0.0 }
 0x141   : > { %1309 = vpow2.f32 %v719_v16  ;;  %v766_v19 = vsel %vm636_vm1, %v1308_v36, 0.0  ;;  %v792_v27 = vpack.c.bf16 %v1308_v36, %v1308_v36 }
 0x142   : > { %764 = vadd.xlane.f32.xlu2 %v763_v18  ;;  %1271 = vmatmul.msk.bf16.vlgmr.msra.gmra.mxu2 %vm797_vm3, %v791_v17 }
 0x143   : > { %1269 = vmatmul.msk.bf16.vlgmr.msra.gmra.mxu0 %vm797_vm3, %v789_v45  ;;  %767 = vadd.xlane.f32.xlu0 %v766_v19 }
 0x144   : > { %v681_v20 = vpop.xlane.xlu0 %680  ;;  %v684_v21 = vpop.xlane.xlu1 %683 }
 0x145   : > { %v699_v57 = vsub.f32 %v1517_v6, %v681_v20  ;;  %v675_v22 = vpop.xlane.xlu2 %674  ;;  %v700_v26 = vsub.f32 %v1519_v7, %v684_v21 }
 0x146   : > { %v697_v23 = vsub.f32 %v1513_v4, %v675_v22 }
 0x147   : > { %v1310_v24 = vpop.eup %1309  ;;  %v729_v25 = vmul.f32 1.442695, %v699_v57  ;;  %v731_v31 = vmul.f32 1.442695, %v700_v26 }
 0x148   : > { %v790_v28 = vpack.c.bf16 %v1310_v24, %v1310_v24  ;;  %v725_v29 = vmul.f32 1.442695, %v697_v23  ;;  %v760_v30 = vsel %vm636_vm1, %v1310_v24, 0.0 }
 0x149   : > { %1311 = vpow2.f32 %v729_v25  ;;  %761 = vadd.xlane.f32.xlu1 %v760_v30 }
 0x14a   : > { %1270 = vmatmul.msk.bf16.vlgmr.msra.gmra.mxu1 %vm797_vm3, %v790_v28  ;;  %1272 = vmatmul.msk.bf16.vlgmr.msra.gmra.mxu3 %vm797_vm3, %v792_v27  ;;  %1313 = vpow2.f32 %v725_v29 }
 0x14b   : > { %1315 = vpow2.f32 %v731_v31 }
 0x14c   : > { %v678_v6 = vpop.xlane.xlu0 %677 }
 0x14d   : > { %v698_v4 = vsub.f32 %v1515_v5, %v678_v6 }
 0x14f   : > { %v1312_v34 = vpop.eup %1311  ;;  %v727_v48 = vmul.f32 1.442695, %v698_v4 }
 0x150   : > { %v795_v7 = vpack.c.bf16 %v1312_v34, %v1312_v34  ;;  %v775_v44 = vsel %vm636_vm1, %v1312_v34, 0.0  ;;  %v1314_v37 = vpop.eup %1313 }
 0x151   : > { %1317 = vpow2.f32 %v727_v48  ;;  %776 = vadd.xlane.f32.xlu0 %v775_v44  ;;  %v793_v38 = vpack.c.bf16 %v1314_v37, %v1314_v37  ;;  %v769_v39 = vsel %vm636_vm1, %v1314_v37, 0.0  ;;  %v1316_v40 = vpop.eup %1315 }
 0x152   : > { %1275 = vmatmul.msk.bf16.vlgmr.msrb.gmra.mxu2 %vm797_vm3, %v795_v7  ;;  %770 = vadd.xlane.f32.xlu1 %v769_v39  ;;  %v796_v41 = vpack.c.bf16 %v1316_v40, %v1316_v40  ;;  %v778_v46 = vsel %vm636_vm1, %v1316_v40, 0.0 }
 0x153   : > { %1273 = vmatmul.msk.bf16.vlgmr.msrb.gmra.mxu0 %vm797_vm3, %v793_v38 }
 0x157   : > { %v1318_v5 = vpop.eup %1317 }
 0x158   : > { %v794_v42 = vpack.c.bf16 %v1318_v5, %v1318_v5  ;;  %v772_v43 = vsel %vm636_vm1, %v1318_v5, 0.0 }
 0x159   : > { %773 = vadd.xlane.f32.xlu2 %v772_v43 }
 0x15a   : > { %1274 = vmatmul.msk.bf16.vlgmr.msrb.gmra.mxu1 %vm797_vm3, %v794_v42  ;;  %1276 = vmatmul.msk.bf16.vlgmr.msrb.gmra.mxu3 %vm797_vm3, %v796_v41 }
 0x15b   : > { %779 = vadd.xlane.f32.xlu1 %v778_v46 }
 0x18b   : > { %v735_v47 = vpop.xlane.xlu1 %734 }
 0x18c   : > { %1319 = vrcp.f32 %v735_v47 }
 0x192   : > { %v1320_v51 = vpop.eup %1319 }
 0x194   : > { %v741_v53 = vpop.xlane.xlu0 %740 }
 0x195   : > { %v738_v50 = vpop.xlane.xlu2 %737 }
 0x196   : > { %v814_v32 = vpop.f32.mrf.mxu0  ;;  %1321 = vrcp.f32 %v738_v50 }
 0x197   : > { %v1119_v52 = vmul.f32 %v1320_v51, %v814_v32  ;;  %1323 = vrcp.f32 %v741_v53 }
 0x199   : > { %1136 = vst.msk [vmem:[%s1619_s27] sm:$0xf] %vm1135_vm4, %v1119_v52 }
 0x19c   : > { %v1322_v54 = vpop.eup %1321  ;;  %v744_v58 = vpop.xlane.xlu1 %743 }
 0x19d   : > { %v1324_v61 = vpop.eup %1323  ;;  %v750_v63 = vpop.xlane.xlu0 %749  ;;  %1325 = vrcp.f32 %v744_v58 }
 0x19e   : > { %v816_v55 = vpop.f32.mrf.mxu0  ;;  %1327 = vrcp.f32 %v750_v63 }
 0x1a0   : > { %v833_v49 = vpop.f32.mrf.mxu1 }
 0x1a1   : > { %v1120_v56 = vmul.f32 %v1322_v54, %v833_v49 }
 0x1a3   : > { %1137 = vst.msk [vmem:[%s1619_s27 + $0x4] sm:$0xf] %vm1135_vm4, %v1120_v56  ;;  %v1326_v33 = vpop.eup %1325 }
 0x1a4   : > { %v753_v2 = vpop.xlane.xlu1 %752  ;;  %v1328_v9 = vpop.eup %1327 }
 0x1a5   : > { %v852_v62 = vpop.f32.mrf.mxu2  ;;  %v747_v35 = vpop.xlane.xlu2 %746 }
 0x1a6   : > { %v1121_v0 = vmul.f32 %v1324_v61, %v852_v62  ;;  %1329 = vrcp.f32 %v747_v35 }
 0x1a7   : > { %1331 = vrcp.f32 %v753_v2 }
 0x1a8   : > { %1138 = vst.msk [vmem:[%s1619_s27 + $0x8] sm:$0xf] %vm1135_vm4, %v1121_v0  ;;  %v835_v1 = vpop.f32.mrf.mxu1 }
 0x1ac   : > { %v1330_v11 = vpop.eup %1329 }
 0x1ad   : > { %v854_v3 = vpop.f32.mrf.mxu2  ;;  %v871_v8 = vpop.f32.mrf.mxu3 }
 0x1ae   : > { %v1122_v10 = vmul.f32 %v1326_v33, %v871_v8  ;;  %v756_v60 = vpop.xlane.xlu2 %755  ;;  %v1332_v15 = vpop.eup %1331 }
 0x1af   : > { %v759_v18 = vpop.xlane.xlu0 %758  ;;  %1333 = vrcp.f32 %v756_v60 }
 0x1b0   : > { %v890_v12 = vpop.f32.mrf.mxu0  ;;  %v909_v13 = vpop.f32.mrf.mxu1  ;;  %1139 = vst.msk [vmem:[%s1619_s27 + $0xc] sm:$0xf] %vm1135_vm4, %v1122_v10  ;;  %1335 = vrcp.f32 %v759_v18 }
 0x1b1   : > { %v1123_v14 = vmul.f32 %v1330_v11, %v890_v12  ;;  %v1124_v59 = vmul.f32 %v1328_v9, %v909_v13 }
 0x1b3   : > { %1140 = vst.msk [vmem:[%s1619_s27 + $0x10] sm:$0xf] %vm1135_vm4, %v1123_v14 }
 0x1b4   : > { %1141 = vst.msk [vmem:[%s1619_s27 + $0x14] sm:$0xf] %vm1135_vm4, %v1124_v59 }
 0x1b5   : > { %v928_v16 = vpop.f32.mrf.mxu2  ;;  %v873_v36 = vpop.f32.mrf.mxu3 }
 0x1b6   : > { %v1125_v17 = vmul.f32 %v1332_v15, %v928_v16  ;;  %v765_v20 = vpop.xlane.xlu2 %764  ;;  %v1334_v57 = vpop.eup %1333 }
 0x1b7   : > { %1337 = vrcp.f32 %v765_v20  ;;  %v1336_v25 = vpop.eup %1335  ;;  %v768_v28 = vpop.xlane.xlu0 %767 }
 0x1b8   : > { %1142 = vst.msk [vmem:[%s1619_s27 + $0x18] sm:$0xf] %vm1135_vm4, %v1125_v17  ;;  %v892_v45 = vpop.f32.mrf.mxu0  ;;  %v911_v19 = vpop.f32.mrf.mxu1 }
 0x1bc   : > { %v762_v22 = vpop.xlane.xlu1 %761 }
 0x1bd   : > { %v930_v21 = vpop.f32.mrf.mxu2  ;;  %v947_v23 = vpop.f32.mrf.mxu3  ;;  %1339 = vrcp.f32 %v762_v22 }
 0x1be   : > { %v1126_v24 = vmul.f32 %v1334_v57, %v947_v23  ;;  %v1338_v29 = vpop.eup %1337  ;;  %1341 = vrcp.f32 %v768_v28 }
 0x1c0   : > { %v966_v26 = vpop.f32.mrf.mxu0  ;;  %1143 = vst.msk [vmem:[%s1619_s27 + $0x1c] sm:$0xf] %vm1135_vm4, %v1126_v24 }
 0x1c1   : > { %v1127_v27 = vmul.f32 %v1336_v25, %v966_v26 }
 0x1c3   : > { %1144 = vst.msk [vmem:[%s1619_s27 + $0x20] sm:$0xf] %vm1135_vm4, %v1127_v27  ;;  %v1340_v4 = vpop.eup %1339 }
 0x1c4   : > { %v777_v37 = vpop.xlane.xlu0 %776  ;;  %v1342_v39 = vpop.eup %1341 }
 0x1c5   : > { %v1004_v30 = vpop.f32.mrf.mxu2  ;;  %v949_v31 = vpop.f32.mrf.mxu3 }
 0x1c6   : > { %v1129_v6 = vmul.f32 %v1338_v29, %v1004_v30  ;;  %v771_v48 = vpop.xlane.xlu1 %770 }
 0x1c7   : > { %v985_v34 = vpop.f32.mrf.mxu1  ;;  %1343 = vrcp.f32 %v771_v48 }
 0x1c8   : > { %1146 = vst.msk [vmem:[%s1619_s27 + $0x28] sm:$0xf] %vm1135_vm4, %v1129_v6  ;;  %v968_v7 = vpop.f32.mrf.mxu0  ;;  %v1128_v44 = vmul.f32 %v1340_v4, %v985_v34  ;;  %1345 = vrcp.f32 %v777_v37 }
 0x1ca   : > { %1145 = vst.msk [vmem:[%s1619_s27 + $0x24] sm:$0xf] %vm1135_vm4, %v1128_v44 }
 0x1cc   : > { %v774_v40 = vpop.xlane.xlu2 %773 }
 0x1cd   : > { %v1006_v38 = vpop.f32.mrf.mxu2  ;;  %v1023_v5 = vpop.f32.mrf.mxu3  ;;  %1347 = vrcp.f32 %v774_v40 }
 0x1ce   : > { %v1130_v41 = vmul.f32 %v1342_v39, %v1023_v5  ;;  %v1344_v43 = vpop.eup %1343  ;;  %v780_v51 = vpop.xlane.xlu1 %779 }
 0x1cf   : > { %v987_v42 = vpop.f32.mrf.mxu1  ;;  %v1346_v50 = vpop.eup %1345  ;;  %1349 = vrcp.f32 %v780_v51 }
 0x1d0   : > { %1147 = vst.msk [vmem:[%s1619_s27 + $0x2c] sm:$0xf] %vm1135_vm4, %v1130_v41  ;;  %v1042_v46 = vpop.f32.mrf.mxu0 }
 0x1d1   : > { %v1131_v47 = vmul.f32 %v1344_v43, %v1042_v46 }
 0x1d3   : > { %1148 = vst.msk [vmem:[%s1619_s27 + $0x30] sm:$0xf] %vm1135_vm4, %v1131_v47  ;;  %v1348_v54 = vpop.eup %1347 }
 0x1d5   : > { %v1080_v32 = vpop.f32.mrf.mxu2  ;;  %v1025_v52 = vpop.f32.mrf.mxu3 }
 0x1d6   : > { %v1133_v53 = vmul.f32 %v1346_v50, %v1080_v32  ;;  %v1350_v61 = vpop.eup %1349 }
 0x1d7   : > { %v1061_v55 = vpop.f32.mrf.mxu1 }
 0x1d8   : > { %1150 = vst.msk [vmem:[%s1619_s27 + $0x38] sm:$0xf] %vm1135_vm4, %v1133_v53  ;;  %v1132_v49 = vmul.f32 %v1348_v54, %v1061_v55  ;;  %v1044_v56 = vpop.f32.mrf.mxu0 }
 0x1da   : > { %1149 = vst.msk [vmem:[%s1619_s27 + $0x34] sm:$0xf] %vm1135_vm4, %v1132_v49 }
 0x1dd   : > { %v1082_v58 = vpop.f32.mrf.mxu2  ;;  %v1099_v62 = vpop.f32.mrf.mxu3 }
 0x1de   : > { %v1134_v63 = vmul.f32 %v1350_v61, %v1099_v62 }
 0x1df   : > { %v1063_v0 = vpop.f32.mrf.mxu1 }
 0x1e0   : > { %1151 = vst.msk [vmem:[%s1619_s27 + $0x3c] sm:$0xf] %vm1135_vm4, %v1134_v63 }
 0x1e5   : > { %v1101_v35 = vpop.f32.mrf.mxu3 }
 0x1e6 PF: > { %s13_s12 = sadd.s32 1, %s1357_s12  }
 0x1e7   : > { %p10_p4 = scmp.ge.s32.totalorder %s13_s12, 4  }
 0x1e9   :  { %12 = sbr.rel (!%p10_p4) target bundleno = 1 (0x1), region = 68 }

// kernel: _lambda_.25
= control target key start
LH: loop header
LB: loop body
LE: loop exit
PB: predicated region body
PF: predicated region fallthrough
CT: control target
= control target key end

     0   :  { %vm44_vm0 = vcmask 261120   ;;  %s177_s1 = inlined_call_operand.vmem [shape: bf16[32,32], index: 1, kind: input, shape index: {}]   ;;  %s178_s0 = inlined_call_operand.vmem [shape: f32[32,32], index: 0, kind: input, shape index: {}]   ;;  %s179_s2 = inlined_call_operand.vmem [shape: f32[1,32], index: 2, kind: input, shape index: {}]   ;;  %s180_s3 = inlined_call_operand.vmem [shape: f32[32,32], index: 3, kind: input, shape index: {}]   ;;  %s181_s4 = inlined_call_operand.vmem [shape: f32[32,32], index: 4, kind: output, shape index: {}]  }
   0x1   :  { %v97_v0 = vld [vmem:[%s177_s1 + $0x8] sm:$0xff]  ;;  %v96_v1 = vld [vmem:[%s177_s1] sm:$0xff]  ;;  %v20_v4 = vld [vmem:[%s178_s0 + $0x10] sm:$0xff] }
   0x2   :  { %v18_v2 = vld [vmem:[%s178_s0] sm:$0xff]  ;;  %v19_v3 = vld [vmem:[%s178_s0 + $0x8] sm:$0xff]  ;;  %57 = vmatpush.bf16.msra.mxu0 %v97_v0  ;;  %98 = vmatpush.bf16.msra.mxu1 %v97_v0  ;;  %v21_v5 = vld [vmem:[%s178_s0 + $0x18] sm:$0xff] }
   0x3   :  { %v22_v6 = vpack.c.bf16 %v19_v3, %v18_v2  ;;  %v23_v7 = vpack.c.bf16 %v21_v5, %v20_v4  ;;  %v100_v8 = vld [vmem:[%s179_s2] ss:$0 sm:$0xff]  ;;  %v72_v12 = vld [vmem:[%s180_s3 + $0x10] sm:$0xff]  ;;  %v71_v18 = vld [vmem:[%s180_s3 + $0x8] sm:$0xff] }
   0x4   :  { %v70_v10 = vld [vmem:[%s180_s3] sm:$0xff]  ;;  %v73_v20 = vld [vmem:[%s180_s3 + $0x18] sm:$0xff] }
   0x6   :  { %58 = vmatpush.bf16.msra.mxu0 %v96_v1  ;;  %99 = vmatpush.bf16.msra.mxu1 %v96_v1 }
   0x9   :  { %94 = vmatmul.msk.bf16.vlgmr.msra.gmra.mxu0 %vm44_vm0, %v22_v6  ;;  %95 = vmatmul.msk.bf16.vlgmr.msra.gmra.mxu1 %vm44_vm0, %v23_v7 }
  0x86   :  { %v60_v9 = vpop.f32.mrf.mxu0  ;;  %v65_v11 = vpop.f32.mrf.mxu1 }
  0x87   :  { %v61_v13 = vadd.f32 %v100_v8, %v60_v9  ;;  %v66_v14 = vadd.f32 %v100_v8, %v65_v11 }
  0x89   :  { %v74_v15 = vadd.f32 %v70_v10, %v61_v13  ;;  %v76_v16 = vadd.f32 %v72_v12, %v66_v14 }
  0x8b   :  { %78 = vst.msk [vmem:[%s181_s4] sm:$0xff] %vm44_vm0, %v74_v15 }
  0x8c   :  { %80 = vst.msk [vmem:[%s181_s4 + $0x10] sm:$0xff] %vm44_vm0, %v76_v16 }
  0x8e   :  { %v62_v17 = vpop.f32.mrf.mxu0  ;;  %v67_v19 = vpop.f32.mrf.mxu1 }
  0x8f   :  { %v63_v21 = vadd.f32 %v100_v8, %v62_v17  ;;  %v68_v22 = vadd.f32 %v100_v8, %v67_v19 }
  0x91   :  { %v75_v23 = vadd.f32 %v71_v18, %v63_v21  ;;  %v77_v24 = vadd.f32 %v73_v20, %v68_v22 }
  0x93   :  { %79 = vst.msk [vmem:[%s181_s4 + $0x8] sm:$0xff] %vm44_vm0, %v75_v23 }
  0x94   :  { %81 = vst.msk [vmem:[%s181_s4 + $0x18] sm:$0xff] %vm44_vm0, %v77_v24 }

// kernel: _lambda_.26
= control target key start
LH: loop header
LB: loop body
LE: loop exit
PB: predicated region body
PF: predicated region fallthrough
CT: control target
= control target key end

     0   :  { %vm26_vm0 = vcmask 261120   ;;  %v260_v10 = vmov 32.0   ;;  %s386_s0 = inlined_call_operand.vmem [shape: f32[40,32], index: 0, kind: input, shape index: {}]   ;;  %s387_s1 = inlined_call_operand.vmem [shape: f32[1,32], index: 1, kind: input, shape index: {}]   ;;  %s388_s2 = inlined_call_operand.vmem [shape: f32[1,32], index: 2, kind: input, shape index: {}]   ;;  %s389_s4 = inlined_call_operand.vmem [shape: f32[1,96], index: 4, kind: input, shape index: {}]   ;;  %s390_s3 = inlined_call_operand.vmem [shape: bf16[32,96], index: 3, kind: input, shape index: {}]   ;;  %s391_s5 = inlined_call_operand.vmem [shape: f32[40,96], index: 5, kind: output, shape index: {}]  }
   0x1   :  { %v25_v0 = vld [vmem:[%s386_s0 + $0x20] sm:$0xff]  ;;  %v22_v1 = vld [vmem:[%s386_s0 + $0x8] sm:$0xff]  ;;  %v24_v4 = vld [vmem:[%s386_s0 + $0x18] sm:$0xff]  ;;  %248 = vrcp.f32 %v260_v10 }
   0x2   :  { %v39_v2 = vsel %vm26_vm0, %v25_v0, 0.0  ;;  %v30_v3 = vsel %vm26_vm0, %v22_v1, 0.0  ;;  %v36_v5 = vsel %vm26_vm0, %v24_v4, 0.0  ;;  %v23_v6 = vld [vmem:[%s386_s0 + $0x10] sm:$0xff]  ;;  %v21_v7 = vld [vmem:[%s386_s0] sm:$0xff]  ;;  %v239_v42 = vld [vmem:[%s390_s3 + $0x8] sm:$0xff] }
   0x3   :  { %40 = vadd.xlane.f32.xlu0 %v39_v2  ;;  %31 = vadd.xlane.f32.xlu1 %v30_v3  ;;  %v33_v8 = vsel %vm26_vm0, %v23_v6, 0.0  ;;  %v27_v9 = vsel %vm26_vm0, %v21_v7, 0.0  ;;  %v238_v43 = vld [vmem:[%s390_s3] sm:$0xff] }
   0x4   :  { %37 = vadd.xlane.f32.xlu2 %v36_v5  ;;  %241 = vmatpush.bf16.msra.mxu2 %v239_v42 }
   0x5   :  { %200 = vmatpush.bf16.msra.mxu0 %v239_v42  ;;  %240 = vmatpush.bf16.msra.mxu1 %v239_v42 }
   0x7   :  { %v249_v11 = vpop.eup %248 }
   0x8   :  { %v43_v12 = vmul.f32 32.0, %v249_v11  ;;  %vm47_vm1 = vweird.f32 %v249_v11  ;;  %243 = vmatpush.bf16.msra.mxu2 %v238_v43 }
   0x9   :  { %201 = vmatpush.bf16.msra.mxu0 %v238_v43  ;;  %242 = vmatpush.bf16.msra.mxu1 %v238_v43 }
   0xa   :  { %v44_v13 = vsub.f32 1.0, %v43_v12 }
   0xb   :  { %34 = vadd.xlane.f32.xlu1 %v33_v8  ;;  %28 = vadd.xlane.f32.xlu0 %v27_v9 }
   0xc   :  { %v45_v14 = vmul.f32 %v249_v11, %v44_v13 }
   0xe   :  { %v46_v15 = vadd.f32 %v249_v11, %v45_v14 }
  0x10   :  { %v311_v16 = vsel %vm47_vm1, %v249_v11, %v46_v15  ;;  %v245_v11 = vld [vmem:[%s387_s1] ss:$0 sm:$0xff] }
  0x76   :  { %v41_v17 = vpop.xlane.xlu0 %40  ;;  %v32_v18 = vpop.xlane.xlu1 %31 }
  0x77   :  { %v53_v19 = vmul.f32 %v311_v16, %v41_v17  ;;  %v50_v20 = vmul.f32 %v311_v16, %v32_v18  ;;  %v38_v25 = vpop.xlane.xlu2 %37 }
  0x78   :  { %v52_v32 = vmul.f32 %v311_v16, %v38_v25 }
  0x79   :  { %v315_v21 = vsub.f32 %v25_v0, %v53_v19  ;;  %v317_v22 = vsub.f32 %v22_v1, %v50_v20 }
  0x7a   :  { %v332_v35 = vsub.f32 %v24_v4, %v52_v32 }
  0x7b   :  { %v63_v23 = vmul.f32 %v315_v21, %v315_v21  ;;  %v60_v24 = vmul.f32 %v317_v22, %v317_v22 }
  0x7c   :  { %v62_v40 = vmul.f32 %v332_v35, %v332_v35 }
  0x7d   :  { %v76_v26 = vsel %vm26_vm0, %v63_v23, 0.0  ;;  %v67_v27 = vsel %vm26_vm0, %v60_v24, 0.0 }
  0x7e   :  { %77 = vadd.xlane.f32.xlu2 %v76_v26  ;;  %68 = vadd.xlane.f32.xlu1 %v67_v27  ;;  %v35_v28 = vpop.xlane.xlu1 %34  ;;  %v29_v29 = vpop.xlane.xlu0 %28  ;;  %v73_v41 = vsel %vm26_vm0, %v62_v40, 0.0 }
  0x7f   :  { %v51_v30 = vmul.f32 %v311_v16, %v35_v28  ;;  %v49_v31 = vmul.f32 %v311_v16, %v29_v29 }
  0x81   :  { %v328_v33 = vsub.f32 %v23_v6, %v51_v30  ;;  %v330_v34 = vsub.f32 %v21_v7, %v49_v31 }
  0x83   :  { %v61_v36 = vmul.f32 %v328_v33, %v328_v33  ;;  %v59_v37 = vmul.f32 %v330_v34, %v330_v34 }
  0x85   :  { %v70_v38 = vsel %vm26_vm0, %v61_v36, 0.0  ;;  %v64_v39 = vsel %vm26_vm0, %v59_v37, 0.0 }
  0x86   :  { %71 = vadd.xlane.f32.xlu2 %v70_v38  ;;  %65 = vadd.xlane.f32.xlu0 %v64_v39 }
  0x8e   :  { %74 = vadd.xlane.f32.xlu0 %v73_v41 }
  0xf1   :  { %v78_v44 = vpop.xlane.xlu2 %77  ;;  %v69_v45 = vpop.xlane.xlu1 %68 }
  0xf2   :  { %v83_v46 = vmul.f32 %v78_v44, %v311_v16  ;;  %v80_v47 = vmul.f32 %v69_v45, %v311_v16 }
  0xf4   :  { %v88_v48 = vadd.f32 1e-06, %v83_v46  ;;  %v85_v49 = vadd.f32 1e-06, %v80_v47 }
  0xf6   :  { %250 = vrsqrt.f32 %v88_v48  ;;  %vm135_vm3 = vweird.f32 %v88_v48  ;;  %vm105_vm4 = vweird.f32 %v85_v49 }
  0xf7   :  { %252 = vrsqrt.f32 %v85_v49 }
  0xf9   :  { %v72_v50 = vpop.xlane.xlu2 %71  ;;  %v66_v51 = vpop.xlane.xlu0 %65 }
  0xfa   :  { %v81_v52 = vmul.f32 %v72_v50, %v311_v16  ;;  %v79_v53 = vmul.f32 %v66_v51, %v311_v16 }
  0xfc   :  { %v251_v54 = vpop.eup %250  ;;  %v86_v55 = vadd.f32 1e-06, %v81_v52  ;;  %v84_v56 = vadd.f32 1e-06, %v79_v53 }
  0xfd   :  { %v253_v57 = vpop.eup %252  ;;  %v130_v58 = vmul.f32 %v251_v54, %v88_v48  ;;  %vm136_vm2 = vweird.f32 %v251_v54 }
  0xfe   :  { %v100_v59 = vmul.f32 %v253_v57, %v85_v49  ;;  %254 = vrsqrt.f32 %v86_v55  ;;  %vm137_vm5 = vmor %vm135_vm3, %vm136_vm2  ;;  %vm106_vm6 = vweird.f32 %v253_v57  ;;  %vm115_vm8 = vweird.f32 %v86_v55 }
  0xff   :  { %v131_v60 = vmul.f32 %v251_v54, %v130_v58  ;;  %256 = vrsqrt.f32 %v84_v56  ;;  %vm107_vm7 = vmor %vm105_vm4, %vm106_vm6  ;;  %vm95_vm11 = vweird.f32 %v84_v56  ;;  %vm217_vm2 = vcmask 785408  }
 0x100   :  { %v101_v61 = vmul.f32 %v253_v57, %v100_v59 }
 0x101   :  { %v132_v62 = vmul.f32 0.5, %v131_v60  ;;  %v75_v63 = vpop.xlane.xlu0 %74 }
 0x102   :  { %v102_v0 = vmul.f32 0.5, %v101_v61  ;;  %v82_v1 = vmul.f32 %v75_v63, %v311_v16  ;;  %v246_v16 = vld [vmem:[%s388_s2] ss:$0 sm:$0xff] }
 0x103   :  { %v133_v2 = vsub.f32 1.5, %v132_v62 }
 0x104   :  { %v255_v3 = vpop.eup %254  ;;  %v103_v4 = vsub.f32 1.5, %v102_v0  ;;  %v87_v5 = vadd.f32 1e-06, %v82_v1 }
 0x105   :  { %v257_v6 = vpop.eup %256  ;;  %v134_v7 = vmul.f32 %v251_v54, %v133_v2  ;;  %v110_v8 = vmul.f32 %v255_v3, %v86_v55  ;;  %vm116_vm10 = vweird.f32 %v255_v3 }
 0x106   :  { %v104_v9 = vmul.f32 %v253_v57, %v103_v4  ;;  %v90_v10 = vmul.f32 %v257_v6, %v84_v56  ;;  %258 = vrsqrt.f32 %v87_v5  ;;  %vm96_vm9 = vweird.f32 %v257_v6  ;;  %vm117_vm13 = vmor %vm115_vm8, %vm116_vm10 }
 0x107   :  { %v138_v12 = vsel %vm137_vm5, %v251_v54, %v134_v7  ;;  %v111_v13 = vmul.f32 %v255_v3, %v110_v8  ;;  %vm97_vm12 = vmor %vm95_vm11, %vm96_vm9  ;;  %vm125_vm15 = vweird.f32 %v87_v5 }
 0x108   :  { %v91_v14 = vmul.f32 %v257_v6, %v90_v10  ;;  %v143_v15 = vmul.f32 %v138_v12, %v315_v21  ;;  %v108_v18 = vsel %vm107_vm7, %v253_v57, %v104_v9 }
 0x109   :  { %v112_v17 = vmul.f32 0.5, %v111_v13  ;;  %v140_v27 = vmul.f32 %v108_v18, %v317_v22 }
 0x10a   :  { %v92_v19 = vmul.f32 0.5, %v91_v14  ;;  %v152_v20 = vmul.f32 %v245_v11, %v143_v15 }
 0x10b   :  { %v113_v23 = vsub.f32 1.5, %v112_v17  ;;  %v149_v39 = vmul.f32 %v245_v11, %v140_v27 }
 0x10c   :  { %v259_v24 = vpop.eup %258  ;;  %v93_v25 = vsub.f32 1.5, %v92_v19  ;;  %v161_v26 = vadd.f32 %v246_v16, %v152_v20 }
 0x10d   :  { %v114_v28 = vmul.f32 %v255_v3, %v113_v23  ;;  %v120_v21 = vmul.f32 %v259_v24, %v87_v5  ;;  %vm126_vm14 = vweird.f32 %v259_v24  ;;  %v158_v44 = vadd.f32 %v246_v16, %v149_v39 }
 0x10e   :  { %v94_v29 = vmul.f32 %v257_v6, %v93_v25  ;;  %v164_v30 = vpack.c.bf16 %v161_v26, %v161_v26  ;;  %vm127_vm1 = vmor %vm125_vm15, %vm126_vm14 }
 0x10f   :  { %v121_v31 = vmul.f32 %v259_v24, %v120_v21  ;;  %v118_v36 = vsel %vm117_vm13, %v255_v3, %v114_v28 }
 0x110   :  { %v98_v32 = vsel %vm97_vm12, %v257_v6, %v94_v29  ;;  %237 = vmatmul.msk.bf16.vlgmr.msra.gmra.mxu2 %vm26_vm0, %v164_v30  ;;  %v141_v41 = vmul.f32 %v118_v36, %v328_v33  ;;  %v247_v33 = vld [vmem:[%s389_s4] ss:$0 sm:$0xff] }
 0x111   :  { %v139_v37 = vmul.f32 %v98_v32, %v330_v34  ;;  %v122_v38 = vmul.f32 0.5, %v121_v31 }
 0x112   :  { %v150_v48 = vmul.f32 %v245_v11, %v141_v41 }
 0x113   :  { %v123_v40 = vsub.f32 1.5, %v122_v38  ;;  %v148_v22 = vmul.f32 %v245_v11, %v139_v37 }
 0x114   :  { %v159_v49 = vadd.f32 %v246_v16, %v150_v48 }
 0x115   :  { %v124_v42 = vmul.f32 %v259_v24, %v123_v40  ;;  %v157_v43 = vadd.f32 %v246_v16, %v148_v22 }
 0x117   :  { %v128_v45 = vsel %vm127_vm1, %v259_v24, %v124_v42  ;;  %v162_v46 = vpack.c.bf16 %v158_v44, %v157_v43 }
 0x118   :  { %v142_v47 = vmul.f32 %v128_v45, %v332_v35 }
 0x119   :  { %235 = vmatmul.msk.bf16.vlgmr.msra.gmra.mxu0 %vm26_vm0, %v162_v46 }
 0x11a   :  { %v151_v34 = vmul.f32 %v245_v11, %v142_v47 }
 0x11c   :  { %v160_v50 = vadd.f32 %v246_v16, %v151_v34 }
 0x11e   :  { %v163_v51 = vpack.c.bf16 %v160_v50, %v159_v49 }
 0x120   :  { %236 = vmatmul.msk.bf16.vlgmr.msra.gmra.mxu1 %vm26_vm0, %v163_v51 }
 0x193   :  { %v213_v52 = vpop.f32.mrf.mxu2 }
 0x194   :  { %v214_v53 = vadd.f32 %v247_v33, %v213_v52 }
 0x196   :  { %222 = vst.msk [vmem:[%s391_s5 + $0x20] sm:$0xff] %vm217_vm2, %v214_v53  ;;  %v203_v35 = vpop.f32.mrf.mxu0 }
 0x197   :  { %v204_v54 = vadd.f32 %v247_v33, %v203_v35 }
 0x199   :  { %218 = vst.msk [vmem:[%s391_s5] sm:$0xff] %vm217_vm2, %v204_v54 }
 0x19b   :  { %v215_v55 = vpop.f32.mrf.mxu2 }
 0x19d   :  { %v208_v56 = vpop.f32.mrf.mxu1 }
 0x19e   :  { %v205_v57 = vpop.f32.mrf.mxu0  ;;  %v209_v58 = vadd.f32 %v247_v33, %v208_v56 }
 0x19f   :  { %v206_v59 = vadd.f32 %v247_v33, %v205_v57 }
 0x1a0   :  { %220 = vst.msk [vmem:[%s391_s5 + $0x10] sm:$0xff] %vm217_vm2, %v209_v58 }
 0x1a1   :  { %219 = vst.msk [vmem:[%s391_s5 + $0x8] sm:$0xff] %vm217_vm2, %v206_v59 }
 0x1a5   :  { %v210_v60 = vpop.f32.mrf.mxu1 }
 0x1a6   :  { %v211_v61 = vadd.f32 %v247_v33, %v210_v60 }
 0x1a8   :  { %221 = vst.msk [vmem:[%s391_s5 + $0x18] sm:$0xff] %vm217_vm2, %v211_v61 }

// kernel: _lambda_.28
= control target key start
LH: loop header
LB: loop body
LE: loop exit
PB: predicated region body
PF: predicated region fallthrough
CT: control target
= control target key end

     0   :  { %vm43_vm0 = vcmask 261120   ;;  %s170_s1 = inlined_call_operand.vmem [shape: bf16[32,32], index: 1, kind: input, shape index: {}]   ;;  %s171_s0 = inlined_call_operand.vmem [shape: f32[40,32], index: 0, kind: input, shape index: {}]   ;;  %s172_s2 = inlined_call_operand.vmem [shape: f32[1,32], index: 2, kind: input, shape index: {}]   ;;  %s173_s3 = inlined_call_operand.vmem [shape: f32[40,32], index: 3, kind: output, shape index: {}]  }
   0x1   :  { %v97_v0 = vld [vmem:[%s170_s1 + $0x8] sm:$0xff]  ;;  %v96_v1 = vld [vmem:[%s170_s1] sm:$0xff]  ;;  %v17_v4 = vld [vmem:[%s171_s0 + $0x10] sm:$0xff] }
   0x2   :  { %v15_v2 = vld [vmem:[%s171_s0] sm:$0xff]  ;;  %v16_v3 = vld [vmem:[%s171_s0 + $0x8] sm:$0xff]  ;;  %59 = vmatpush.bf16.msra.mxu0 %v97_v0  ;;  %98 = vmatpush.bf16.msra.mxu1 %v97_v0  ;;  %v18_v5 = vld [vmem:[%s171_s0 + $0x18] sm:$0xff] }
   0x3   :  { %99 = vmatpush.bf16.msra.mxu2 %v97_v0  ;;  %v19_v6 = vld [vmem:[%s171_s0 + $0x20] sm:$0xff]  ;;  %v20_v7 = vpack.c.bf16 %v16_v3, %v15_v2  ;;  %v21_v8 = vpack.c.bf16 %v18_v5, %v17_v4 }
   0x4   :  { %v22_v9 = vpack.c.bf16 %v19_v6, %v19_v6  ;;  %v102_v10 = vld [vmem:[%s172_s2] ss:$0 sm:$0xff] }
   0x6   :  { %60 = vmatpush.bf16.msra.mxu0 %v96_v1  ;;  %100 = vmatpush.bf16.msra.mxu1 %v96_v1 }
   0x7   :  { %101 = vmatpush.bf16.msra.mxu2 %v96_v1 }
   0x9   :  { %93 = vmatmul.msk.bf16.vlgmr.msra.gmra.mxu0 %vm43_vm0, %v20_v7  ;;  %94 = vmatmul.msk.bf16.vlgmr.msra.gmra.mxu1 %vm43_vm0, %v21_v8 }
   0xa   :  { %95 = vmatmul.msk.bf16.vlgmr.msra.gmra.mxu2 %vm43_vm0, %v22_v9 }
  0x86   :  { %v62_v11 = vpop.f32.mrf.mxu0  ;;  %v67_v12 = vpop.f32.mrf.mxu1 }
  0x87   :  { %v63_v13 = vadd.f32 %v102_v10, %v62_v11  ;;  %v68_v14 = vadd.f32 %v102_v10, %v67_v12 }
  0x89   :  { %76 = vst.msk [vmem:[%s173_s3] sm:$0xff] %vm43_vm0, %v63_v13 }
  0x8a   :  { %78 = vst.msk [vmem:[%s173_s3 + $0x10] sm:$0xff] %vm43_vm0, %v68_v14 }
  0x8d   :  { %v72_v15 = vpop.f32.mrf.mxu2 }
  0x8e   :  { %v73_v16 = vadd.f32 %v102_v10, %v72_v15  ;;  %v64_v17 = vpop.f32.mrf.mxu0  ;;  %v69_v18 = vpop.f32.mrf.mxu1 }
  0x8f   :  { %v65_v19 = vadd.f32 %v102_v10, %v64_v17  ;;  %v70_v20 = vadd.f32 %v102_v10, %v69_v18 }
  0x90   :  { %80 = vst.msk [vmem:[%s173_s3 + $0x20] sm:$0xff] %vm43_vm0, %v73_v16 }
  0x91   :  { %77 = vst.msk [vmem:[%s173_s3 + $0x8] sm:$0xff] %vm43_vm0, %v65_v19 }
  0x92   :  { %79 = vst.msk [vmem:[%s173_s3 + $0x18] sm:$0xff] %vm43_vm0, %v70_v20 }
  0x95   :  { %v74_v21 = vpop.f32.mrf.mxu2 }

// kernel: _lambda_.30
= control target key start
LH: loop header
LB: loop body
LE: loop exit
PB: predicated region body
PF: predicated region fallthrough
CT: control target
= control target key end

     0   :  { %vm62_vm0 = vcmask 523264   ;;  %vm105_vm1 = vcmask 261120   ;;  %s237_s1 = inlined_call_operand.vmem [shape: bf16[64,32], index: 1, kind: input, shape index: {}]   ;;  %s238_s2 = inlined_call_operand.vmem [shape: f32[1,32], index: 2, kind: input, shape index: {}]   ;;  %s239_s0 = inlined_call_operand.vmem [shape: f32[34,64], index: 0, kind: input, shape index: {}]   ;;  %s240_s3 = inlined_call_operand.vmem [shape: f32[34,32], index: 3, kind: input, shape index: {}]   ;;  %s241_s4 = inlined_call_operand.vmem [shape: f32[34,32], index: 4, kind: output, shape index: {}]  }
   0x1   :  { %v137_v0 = vld [vmem:[%s237_s1 + $0x18] sm:$0xff]  ;;  %v136_v1 = vld [vmem:[%s237_s1 + $0x10] sm:$0xff]  ;;  %v135_v2 = vld [vmem:[%s237_s1 + $0x8] sm:$0xff] }
   0x2   :  { %76 = vmatpush.bf16.msra.mxu0 %v137_v0  ;;  %138 = vmatpush.bf16.msra.mxu1 %v137_v0  ;;  %v134_v3 = vld [vmem:[%s237_s1] sm:$0xff]  ;;  %v19_v5 = vld [vmem:[%s239_s0 + $0x8] sm:$0xff]  ;;  %v20_v6 = vld [vmem:[%s239_s0 + $0x10] sm:$0xff] }
   0x3   :  { %139 = vmatpush.bf16.msra.mxu2 %v137_v0  ;;  %v18_v4 = vld [vmem:[%s239_s0] sm:$0xff]  ;;  %v21_v7 = vld [vmem:[%s239_s0 + $0x18] sm:$0xff]  ;;  %v97_v16 = vld [vmem:[%s240_s3 + $0x10] sm:$0xff] }
   0x4   :  { %v22_v8 = vld [vmem:[%s239_s0 + $0x20] sm:$0xff]  ;;  %v23_v9 = vpack.c.bf16 %v19_v5, %v18_v4  ;;  %v24_v10 = vpack.c.bf16 %v21_v7, %v20_v6  ;;  %v96_v25 = vld [vmem:[%s240_s3 + $0x8] sm:$0xff]  ;;  %v98_v27 = vld [vmem:[%s240_s3 + $0x18] sm:$0xff] }
   0x5   :  { %v25_v11 = vpack.c.bf16 %v22_v8, %v22_v8  ;;  %v146_v12 = vld [vmem:[%s238_s2] ss:$0 sm:$0xff] }
   0x6   :  { %77 = vmatpush.bf16.msra.mxu0 %v136_v1  ;;  %140 = vmatpush.bf16.msra.mxu1 %v136_v1  ;;  %v95_v14 = vld [vmem:[%s240_s3] sm:$0xff] }
   0x7   :  { %141 = vmatpush.bf16.msra.mxu2 %v136_v1  ;;  %v99_v22 = vld [vmem:[%s240_s3 + $0x20] sm:$0xff] }
   0xa   :  { %78 = vmatpush.bf16.msra.mxu0 %v135_v2  ;;  %142 = vmatpush.bf16.msra.mxu1 %v135_v2 }
   0xb   :  { %143 = vmatpush.bf16.msra.mxu2 %v135_v2 }
   0xe   :  { %79 = vmatpush.bf16.msra.mxu0 %v134_v3  ;;  %144 = vmatpush.bf16.msra.mxu1 %v134_v3 }
   0xf   :  { %145 = vmatpush.bf16.msra.mxu2 %v134_v3 }
  0x11   :  { %131 = vmatmul.msk.bf16.vlgmr.msra.gmra.mxu0 %vm62_vm0, %v23_v9  ;;  %132 = vmatmul.msk.bf16.vlgmr.msra.gmra.mxu1 %vm62_vm0, %v24_v10 }
  0x12   :  { %133 = vmatmul.msk.bf16.vlgmr.msra.gmra.mxu2 %vm62_vm0, %v25_v11 }
  0x8e   :  { %v81_v13 = vpop.f32.mrf.mxu0  ;;  %v86_v15 = vpop.f32.mrf.mxu1 }
  0x8f   :  { %v82_v17 = vadd.f32 %v146_v12, %v81_v13  ;;  %v87_v18 = vadd.f32 %v146_v12, %v86_v15 }
  0x91   :  { %v100_v19 = vadd.f32 %v95_v14, %v82_v17  ;;  %v102_v20 = vadd.f32 %v97_v16, %v87_v18 }
  0x93   :  { %106 = vst.msk [vmem:[%s241_s4] sm:$0xff] %vm105_vm1, %v100_v19 }
  0x94   :  { %108 = vst.msk [vmem:[%s241_s4 + $0x10] sm:$0xff] %vm105_vm1, %v102_v20 }
  0x95   :  { %v91_v21 = vpop.f32.mrf.mxu2 }
  0x96   :  { %v92_v23 = vadd.f32 %v146_v12, %v91_v21  ;;  %v83_v24 = vpop.f32.mrf.mxu0  ;;  %v88_v26 = vpop.f32.mrf.mxu1 }
  0x97   :  { %v84_v28 = vadd.f32 %v146_v12, %v83_v24  ;;  %v89_v29 = vadd.f32 %v146_v12, %v88_v26 }
  0x98   :  { %v104_v30 = vadd.f32 %v99_v22, %v92_v23 }
  0x99   :  { %v101_v31 = vadd.f32 %v96_v25, %v84_v28  ;;  %v103_v32 = vadd.f32 %v98_v27, %v89_v29 }
  0x9a   :  { %110 = vst.msk [vmem:[%s241_s4 + $0x20] sm:$0xff] %vm105_vm1, %v104_v30 }
  0x9b   :  { %107 = vst.msk [vmem:[%s241_s4 + $0x8] sm:$0xff] %vm105_vm1, %v101_v31 }
  0x9c   :  { %109 = vst.msk [vmem:[%s241_s4 + $0x18] sm:$0xff] %vm105_vm1, %v103_v32 }
  0x9d   :  { %v93_v33 = vpop.f32.mrf.mxu2 }

// kernel: _lambda_.29
= control target key start
LH: loop header
LB: loop body
LE: loop exit
PB: predicated region body
PF: predicated region fallthrough
CT: control target
= control target key end

     0   :  { %vm26_vm0 = vcmask 261120   ;;  %v495_v10 = vmov 32.0   ;;  %s749_s0 = inlined_call_operand.vmem [shape: f32[34,32], index: 0, kind: input, shape index: {}]   ;;  %s750_s1 = inlined_call_operand.vmem [shape: f32[1,32], index: 1, kind: input, shape index: {}]   ;;  %s751_s2 = inlined_call_operand.vmem [shape: f32[1,32], index: 2, kind: input, shape index: {}]   ;;  %s752_s4 = inlined_call_operand.vmem [shape: f32[1,64], index: 4, kind: input, shape index: {}]   ;;  %s753_s3 = inlined_call_operand.vmem [shape: bf16[32,64], index: 3, kind: input, shape index: {}]   ;;  %s754_s5 = inlined_call_operand.vmem [shape: f32[34,64], index: 5, kind: output, shape index: {}]  }
   0x1   :  { %v23_v0 = vld [vmem:[%s749_s0 + $0x10] sm:$0xff]  ;;  %v21_v1 = vld [vmem:[%s749_s0] sm:$0xff]  ;;  %v24_v6 = vld [vmem:[%s749_s0 + $0x18] sm:$0xff]  ;;  %473 = vrcp.f32 %v495_v10 }
   0x2   :  { %v33_v2 = vsel %vm26_vm0, %v23_v0, 0.0  ;;  %v27_v3 = vsel %vm26_vm0, %v21_v1, 0.0  ;;  %v25_v4 = vld [vmem:[%s749_s0 + $0x20] sm:$0xff]  ;;  %v22_v7 = vld [vmem:[%s749_s0 + $0x8] sm:$0xff]  ;;  %v36_v8 = vsel %vm26_vm0, %v24_v6, 0.0 }
   0x3   :  { %34 = vadd.xlane.f32.xlu1 %v33_v2  ;;  %28 = vadd.xlane.f32.xlu0 %v27_v3  ;;  %v39_v5 = vsel %vm26_vm0, %v25_v4, 0.0  ;;  %v30_v9 = vsel %vm26_vm0, %v22_v7, 0.0  ;;  %v464_v42 = vld [vmem:[%s753_s3 + $0x8] sm:$0xff]  ;;  %v463_v49 = vld [vmem:[%s753_s3] sm:$0xff] }
   0x4   :  { %40 = vadd.xlane.f32.xlu2 %v39_v5  ;;  %200 = vmatpush.bf16.msra.mxu0 %v464_v42 }
   0x5   :  { %465 = vmatpush.bf16.msra.mxu1 %v464_v42  ;;  %466 = vmatpush.bf16.msra.mxu2 %v464_v42 }
   0x7   :  { %v474_v11 = vpop.eup %473 }
   0x8   :  { %v43_v12 = vmul.f32 32.0, %v474_v11  ;;  %vm47_vm1 = vweird.f32 %v474_v11  ;;  %201 = vmatpush.bf16.msra.mxu0 %v463_v49 }
   0x9   :  { %467 = vmatpush.bf16.msra.mxu1 %v463_v49  ;;  %468 = vmatpush.bf16.msra.mxu2 %v463_v49 }
   0xa   :  { %v44_v13 = vsub.f32 1.0, %v43_v12 }
   0xb   :  { %37 = vadd.xlane.f32.xlu1 %v36_v8  ;;  %31 = vadd.xlane.f32.xlu0 %v30_v9 }
   0xc   :  { %v45_v14 = vmul.f32 %v474_v11, %v44_v13 }
   0xe   :  { %v46_v15 = vadd.f32 %v474_v11, %v45_v14 }
  0x10   :  { %v546_v16 = vsel %vm47_vm1, %v474_v11, %v46_v15 }
  0x76   :  { %v35_v17 = vpop.xlane.xlu1 %34  ;;  %v29_v18 = vpop.xlane.xlu0 %28 }
  0x77   :  { %v51_v19 = vmul.f32 %v546_v16, %v35_v17  ;;  %v49_v20 = vmul.f32 %v546_v16, %v29_v18  ;;  %v41_v25 = vpop.xlane.xlu2 %40 }
  0x78   :  { %v53_v32 = vmul.f32 %v546_v16, %v41_v25 }
  0x79   :  { %v550_v21 = vsub.f32 %v23_v0, %v51_v19  ;;  %v552_v22 = vsub.f32 %v21_v1, %v49_v20 }
  0x7a   :  { %v567_v35 = vsub.f32 %v25_v4, %v53_v32 }
  0x7b   :  { %v61_v23 = vmul.f32 %v550_v21, %v550_v21  ;;  %v59_v24 = vmul.f32 %v552_v22, %v552_v22 }
  0x7c   :  { %v63_v40 = vmul.f32 %v567_v35, %v567_v35 }
  0x7d   :  { %v70_v26 = vsel %vm26_vm0, %v61_v23, 0.0  ;;  %v64_v27 = vsel %vm26_vm0, %v59_v24, 0.0  ;;  %v470_v23 = vld [vmem:[%s750_s1] ss:$0 sm:$0xff] }
  0x7e   :  { %71 = vadd.xlane.f32.xlu1 %v70_v26  ;;  %v38_v28 = vpop.xlane.xlu1 %37  ;;  %65 = vadd.xlane.f32.xlu2 %v64_v27  ;;  %v32_v29 = vpop.xlane.xlu0 %31  ;;  %v76_v41 = vsel %vm26_vm0, %v63_v40, 0.0 }
  0x7f   :  { %v52_v30 = vmul.f32 %v546_v16, %v38_v28  ;;  %v50_v31 = vmul.f32 %v546_v16, %v32_v29 }
  0x81   :  { %v563_v33 = vsub.f32 %v24_v6, %v52_v30  ;;  %v565_v34 = vsub.f32 %v22_v7, %v50_v31 }
  0x83   :  { %v62_v36 = vmul.f32 %v563_v33, %v563_v33  ;;  %v60_v37 = vmul.f32 %v565_v34, %v565_v34 }
  0x85   :  { %v73_v38 = vsel %vm26_vm0, %v62_v36, 0.0  ;;  %v67_v39 = vsel %vm26_vm0, %v60_v37, 0.0 }
  0x86   :  { %74 = vadd.xlane.f32.xlu2 %v73_v38  ;;  %68 = vadd.xlane.f32.xlu0 %v67_v39 }
  0x8e   :  { %77 = vadd.xlane.f32.xlu0 %v76_v41 }
  0xf1   :  { %v72_v43 = vpop.xlane.xlu1 %71  ;;  %v66_v44 = vpop.xlane.xlu2 %65 }
  0xf2   :  { %v81_v45 = vmul.f32 %v72_v43, %v546_v16  ;;  %v79_v46 = vmul.f32 %v66_v44, %v546_v16 }
  0xf4   :  { %v86_v47 = vadd.f32 1e-06, %v81_v45  ;;  %v84_v48 = vadd.f32 1e-06, %v79_v46 }
  0xf6   :  { %475 = vrsqrt.f32 %v86_v47  ;;  %vm115_vm2 = vweird.f32 %v86_v47  ;;  %vm95_vm6 = vweird.f32 %v84_v48 }
  0xf7   :  { %477 = vrsqrt.f32 %v84_v48 }
  0xf9   :  { %v75_v50 = vpop.xlane.xlu2 %74  ;;  %v69_v51 = vpop.xlane.xlu0 %68 }
  0xfa   :  { %v82_v52 = vmul.f32 %v75_v50, %v546_v16  ;;  %v80_v53 = vmul.f32 %v69_v51, %v546_v16  ;;  %v472_v51 = vld [vmem:[%s752_s4] ss:$0 sm:$0xff] }
  0xfc   :  { %v476_v54 = vpop.eup %475  ;;  %v87_v55 = vadd.f32 1e-06, %v82_v52  ;;  %v85_v56 = vadd.f32 1e-06, %v80_v53 }
  0xfd   :  { %v478_v57 = vpop.eup %477  ;;  %v110_v58 = vmul.f32 %v476_v54, %v86_v47  ;;  %vm116_vm3 = vweird.f32 %v476_v54 }
  0xfe   :  { %v90_v59 = vmul.f32 %v478_v57, %v84_v48  ;;  %479 = vrsqrt.f32 %v87_v55  ;;  %vm96_vm4 = vweird.f32 %v478_v57  ;;  %vm117_vm5 = vmor %vm115_vm2, %vm116_vm3  ;;  %vm125_vm8 = vweird.f32 %v87_v55 }
  0xff   :  { %v111_v60 = vmul.f32 %v476_v54, %v110_v58  ;;  %481 = vrsqrt.f32 %v85_v56  ;;  %vm97_vm7 = vmor %vm95_vm6, %vm96_vm4  ;;  %vm105_vm12 = vweird.f32 %v85_v56 }
 0x100   :  { %v91_v61 = vmul.f32 %v478_v57, %v90_v59 }
 0x101   :  { %v112_v62 = vmul.f32 0.5, %v111_v60  ;;  %v78_v63 = vpop.xlane.xlu0 %77 }
 0x102   :  { %v92_v0 = vmul.f32 0.5, %v91_v61  ;;  %v83_v1 = vmul.f32 %v78_v63, %v546_v16 }
 0x103   :  { %v113_v2 = vsub.f32 1.5, %v112_v62 }
 0x104   :  { %v480_v3 = vpop.eup %479  ;;  %v93_v4 = vsub.f32 1.5, %v92_v0  ;;  %v88_v5 = vadd.f32 1e-06, %v83_v1 }
 0x105   :  { %v482_v6 = vpop.eup %481  ;;  %v114_v7 = vmul.f32 %v476_v54, %v113_v2  ;;  %v120_v8 = vmul.f32 %v480_v3, %v87_v55  ;;  %vm126_vm9 = vweird.f32 %v480_v3 }
 0x106   :  { %v94_v9 = vmul.f32 %v478_v57, %v93_v4  ;;  %v100_v10 = vmul.f32 %v482_v6, %v85_v56  ;;  %483 = vrsqrt.f32 %v88_v5  ;;  %vm106_vm10 = vweird.f32 %v482_v6  ;;  %vm127_vm11 = vmor %vm125_vm8, %vm126_vm9 }
 0x107   :  { %v121_v11 = vmul.f32 %v480_v3, %v120_v8  ;;  %v118_v13 = vsel %vm117_vm5, %v476_v54, %v114_v7  ;;  %vm107_vm13 = vmor %vm105_vm12, %vm106_vm10  ;;  %vm135_vm15 = vweird.f32 %v88_v5  ;;  %vm437_vm9 = vcmask 523264  }
 0x108   :  { %v101_v12 = vmul.f32 %v482_v6, %v100_v10  ;;  %v98_v15 = vsel %vm97_vm7, %v478_v57, %v94_v9  ;;  %v141_v19 = vmul.f32 %v118_v13, %v550_v21  ;;  %v471_v21 = vld [vmem:[%s751_s2] ss:$0 sm:$0xff] }
 0x109   :  { %v122_v14 = vmul.f32 0.5, %v121_v11  ;;  %v139_v24 = vmul.f32 %v98_v15, %v552_v22 }
 0x10a   :  { %v102_v16 = vmul.f32 0.5, %v101_v12  ;;  %v150_v32 = vmul.f32 %v470_v23, %v141_v19 }
 0x10b   :  { %v123_v17 = vsub.f32 1.5, %v122_v14  ;;  %v148_v22 = vmul.f32 %v470_v23, %v139_v24 }
 0x10c   :  { %v484_v18 = vpop.eup %483  ;;  %v103_v20 = vsub.f32 1.5, %v102_v16  ;;  %v159_v41 = vadd.f32 %v471_v21, %v150_v32 }
 0x10d   :  { %v124_v25 = vmul.f32 %v480_v3, %v123_v17  ;;  %v130_v26 = vmul.f32 %v484_v18, %v88_v5  ;;  %vm136_vm14 = vweird.f32 %v484_v18  ;;  %v157_v44 = vadd.f32 %v471_v21, %v148_v22 }
 0x10e   :  { %v104_v27 = vmul.f32 %v482_v6, %v103_v20  ;;  %vm137_vm1 = vmor %vm135_vm15, %vm136_vm14 }
 0x10f   :  { %v128_v28 = vsel %vm127_vm11, %v480_v3, %v124_v25  ;;  %v131_v29 = vmul.f32 %v484_v18, %v130_v26 }
 0x110   :  { %v142_v30 = vmul.f32 %v128_v28, %v563_v33  ;;  %v108_v31 = vsel %vm107_vm13, %v482_v6, %v104_v27 }
 0x111   :  { %v140_v36 = vmul.f32 %v108_v31, %v565_v34  ;;  %v132_v37 = vmul.f32 0.5, %v131_v29 }
 0x112   :  { %v151_v38 = vmul.f32 %v470_v23, %v142_v30 }
 0x113   :  { %v133_v39 = vsub.f32 1.5, %v132_v37  ;;  %v149_v40 = vmul.f32 %v470_v23, %v140_v36 }
 0x114   :  { %v160_v42 = vadd.f32 %v471_v21, %v151_v38 }
 0x115   :  { %v134_v43 = vmul.f32 %v484_v18, %v133_v39  ;;  %v158_v33 = vadd.f32 %v471_v21, %v149_v40 }
 0x116   :  { %v163_v45 = vpack.c.bf16 %v160_v42, %v159_v41 }
 0x117   :  { %v138_v46 = vsel %vm137_vm1, %v484_v18, %v134_v43  ;;  %v162_v47 = vpack.c.bf16 %v158_v33, %v157_v44 }
 0x118   :  { %456 = vmatmul.msk.bf16.vlgmr.msra.gmra.mxu1 %vm26_vm0, %v163_v45  ;;  %v143_v34 = vmul.f32 %v138_v46, %v567_v35 }
 0x119   :  { %455 = vmatmul.msk.bf16.vlgmr.msra.gmra.mxu0 %vm26_vm0, %v162_v47 }
 0x11a   :  { %v152_v48 = vmul.f32 %v470_v23, %v143_v34 }
 0x11c   :  { %v161_v49 = vadd.f32 %v471_v21, %v152_v48 }
 0x11e   :  { %v164_v50 = vpack.c.bf16 %v161_v49, %v161_v49 }
 0x120   :  { %457 = vmatmul.msk.bf16.vlgmr.msra.gmra.mxu2 %vm26_vm0, %v164_v50 }
 0x195   :  { %v208_v52 = vpop.f32.mrf.mxu1 }
 0x196   :  { %v203_v53 = vpop.f32.mrf.mxu0  ;;  %v606_v54 = vadd.f32 %v472_v51, %v208_v52 }
 0x197   :  { %v608_v55 = vadd.f32 %v472_v51, %v203_v53 }
 0x198   :  { %v611_v56 = vmul.f32 0.70710677, %v606_v54 }
 0x199   :  { %v614_v35 = vmul.f32 0.70710677, %v608_v55 }
 0x19a   :  { %v307_v57 = vmul.f32 %v611_v56, %v611_v56 }
 0x19b   :  { %v227_v58 = vmul.f32 %v614_v35, %v614_v35 }
 0x19c   :  { %v308_v59 = vmin.f32 %v307_v57, 16.0 }
 0x19d   :  { %v620_v60 = vmin.f32 %v227_v58, 16.0  ;;  %v210_v61 = vpop.f32.mrf.mxu1 }
 0x19e   :  { %v309_v62 = vmul.f32 2.1237322e-06, %v308_v59  ;;  %v320_v63 = vmul.f32 3.8918573e-05, %v308_v59  ;;  %v205_v0 = vpop.f32.mrf.mxu0  ;;  %v622_v1 = vadd.f32 %v472_v51, %v210_v61 }
 0x19f   :  { %v229_v2 = vmul.f32 2.1237322e-06, %v620_v60  ;;  %v240_v3 = vmul.f32 3.8918573e-05, %v620_v60  ;;  %v626_v4 = vadd.f32 %v472_v51, %v205_v0 }
 0x1a0   :  { %v310_v5 = vadd.f32 0.00028619796, %v309_v62  ;;  %v321_v6 = vadd.f32 0.001143296, %v320_v63  ;;  %v632_v12 = vmul.f32 0.70710677, %v622_v1 }
 0x1a1   :  { %v230_v7 = vadd.f32 0.00028619796, %v229_v2  ;;  %v241_v8 = vadd.f32 0.001143296, %v240_v3  ;;  %v629_v11 = vmul.f32 0.70710677, %v626_v4 }
 0x1a2   :  { %v311_v9 = vmul.f32 %v310_v5, %v308_v59  ;;  %v322_v10 = vmul.f32 %v321_v6, %v308_v59  ;;  %v347_v19 = vmul.f32 %v632_v12, %v632_v12 }
 0x1a3   :  { %v231_v13 = vmul.f32 %v230_v7, %v620_v60  ;;  %v242_v14 = vmul.f32 %v241_v8, %v620_v60  ;;  %v213_v15 = vpop.f32.mrf.mxu2  ;;  %v267_v18 = vmul.f32 %v629_v11, %v629_v11 }
 0x1a4   :  { %v312_v16 = vadd.f32 0.0036580483, %v311_v9  ;;  %v323_v17 = vadd.f32 0.014752088, %v322_v10  ;;  %v644_v29 = vmin.f32 %v347_v19, 16.0  ;;  %v648_v40 = vadd.f32 %v472_v51, %v213_v15 }
 0x1a5   :  { %v232_v20 = vadd.f32 0.0036580483, %v231_v13  ;;  %v243_v23 = vadd.f32 0.014752088, %v242_v14  ;;  %v640_v26 = vmin.f32 %v267_v18, 16.0 }
 0x1a6   :  { %v313_v24 = vmul.f32 %v312_v16, %v308_v59  ;;  %v324_v25 = vmul.f32 %v323_v17, %v308_v59  ;;  %v349_v44 = vmul.f32 2.1237322e-06, %v644_v29  ;;  %v360_v34 = vmul.f32 3.8918573e-05, %v644_v29 }
 0x1a7   :  { %v233_v27 = vmul.f32 %v232_v20, %v620_v60  ;;  %v244_v28 = vmul.f32 %v243_v23, %v620_v60  ;;  %v269_v21 = vmul.f32 2.1237322e-06, %v640_v26  ;;  %v280_v37 = vmul.f32 3.8918573e-05, %v640_v26 }
 0x1a8   :  { %v314_v30 = vadd.f32 0.05243302, %v313_v24  ;;  %v325_v31 = vadd.f32 0.112945676, %v324_v25  ;;  %v350_v50 = vadd.f32 0.00028619796, %v349_v44 }
 0x1a9   :  { %v234_v32 = vadd.f32 0.05243302, %v233_v27  ;;  %v245_v36 = vadd.f32 0.112945676, %v244_v28  ;;  %v270_v39 = vadd.f32 0.00028619796, %v269_v21 }
 0x1aa   :  { %v315_v22 = vmul.f32 %v314_v30, %v308_v59  ;;  %v326_v38 = vmul.f32 %v325_v31, %v308_v59  ;;  %v281_v43 = vadd.f32 0.001143296, %v280_v37  ;;  %v361_v53 = vadd.f32 0.001143296, %v360_v34 }
 0x1ab   :  { %v235_v41 = vmul.f32 %v234_v32, %v620_v60  ;;  %v246_v42 = vmul.f32 %v245_v36, %v620_v60  ;;  %v215_v33 = vpop.f32.mrf.mxu2  ;;  %v271_v47 = vmul.f32 %v270_v39, %v640_v26  ;;  %v657_v57 = vmul.f32 0.70710677, %v648_v40 }
 0x1ac   :  { %v316_v45 = vadd.f32 0.18741608, %v315_v22  ;;  %v327_v46 = vadd.f32 0.4994258, %v326_v38  ;;  %v282_v49 = vmul.f32 %v281_v43, %v640_v26  ;;  %v351_v5 = vmul.f32 %v350_v50, %v644_v29 }
 0x1ad   :  { %v247_v48 = vadd.f32 0.4994258, %v246_v42  ;;  %v236_v51 = vadd.f32 0.18741608, %v235_v41  ;;  %v272_v0 = vadd.f32 0.0036580483, %v271_v47  ;;  %v362_v6 = vmul.f32 %v361_v53, %v644_v29 }
 0x1ae   :  { %v328_v52 = vmul.f32 %v327_v46, %v308_v59  ;;  %v317_v61 = vmul.f32 %v316_v45, %v308_v59  ;;  %v283_v62 = vadd.f32 0.014752088, %v282_v49  ;;  %v387_v8 = vmul.f32 %v657_v57, %v657_v57 }
 0x1af   :  { %v248_v58 = vmul.f32 %v247_v48, %v620_v60  ;;  %v237_v7 = vmul.f32 %v236_v51, %v620_v60  ;;  %v273_v9 = vmul.f32 %v272_v0, %v640_v26  ;;  %v352_v13 = vadd.f32 0.0036580483, %v351_v5 }
 0x1b0   :  { %v329_v63 = vadd.f32 1.0, %v328_v52  ;;  %v284_v3 = vmul.f32 %v283_v62, %v640_v26  ;;  %v318_v59 = vadd.f32 1.1283791, %v317_v61  ;;  %v363_v14 = vadd.f32 0.014752088, %v362_v6 }
 0x1b1   :  { %v660_v2 = vadd.f32 1.0, %v248_v58  ;;  %v238_v15 = vadd.f32 1.1283791, %v237_v7  ;;  %v670_v16 = vmin.f32 %v387_v8, 16.0  ;;  %v274_v23 = vadd.f32 0.05243302, %v273_v9 }
 0x1b2   :  { %485 = vrcp.f32 %v329_v63  ;;  %v285_v10 = vadd.f32 0.112945676, %v284_v3  ;;  %v319_v17 = vmul.f32 %v318_v59, %v611_v56  ;;  %v339_v18 = vand.u32 2147483647, %v329_v63 }
 0x1b3   :  { %487 = vrcp.f32 %v660_v2  ;;  %v364_v19 = vmul.f32 %v363_v14, %v644_v29  ;;  %vm335_vm0 = vweird.f32 %v329_v63  ;;  %v389_v24 = vmul.f32 2.1237322e-06, %v670_v16 }
 0x1b4   :  { %v286_v60 = vmul.f32 %v285_v10, %v640_v26  ;;  %v400_v25 = vmul.f32 3.8918573e-05, %v670_v16  ;;  %vm255_vm2 = vweird.f32 %v660_v2  ;;  %v353_v31 = vmul.f32 %v352_v13, %v644_v29 }
 0x1b5   :  { %v259_v21 = vand.u32 2147483647, %v660_v2  ;;  %v261_v32 = vand.u32 2147483648, %v660_v2  ;;  %v365_v36 = vadd.f32 0.112945676, %v364_v19  ;;  %v341_v22 = vand.u32 2147483648, %v329_v63 }
 0x1b6   :  { %v287_v30 = vadd.f32 0.4994258, %v286_v60  ;;  %v390_v39 = vadd.f32 0.00028619796, %v389_v24  ;;  %v275_v42 = vmul.f32 %v274_v23, %v640_v26  ;;  %v401_v44 = vadd.f32 0.001143296, %v400_v25 }
 0x1b7   :  { %v366_v43 = vmul.f32 %v365_v36, %v644_v29  ;;  %v354_v46 = vadd.f32 0.05243302, %v353_v31  ;;  %vm688_vm5 = vcmp.eq.f32.partialorder %v339_v18, 8.507059e+37  ;;  %v342_v53 = vor.u32 1.1754944e-38, %v341_v22 }
 0x1b8   :  { %v486_v20 = vpop.eup %485  ;;  %v288_v38 = vmul.f32 %v287_v30, %v640_v26  ;;  %v402_v48 = vmul.f32 %v401_v44, %v670_v16  ;;  %v391_v51 = vmul.f32 %v390_v39, %v670_v16  ;;  %v276_v58 = vadd.f32 0.18741608, %v275_v42 }
 0x1b9   :  { %v488_v27 = vpop.eup %487  ;;  %v331_v28 = vmul.f32 %v486_v20, %v329_v63  ;;  %vm336_vm3 = vweird.f32 %v486_v20  ;;  %v367_v34 = vadd.f32 0.4994258, %v366_v43  ;;  %v262_v62 = vor.u32 1.1754944e-38, %v261_v32 }
 0x1ba   :  { %v251_v56 = vmul.f32 %v488_v27, %v660_v2  ;;  %v685_v45 = vadd.f32 1.0, %v288_v38  ;;  %vm256_vm4 = vweird.f32 %v488_v27  ;;  %vm337_vm6 = vmor %vm335_vm0, %vm336_vm3  ;;  %v355_v3 = vmul.f32 %v354_v46, %v644_v29 }
 0x1bb   :  { %v332_v37 = vsub.f32 1.0, %v331_v28  ;;  %v368_v61 = vmul.f32 %v367_v34, %v644_v29  ;;  %vm257_vm7 = vmor %vm255_vm2, %vm256_vm4  ;;  %v403_v5 = vadd.f32 0.014752088, %v402_v48  ;;  %v239_v6 = vmul.f32 %v238_v15, %v614_v35 }
 0x1bc   :  { %v252_v41 = vsub.f32 1.0, %v251_v56  ;;  %489 = vrcp.f32 %v685_v45  ;;  %vm260_vm8 = vcmp.eq.f32.partialorder %v259_v21, 8.507059e+37  ;;  %v392_v10 = vadd.f32 0.0036580483, %v391_v51 }
 0x1bd   :  { %v333_v33 = vmul.f32 %v486_v20, %v332_v37  ;;  %v702_v9 = vadd.f32 1.0, %v368_v61  ;;  %v277_v2 = vmul.f32 %v276_v58, %v640_v26  ;;  %v404_v14 = vmul.f32 %v403_v5, %v670_v16 }
 0x1be   :  { %v253_v47 = vmul.f32 %v488_v27, %v252_v41  ;;  %v356_v19 = vadd.f32 0.18741608, %v355_v3  ;;  %v219_v15 = vmul.f32 0.5, %v606_v54  ;;  %v393_v24 = vmul.f32 %v392_v10, %v670_v16 }
 0x1bf   :  { %v334_v49 = vadd.f32 %v486_v20, %v333_v33  ;;  %491 = vrcp.f32 %v702_v9  ;;  %v405_v25 = vadd.f32 0.112945676, %v404_v14  ;;  %v278_v26 = vadd.f32 1.1283791, %v277_v2 }
 0x1c0   :  { %v254_v52 = vadd.f32 %v488_v27, %v253_v47  ;;  %v301_v31 = vand.u32 2147483648, %v685_v45  ;;  %v357_v56 = vmul.f32 %v356_v19, %v644_v29  ;;  %v394_v37 = vadd.f32 0.05243302, %v393_v24 }
 0x1c1   :  { %v338_v0 = vsel %vm337_vm6, %v486_v20, %v334_v49  ;;  %v406_v21 = vmul.f32 %v405_v25, %v670_v16  ;;  %vm295_vm11 = vweird.f32 %v685_v45  ;;  %v279_v39 = vmul.f32 %v278_v26, %v629_v11 }
 0x1c2   :  { %v258_v7 = vsel %vm257_vm7, %v488_v27, %v254_v52  ;;  %v343_v63 = vsel %vm688_vm5, %v342_v53, %v338_v0  ;;  %v490_v18 = vpop.eup %489  ;;  %v302_v41 = vor.u32 1.1754944e-38, %v301_v31  ;;  %v358_v44 = vadd.f32 1.1283791, %v357_v56 }
 0x1c3   :  { %v263_v8 = vsel %vm260_vm8, %v262_v62, %v258_v7  ;;  %v344_v59 = vmul.f32 %v343_v63, %v319_v17  ;;  %v291_v20 = vmul.f32 %v490_v18, %v685_v45  ;;  %v217_v17 = vmul.f32 0.5, %v608_v55 }
 0x1c4   :  { %v264_v13 = vmul.f32 %v263_v8, %v239_v6  ;;  %vm296_vm10 = vweird.f32 %v490_v18  ;;  %v299_v55 = vand.u32 2147483647, %v685_v45  ;;  %v407_v22 = vadd.f32 0.4994258, %v406_v21 }
 0x1c5   :  { %v460_v60 = vclamps-f32 %v344_v59, 1.0  ;;  %v292_v28 = vsub.f32 1.0, %v291_v20  ;;  %v492_v36 = vpop.eup %491  ;;  %vm297_vm12 = vmor %vm295_vm11, %vm296_vm10  ;;  %v381_v47 = vand.u32 2147483648, %v702_v9  ;;  %v395_v34 = vmul.f32 %v394_v37, %v670_v16 }
 0x1c6   :  { %v458_v35 = vclamps-f32 %v264_v13, 1.0  ;;  %v371_v38 = vmul.f32 %v492_v36, %v702_v9  ;;  %v408_v42 = vmul.f32 %v407_v22, %v670_v16  ;;  %vm300_vm13 = vcmp.eq.f32.partialorder %v299_v55, 8.507059e+37 }
 0x1c7   :  { %v429_v23 = vadd.f32 1.0, %v460_v60  ;;  %v293_v32 = vmul.f32 %v490_v18, %v292_v28  ;;  %vm376_vm14 = vweird.f32 %v492_v36  ;;  %v379_v50 = vand.u32 2147483647, %v702_v9 }
 0x1c8   :  { %v427_v27 = vadd.f32 1.0, %v458_v35  ;;  %v372_v33 = vsub.f32 1.0, %v371_v38  ;;  %v409_v48 = vadd.f32 1.0, %v408_v42  ;;  %vm375_vm15 = vweird.f32 %v702_v9 }
 0x1c9   :  { %v434_v30 = vmul.f32 %v429_v23, %v219_v15  ;;  %v294_v29 = vadd.f32 %v490_v18, %v293_v32  ;;  %v218_v52 = vmul.f32 0.5, %v626_v4  ;;  %vm377_vm1 = vmor %vm375_vm15, %vm376_vm14  ;;  %v382_v53 = vor.u32 1.1754944e-38, %v381_v47 }
 0x1ca   :  { %v432_v54 = vmul.f32 %v427_v27, %v217_v17  ;;  %v373_v45 = vmul.f32 %v492_v36, %v372_v33  ;;  %493 = vrcp.f32 %v409_v48  ;;  %v396_v58 = vadd.f32 0.18741608, %v395_v34 }
 0x1cb   :  { %440 = vst.msk [vmem:[%s754_s5 + $0x10] sm:$0xff] %vm437_vm9, %v434_v30  ;;  %v298_v43 = vsel %vm297_vm12, %v490_v18, %v294_v29  ;;  %v359_v62 = vmul.f32 %v358_v44, %v632_v12  ;;  %vm380_vm0 = vcmp.eq.f32.partialorder %v379_v50, 8.507059e+37  ;;  %v220_v59 = vmul.f32 0.5, %v622_v1 }
 0x1cc   :  { %438 = vst.msk [vmem:[%s754_s5] sm:$0xff] %vm437_vm9, %v432_v54  ;;  %v303_v46 = vsel %vm300_vm13, %v302_v41, %v298_v43  ;;  %v374_v51 = vadd.f32 %v492_v36, %v373_v45  ;;  %v397_v63 = vmul.f32 %v396_v58, %v670_v16  ;;  %v421_v13 = vand.u32 2147483648, %v409_v48 }
 0x1cd   :  { %v304_v49 = vmul.f32 %v303_v46, %v279_v39  ;;  %v419_v18 = vand.u32 2147483647, %v409_v48  ;;  %vm415_vm3 = vweird.f32 %v409_v48  ;;  %v221_v17 = vmul.f32 0.5, %v648_v40 }
 0x1ce   :  { %v378_v0 = vsel %vm377_vm1, %v492_v36, %v374_v51  ;;  %v398_v12 = vadd.f32 1.1283791, %v397_v63  ;;  %v422_v60 = vor.u32 1.1754944e-38, %v421_v13 }
 0x1cf   :  { %v459_v11 = vclamps-f32 %v304_v49, 1.0  ;;  %v383_v3 = vsel %vm380_vm0, %v382_v53, %v378_v0  ;;  %vm420_vm5 = vcmp.eq.f32.partialorder %v419_v18, 8.507059e+37 }
 0x1d0   :  { %v384_v6 = vmul.f32 %v383_v3, %v359_v62  ;;  %v494_v7 = vpop.eup %493  ;;  %v399_v19 = vmul.f32 %v398_v12, %v657_v57 }
 0x1d1   :  { %v428_v61 = vadd.f32 1.0, %v459_v11  ;;  %v411_v8 = vmul.f32 %v494_v7, %v409_v48  ;;  %vm416_vm2 = vweird.f32 %v494_v7 }
 0x1d2   :  { %v461_v4 = vclamps-f32 %v384_v6, 1.0  ;;  %vm417_vm4 = vmor %vm415_vm3, %vm416_vm2 }
 0x1d3   :  { %v433_v5 = vmul.f32 %v428_v61, %v218_v52  ;;  %v412_v10 = vsub.f32 1.0, %v411_v8 }
 0x1d4   :  { %v430_v9 = vadd.f32 1.0, %v461_v4 }
 0x1d5   :  { %439 = vst.msk [vmem:[%s754_s5 + $0x8] sm:$0xff] %vm437_vm9, %v433_v5  ;;  %v413_v14 = vmul.f32 %v494_v7, %v412_v10 }
 0x1d6   :  { %v435_v2 = vmul.f32 %v430_v9, %v220_v59 }
 0x1d7   :  { %v414_v16 = vadd.f32 %v494_v7, %v413_v14 }
 0x1d8   :  { %441 = vst.msk [vmem:[%s754_s5 + $0x18] sm:$0xff] %vm437_vm9, %v435_v2 }
 0x1d9   :  { %v418_v1 = vsel %vm417_vm4, %v494_v7, %v414_v16 }
 0x1da   :  { %v423_v35 = vsel %vm420_vm5, %v422_v60, %v418_v1 }
 0x1db   :  { %v424_v15 = vmul.f32 %v423_v35, %v399_v19 }
 0x1dd   :  { %v462_v20 = vclamps-f32 %v424_v15, 1.0 }
 0x1df   :  { %v431_v23 = vadd.f32 1.0, %v462_v20 }
 0x1e1   :  { %v436_v24 = vmul.f32 %v431_v23, %v221_v17 }
 0x1e3   :  { %442 = vst.msk [vmem:[%s754_s5 + $0x20] sm:$0xff] %vm437_vm9, %v436_v24 }

// kernel: _lambda_.27
= control target key start
LH: loop header
LB: loop body
LE: loop exit
PB: predicated region body
PF: predicated region fallthrough
CT: control target
= control target key end

     0   :  { %s1384_s12 = smov 0   ;;  %s1663_s0 = inlined_call_operand.vmem [shape: f32[32,5,8], index: 0, kind: input, shape index: {}]   ;;  %s1664_s1 = inlined_call_operand.vmem [shape: f32[32,5,8], index: 1, kind: input, shape index: {}]   ;;  %s1665_s2 = inlined_call_operand.vmem [shape: f32[32,5,8], index: 2, kind: input, shape index: {}]   ;;  %s1666_s3 = inlined_call_operand.vmem [shape: f32[32,5,8], index: 3, kind: output, shape index: {}]  }
   0x1 LB: > { %s1235_s13 = sadd.s32 4294967295, %s1361_s12   ;;  %p1239_p0 = scmp.ge.s32.totalorder %s1361_s12, 1  ;;  %s1361_s12 = sphi %s1384_s12, %s13_s12  }
   0x2   : > { %p160_p1 = scmp.lt.s32.totalorder %s1361_s12, 3 }
   0x4   : > { %p161_p2 = pnand %p1239_p0, %p160_p1 }
   0x5   : > { %s1240_s14 = sshll.u32 (!%p161_p2), %s1235_s13, 4 }
   0x6   : > { %164 = sbr.rel (%p161_p2) target bundleno = 486 (0x1e6), region = 32  ;;  %p195_p3 = scmp.lt.s32.totalorder (!%p161_p2), %s1240_s14, 31 }
   0xb   : > { %s1668_s14 = smov (!%p195_p3, %s1240_s14), 31  ;;  %vm331_vm0 = vcmask 64512   ;;  %vm636_vm1 = vcmask 36864   ;;  %vm801_vm2 = vcmask 1041408   ;;  %vm802_vm3 = vcmask 1042432  }
   0xc   : > { %s1392_s15 = sshll.u32 %s1668_s14, 3  ;;  %vm797_vm4 = vcmask 39936   ;;  %vm1138_vm5 = vcmask 61440  }
   0xd   : > { %s1398_s18 = scalar_lea.vmem %s1664_s1, %s1392_s15  ;;  %s1404_s21 = scalar_lea.vmem %s1663_s0, %s1392_s15 }
   0xe   : > { %v267_v0 = vld [vmem:[%s1398_s18] sm:$0x1f]  ;;  %v268_v1 = vld [vmem:[%s1398_s18 + $0x8] sm:$0x1f]  ;;  %v269_v2 = vld [vmem:[%s1398_s18 + $0x10] sm:$0x1f]  ;;  %s1538_s24 = scalar_lea.vmem %s1665_s2, %s1392_s15  ;;  %s1626_s27 = scalar_lea.vmem %s1666_s3, %s1392_s15 }
   0xf   : > { %v283_v3 = vpack.c.bf16 %v267_v0, %v267_v0  ;;  %v284_v4 = vpack.c.bf16 %v268_v1, %v268_v1  ;;  %v285_v5 = vpack.c.bf16 %v269_v2, %v269_v2  ;;  %v270_v6 = vld [vmem:[%s1398_s18 + $0x18] sm:$0x1f]  ;;  %v219_v7 = vld [vmem:[%s1404_s21] sm:$0x1f]  ;;  %v220_v8 = vld [vmem:[%s1404_s21 + $0x8] sm:$0x1f] }
  0x10   : > { %v286_v9 = vpack.c.bf16 %v270_v6, %v270_v6  ;;  %v235_v10 = vmul.f32 0.35355338, %v219_v7  ;;  %v236_v11 = vmul.f32 0.35355338, %v220_v8  ;;  %v221_v12 = vld [vmem:[%s1404_s21 + $0x10] sm:$0x1f] }
  0x11   : > { %v336_v13 = vsel %vm331_vm0, %v283_v3, 0  ;;  %v355_v14 = vsel %vm331_vm0, %v284_v4, 0  ;;  %v374_v15 = vsel %vm331_vm0, %v285_v5, 0  ;;  %v237_v16 = vmul.f32 0.35355338, %v221_v12 }
  0x12   : > { %345 = vmatpush.bf16.xpose.msra.mxu0 %v336_v13  ;;  %364 = vmatpush.bf16.xpose.msra.mxu1 %v355_v14  ;;  %v393_v17 = vsel %vm331_vm0, %v286_v9, 0  ;;  %v222_v18 = vld [vmem:[%s1404_s21 + $0x18] sm:$0x1f]  ;;  %v273_v19 = vld [vmem:[%s1398_s18 + $0x30] sm:$0x1f]  ;;  %v251_v27 = vpack.c.bf16 %v235_v10, %v235_v10  ;;  %v252_v28 = vpack.c.bf16 %v236_v11, %v236_v11 }
  0x13   : > { %383 = vmatpush.bf16.xpose.msra.mxu2 %v374_v15  ;;  %402 = vmatpush.bf16.xpose.msra.mxu3 %v393_v17  ;;  %v238_v20 = vmul.f32 0.35355338, %v222_v18  ;;  %v289_v21 = vpack.c.bf16 %v273_v19, %v273_v19  ;;  %v274_v22 = vld [vmem:[%s1398_s18 + $0x38] sm:$0x1f]  ;;  %v271_v23 = vld [vmem:[%s1398_s18 + $0x20] sm:$0x1f]  ;;  %v253_v31 = vpack.c.bf16 %v237_v16, %v237_v16 }
  0x14   : > { %v290_v24 = vpack.c.bf16 %v274_v22, %v274_v22  ;;  %v287_v25 = vpack.c.bf16 %v271_v23, %v271_v23  ;;  %v272_v26 = vld [vmem:[%s1398_s18 + $0x28] sm:$0x1f]  ;;  %v277_v36 = vld [vmem:[%s1398_s18 + $0x50] sm:$0x1f]  ;;  %v278_v38 = vld [vmem:[%s1398_s18 + $0x58] sm:$0x1f] }
  0x15   : > { %v450_v29 = vsel %vm331_vm0, %v289_v21, 0  ;;  %v288_v30 = vpack.c.bf16 %v272_v26, %v272_v26  ;;  %v254_v32 = vpack.c.bf16 %v238_v20, %v238_v20  ;;  %v293_v37 = vpack.c.bf16 %v277_v36, %v277_v36  ;;  %v275_v39 = vld [vmem:[%s1398_s18 + $0x40] sm:$0x1f]  ;;  %v276_v45 = vld [vmem:[%s1398_s18 + $0x48] sm:$0x1f] }
  0x16   : > { %v469_v33 = vsel %vm331_vm0, %v290_v24, 0  ;;  %v412_v34 = vsel %vm331_vm0, %v287_v25, 0  ;;  %v294_v40 = vpack.c.bf16 %v278_v38, %v278_v38  ;;  %v291_v41 = vpack.c.bf16 %v275_v39, %v275_v39  ;;  %v223_v47 = vld [vmem:[%s1404_s21 + $0x20] sm:$0x1f]  ;;  %v224_v48 = vld [vmem:[%s1404_s21 + $0x28] sm:$0x1f] }
  0x17   : > { %v431_v35 = vsel %vm331_vm0, %v288_v30, 0  ;;  %v526_v42 = vsel %vm331_vm0, %v293_v37, 0  ;;  %v292_v46 = vpack.c.bf16 %v276_v45, %v276_v45  ;;  %v225_v50 = vld [vmem:[%s1404_s21 + $0x30] sm:$0x1f]  ;;  %v226_v51 = vld [vmem:[%s1404_s21 + $0x38] sm:$0x1f] }
  0x18   : > { %v545_v43 = vsel %vm331_vm0, %v294_v40, 0  ;;  %v488_v44 = vsel %vm331_vm0, %v291_v41, 0  ;;  %v239_v52 = vmul.f32 0.35355338, %v223_v47  ;;  %v240_v53 = vmul.f32 0.35355338, %v224_v48 }
  0x19   : > { %1248 = vmatmul.msk.bf16.vlgmr.msra.gmra.mxu0 %vm331_vm0, %v251_v27  ;;  %1249 = vmatmul.msk.bf16.vlgmr.msra.gmra.mxu1 %vm331_vm0, %v252_v28  ;;  %v507_v49 = vsel %vm331_vm0, %v292_v46, 0  ;;  %v281_v54 = vld [vmem:[%s1398_s18 + $0x70] sm:$0x1f]  ;;  %v282_v55 = vld [vmem:[%s1398_s18 + $0x78] sm:$0x1f] }
  0x1a   : > { %421 = vmatpush.bf16.xpose.msrb.mxu0 %v412_v34  ;;  %440 = vmatpush.bf16.xpose.msrb.mxu1 %v431_v35  ;;  %v241_v56 = vmul.f32 0.35355338, %v225_v50  ;;  %v242_v57 = vmul.f32 0.35355338, %v226_v51  ;;  %v279_v58 = vld [vmem:[%s1398_s18 + $0x60] sm:$0x1f]  ;;  %v297_v59 = vpack.c.bf16 %v281_v54, %v281_v54  ;;  %v298_v60 = vpack.c.bf16 %v282_v55, %v282_v55 }
  0x1b   : > { %459 = vmatpush.bf16.xpose.msrb.mxu2 %v450_v29  ;;  %478 = vmatpush.bf16.xpose.msrb.mxu3 %v469_v33  ;;  %v255_v61 = vpack.c.bf16 %v239_v52, %v239_v52  ;;  %v256_v62 = vpack.c.bf16 %v240_v53, %v240_v53  ;;  %v295_v63 = vpack.c.bf16 %v279_v58, %v279_v58  ;;  %v280_v5 = vld [vmem:[%s1398_s18 + $0x68] sm:$0x1f]  ;;  %v227_v8 = vld [vmem:[%s1404_s21 + $0x40] sm:$0x1f]  ;;  %v229_v10 = vld [vmem:[%s1404_s21 + $0x50] sm:$0x1f] }
  0x1c   : > { %1250 = vmatmul.msk.bf16.vlgmr.msra.gmra.mxu2 %vm331_vm0, %v253_v31  ;;  %1251 = vmatmul.msk.bf16.vlgmr.msra.gmra.mxu3 %vm331_vm0, %v254_v32  ;;  %v257_v0 = vpack.c.bf16 %v241_v56, %v241_v56  ;;  %v258_v1 = vpack.c.bf16 %v242_v57, %v242_v57  ;;  %v602_v2 = vsel %vm331_vm0, %v297_v59, 0  ;;  %v621_v3 = vsel %vm331_vm0, %v298_v60, 0  ;;  %v228_v9 = vld [vmem:[%s1404_s21 + $0x48] sm:$0x1f]  ;;  %v230_v11 = vld [vmem:[%s1404_s21 + $0x58] sm:$0x1f] }
  0x1d   : > { %v564_v4 = vsel %vm331_vm0, %v295_v63, 0  ;;  %v296_v6 = vpack.c.bf16 %v280_v5, %v280_v5  ;;  %v243_v12 = vmul.f32 0.35355338, %v227_v8  ;;  %v244_v13 = vmul.f32 0.35355338, %v228_v9 }
  0x1e   : > { %v245_v14 = vmul.f32 0.35355338, %v229_v10  ;;  %v246_v15 = vmul.f32 0.35355338, %v230_v11  ;;  %v231_v20 = vld [vmem:[%s1404_s21 + $0x60] sm:$0x1f] }
  0x1f   : > { %v583_v7 = vsel %vm331_vm0, %v296_v6, 0  ;;  %v259_v16 = vpack.c.bf16 %v243_v12, %v243_v12  ;;  %v260_v17 = vpack.c.bf16 %v244_v13, %v244_v13  ;;  %v232_v21 = vld [vmem:[%s1404_s21 + $0x68] sm:$0x1f]  ;;  %v233_v22 = vld [vmem:[%s1404_s21 + $0x70] sm:$0x1f] }
  0x20   : > { %v261_v18 = vpack.c.bf16 %v245_v14, %v245_v14  ;;  %v262_v19 = vpack.c.bf16 %v246_v15, %v246_v15  ;;  %v234_v23 = vld [vmem:[%s1404_s21 + $0x78] sm:$0x1f]  ;;  %v247_v24 = vmul.f32 0.35355338, %v231_v20  ;;  %v248_v25 = vmul.f32 0.35355338, %v232_v21 }
  0x21   : > { %v249_v26 = vmul.f32 0.35355338, %v233_v22  ;;  %v250_v27 = vmul.f32 0.35355338, %v234_v23  ;;  %v301_v22 = vld [vmem:[%s1538_s24 + $0x10] sm:$0x1f] }
  0x22   : > { %497 = vmatpush.bf16.xpose.msra.mxu0 %v488_v44  ;;  %516 = vmatpush.bf16.xpose.msra.mxu1 %v507_v49  ;;  %v263_v28 = vpack.c.bf16 %v247_v24, %v247_v24  ;;  %v264_v29 = vpack.c.bf16 %v248_v25, %v248_v25  ;;  %v317_v23 = vpack.c.bf16 %v301_v22, %v301_v22  ;;  %v300_v24 = vld [vmem:[%s1538_s24 + $0x8] sm:$0x1f]  ;;  %v310_v22 = vld [vmem:[%s1538_s24 + $0x58] sm:$0x1f] }
  0x23   : > { %535 = vmatpush.bf16.xpose.msra.mxu2 %v526_v42  ;;  %554 = vmatpush.bf16.xpose.msra.mxu3 %v545_v43  ;;  %v265_v30 = vpack.c.bf16 %v249_v26, %v249_v26  ;;  %v266_v31 = vpack.c.bf16 %v250_v27, %v250_v27  ;;  %v316_v26 = vpack.c.bf16 %v300_v24, %v300_v24 }
  0x29   : > { %1252 = vmatmul.msk.bf16.vlgmr.msrb.gmra.mxu0 %vm331_vm0, %v255_v61  ;;  %1253 = vmatmul.msk.bf16.vlgmr.msrb.gmra.mxu1 %vm331_vm0, %v256_v62 }
  0x2a   : > { %573 = vmatpush.bf16.xpose.msrb.mxu0 %v564_v4  ;;  %592 = vmatpush.bf16.xpose.msrb.mxu1 %v583_v7 }
  0x2c   : > { %1254 = vmatmul.msk.bf16.vlgmr.msrb.gmra.mxu2 %vm331_vm0, %v257_v0  ;;  %1255 = vmatmul.msk.bf16.vlgmr.msrb.gmra.mxu3 %vm331_vm0, %v258_v1 }
  0x2d   : > { %611 = vmatpush.bf16.xpose.msrb.mxu2 %v602_v2  ;;  %630 = vmatpush.bf16.xpose.msrb.mxu3 %v621_v3 }
  0x39   : > { %1256 = vmatmul.msk.bf16.vlgmr.msra.gmra.mxu0 %vm331_vm0, %v259_v16  ;;  %1257 = vmatmul.msk.bf16.vlgmr.msra.gmra.mxu1 %vm331_vm0, %v260_v17  ;;  %v299_v16 = vld [vmem:[%s1538_s24] sm:$0x1f] }
  0x3a   : > { %v315_v17 = vpack.c.bf16 %v299_v16, %v299_v16 }
  0x3c   : > { %1258 = vmatmul.msk.bf16.vlgmr.msra.gmra.mxu2 %vm331_vm0, %v261_v18  ;;  %1259 = vmatmul.msk.bf16.vlgmr.msra.gmra.mxu3 %vm331_vm0, %v262_v19  ;;  %v1363_v18 = vmov 65535  }
  0x3d   : > { %v803_v19 = vsel %vm801_vm2, 4294967295, %v1363_v18 }
  0x3e   : > { %v1541_v20 = vsel %vm802_vm3, %v803_v19, 0 }
  0x3f   : > { %v806_v21 = vand.u32 %v1541_v20, %v315_v17  ;;  %v844_v25 = vand.u32 %v1541_v20, %v317_v23  ;;  %v825_v27 = vand.u32 %v1541_v20, %v316_v26  ;;  %v308_v23 = vld [vmem:[%s1538_s24 + $0x48] sm:$0x1f] }
  0x40   : > { %v324_v26 = vpack.c.bf16 %v308_v23, %v308_v23 }
  0x41   : > { %815 = vmatpush.bf16.msra.mxu0 %v806_v21  ;;  %853 = vmatpush.bf16.msra.mxu2 %v844_v25 }
  0x42   : > { %834 = vmatpush.bf16.msra.mxu1 %v825_v27 }
  0x49   : > { %1260 = vmatmul.msk.bf16.vlgmr.msrb.gmra.mxu0 %vm331_vm0, %v263_v28  ;;  %1261 = vmatmul.msk.bf16.vlgmr.msrb.gmra.mxu1 %vm331_vm0, %v264_v29  ;;  %v302_v28 = vld [vmem:[%s1538_s24 + $0x18] sm:$0x1f] }
  0x4a   : > { %v318_v29 = vpack.c.bf16 %v302_v28, %v302_v28 }
  0x4c   : > { %1262 = vmatmul.msk.bf16.vlgmr.msrb.gmra.mxu2 %vm331_vm0, %v265_v30  ;;  %1263 = vmatmul.msk.bf16.vlgmr.msrb.gmra.mxu3 %vm331_vm0, %v266_v31  ;;  %v863_v30 = vand.u32 %v1541_v20, %v318_v29  ;;  %v305_v31 = vld [vmem:[%s1538_s24 + $0x30] sm:$0x1f]  ;;  %v977_v29 = vand.u32 %v1541_v20, %v324_v26 }
  0x4e   : > { %872 = vmatpush.bf16.msra.mxu3 %v863_v30 }
  0x96   : > { %v1470_v32 = vpop.f32.mrf.mxu0  ;;  %v1472_v33 = vpop.f32.mrf.mxu1 }
  0x97   : > { %v637_v34 = vsel %vm636_vm1, %v1470_v32, -inf  ;;  %v640_v37 = vsel %vm636_vm1, %v1472_v33, -inf }
  0x98   : > { %638 = vmax.xlane.f32.xlu1 %v637_v34  ;;  %v303_v34 = vld [vmem:[%s1538_s24 + $0x20] sm:$0x1f] }
  0x9e   : > { %v349_v39 = vpop.f32.mrf.mxu0  ;;  %v368_v40 = vpop.f32.mrf.mxu1 }
  0x9f   : > { %v1476_v35 = vpop.f32.mrf.mxu2  ;;  %v1478_v36 = vpop.f32.mrf.mxu3  ;;  %v304_v40 = vld [vmem:[%s1538_s24 + $0x28] sm:$0x1f] }
  0xa0   : > { %v643_v38 = vsel %vm636_vm1, %v1476_v35, -inf  ;;  %641 = vmax.xlane.f32.xlu1 %v640_v37  ;;  %v646_v41 = vsel %vm636_vm1, %v1478_v36, -inf  ;;  %v321_v37 = vpack.c.bf16 %v305_v31, %v305_v31 }
  0xa1   : > { %644 = vmax.xlane.f32.xlu0 %v643_v38  ;;  %v319_v38 = vpack.c.bf16 %v303_v34, %v303_v34 }
  0xa6   : > { %v1486_v44 = vpop.f32.mrf.mxu0  ;;  %v1488_v45 = vpop.f32.mrf.mxu1 }
  0xa7   : > { %v387_v42 = vpop.f32.mrf.mxu2  ;;  %v406_v43 = vpop.f32.mrf.mxu3  ;;  %v652_v46 = vsel %vm636_vm1, %v1488_v45, -inf  ;;  %v649_v47 = vsel %vm636_vm1, %v1486_v44, -inf }
  0xa8   : > { %653 = vmax.xlane.f32.xlu1 %v652_v46  ;;  %v920_v42 = vand.u32 %v1541_v20, %v321_v37  ;;  %v882_v43 = vand.u32 %v1541_v20, %v319_v38  ;;  %v320_v46 = vpack.c.bf16 %v304_v40, %v304_v40 }
  0xa9   : > { %647 = vmax.xlane.f32.xlu0 %v646_v41 }
  0xaa   : > { %929 = vmatpush.bf16.msrb.mxu2 %v920_v42  ;;  %891 = vmatpush.bf16.msrb.mxu0 %v882_v43  ;;  %v311_v42 = vld [vmem:[%s1538_s24 + $0x60] sm:$0x1f] }
  0xae   : > { %v425_v51 = vpop.f32.mrf.mxu0  ;;  %v444_v52 = vpop.f32.mrf.mxu1 }
  0xaf   : > { %v1494_v48 = vpop.f32.mrf.mxu2  ;;  %v1496_v49 = vpop.f32.mrf.mxu3  ;;  %v306_v51 = vld [vmem:[%s1538_s24 + $0x38] sm:$0x1f] }
  0xb0   : > { %v655_v50 = vsel %vm636_vm1, %v1494_v48, -inf  ;;  %v658_v53 = vsel %vm636_vm1, %v1496_v49, -inf  ;;  %v322_v52 = vpack.c.bf16 %v306_v51, %v306_v51 }
  0xb1   : > { %656 = vmax.xlane.f32.xlu2 %v655_v50  ;;  %650 = vmax.xlane.f32.xlu0 %v649_v47  ;;  %v901_v50 = vand.u32 %v1541_v20, %v320_v46 }
  0xb3   : > { %910 = vmatpush.bf16.msrb.mxu1 %v901_v50  ;;  %v327_v50 = vpack.c.bf16 %v311_v42, %v311_v42 }
  0xb6   : > { %v1502_v56 = vpop.f32.mrf.mxu0  ;;  %v1504_v57 = vpop.f32.mrf.mxu1 }
  0xb7   : > { %v463_v54 = vpop.f32.mrf.mxu2  ;;  %v482_v55 = vpop.f32.mrf.mxu3  ;;  %v661_v58 = vsel %vm636_vm1, %v1502_v56, -inf  ;;  %v664_v1 = vsel %vm636_vm1, %v1504_v57, -inf }
  0xb8   : > { %662 = vmax.xlane.f32.xlu1 %v661_v58  ;;  %v939_v54 = vand.u32 %v1541_v20, %v322_v52 }
  0xb9   : > { %659 = vmax.xlane.f32.xlu2 %v658_v53 }
  0xba   : > { %948 = vmatpush.bf16.msrb.mxu3 %v939_v54 }
  0xbe   : > { %v501_v63 = vpop.f32.mrf.mxu0  ;;  %v520_v0 = vpop.f32.mrf.mxu1 }
  0xbf   : > { %v1508_v59 = vpop.f32.mrf.mxu2  ;;  %v1510_v60 = vpop.f32.mrf.mxu3 }
  0xc0   : > { %v667_v61 = vsel %vm636_vm1, %v1508_v59, -inf  ;;  %v670_v62 = vsel %vm636_vm1, %v1510_v60, -inf }
  0xc1   : > { %668 = vmax.xlane.f32.xlu2 %v667_v61  ;;  %671 = vmax.xlane.f32.xlu0 %v670_v62 }
  0xc6   : > { %v1518_v4 = vpop.f32.mrf.mxu0  ;;  %v1520_v5 = vpop.f32.mrf.mxu1 }
  0xc7   : > { %v539_v2 = vpop.f32.mrf.mxu2  ;;  %v558_v3 = vpop.f32.mrf.mxu3  ;;  %v673_v8 = vsel %vm636_vm1, %v1518_v4, -inf  ;;  %v676_v13 = vsel %vm636_vm1, %v1520_v5, -inf }
  0xc8   : > { %v309_v2 = vld [vmem:[%s1538_s24 + $0x50] sm:$0x1f]  ;;  %v307_v3 = vld [vmem:[%s1538_s24 + $0x40] sm:$0x1f] }
  0xc9   : > { %665 = vmax.xlane.f32.xlu2 %v664_v1 }
  0xce   : > { %v577_v11 = vpop.f32.mrf.mxu0  ;;  %v596_v12 = vpop.f32.mrf.mxu1 }
  0xcf   : > { %v1522_v6 = vpop.f32.mrf.mxu2  ;;  %v1524_v7 = vpop.f32.mrf.mxu3 }
  0xd0   : > { %v679_v9 = vsel %vm636_vm1, %v1522_v6, -inf  ;;  %v682_v10 = vsel %vm636_vm1, %v1524_v7, -inf }
  0xd1   : > { %680 = vmax.xlane.f32.xlu0 %v679_v9  ;;  %683 = vmax.xlane.f32.xlu1 %v682_v10  ;;  %v323_v9 = vpack.c.bf16 %v307_v3, %v307_v3 }
  0xd2   : > { %674 = vmax.xlane.f32.xlu2 %v673_v8 }
  0xd3   : > { %v958_v12 = vand.u32 %v1541_v20, %v323_v9 }
  0xd7   : > { %v615_v14 = vpop.f32.mrf.mxu2  ;;  %v634_v15 = vpop.f32.mrf.mxu3 }
  0xd9   : > { %677 = vmax.xlane.f32.xlu0 %v676_v13 }
 0x10b   : > { %v639_v39 = vpop.xlane.xlu1 %638 }
 0x10c   : > { %v685_v41 = vsub.f32 %v1470_v32, %v639_v39 }
 0x10e   : > { %v701_v47 = vmul.f32 1.442695, %v685_v41  ;;  %v313_v41 = vld [vmem:[%s1538_s24 + $0x70] sm:$0x1f] }
 0x110   : > { %1291 = vpow2.f32 %v701_v47  ;;  %v329_v47 = vpack.c.bf16 %v313_v41, %v313_v41 }
 0x112   : > { %v1072_v54 = vand.u32 %v1541_v20, %v329_v47 }
 0x113   : > { %v642_v55 = vpop.xlane.xlu1 %641 }
 0x114   : > { %v645_v53 = vpop.xlane.xlu0 %644  ;;  %v686_v58 = vsub.f32 %v1472_v33, %v642_v55 }
 0x115   : > { %v687_v32 = vsub.f32 %v1476_v35, %v645_v53  ;;  %v325_v35 = vpack.c.bf16 %v309_v2, %v309_v2 }
 0x116   : > { %v1292_v62 = vpop.eup %1291  ;;  %v703_v63 = vmul.f32 1.442695, %v686_v58 }
 0x117   : > { %v705_v61 = vmul.f32 1.442695, %v687_v32  ;;  %v781_v0 = vpack.c.bf16 %v1292_v62, %v1292_v62  ;;  %v733_v1 = vsel %vm636_vm1, %v1292_v62, 0.0  ;;  %v996_v15 = vand.u32 %v1541_v20, %v325_v35 }
 0x118   : > { %734 = vadd.xlane.f32.xlu1 %v733_v1  ;;  %v1034_v62 = vand.u32 %v1541_v20, %v327_v50 }
 0x119   : > { %1293 = vpow2.f32 %v705_v61  ;;  %1264 = vmatmul.msk.bf16.vlgmr.msra.gmra.mxu0 %vm797_vm4, %v781_v0 }
 0x11a   : > { %1295 = vpow2.f32 %v703_v63  ;;  %967 = vmatpush.bf16.msra.mxu0 %v958_v12 }
 0x11b   : > { %v654_v10 = vpop.xlane.xlu1 %653 }
 0x11c   : > { %v648_v8 = vpop.xlane.xlu0 %647  ;;  %v690_v11 = vsub.f32 %v1488_v45, %v654_v10  ;;  %v326_v45 = vpack.c.bf16 %v310_v22, %v310_v22 }
 0x11d   : > { %v688_v33 = vsub.f32 %v1478_v36, %v648_v8  ;;  %v312_v8 = vld [vmem:[%s1538_s24 + $0x68] sm:$0x1f] }
 0x11e   : > { %v711_v18 = vmul.f32 1.442695, %v690_v11  ;;  %v1015_v37 = vand.u32 %v1541_v20, %v326_v45  ;;  %v328_v10 = vpack.c.bf16 %v312_v8, %v312_v8 }
 0x11f   : > { %v1294_v13 = vpop.eup %1293  ;;  %v707_v14 = vmul.f32 1.442695, %v688_v33 }
 0x120   : > { %v1296_v16 = vpop.eup %1295  ;;  %v783_v17 = vpack.c.bf16 %v1294_v13, %v1294_v13  ;;  %v739_v19 = vsel %vm636_vm1, %v1294_v13, 0.0 }
 0x121   : > { %v782_v21 = vpack.c.bf16 %v1296_v16, %v1296_v16  ;;  %1297 = vpow2.f32 %v707_v14  ;;  %740 = vadd.xlane.f32.xlu0 %v739_v19  ;;  %v736_v36 = vsel %vm636_vm1, %v1296_v16, 0.0  ;;  %v1053_v14 = vand.u32 %v1541_v20, %v328_v10 }
 0x122   : > { %1299 = vpow2.f32 %v711_v18  ;;  %1266 = vmatmul.msk.bf16.vlgmr.msra.gmra.mxu2 %vm797_vm4, %v783_v17  ;;  %737 = vadd.xlane.f32.xlu2 %v736_v36 }
 0x123   : > { %1265 = vmatmul.msk.bf16.vlgmr.msra.gmra.mxu1 %vm797_vm4, %v782_v21  ;;  %1005 = vmatpush.bf16.msra.mxu2 %v996_v15 }
 0x124   : > { %v657_v24 = vpop.xlane.xlu2 %656  ;;  %v651_v25 = vpop.xlane.xlu0 %650  ;;  %986 = vmatpush.bf16.msra.mxu1 %v977_v29 }
 0x125   : > { %v691_v27 = vsub.f32 %v1494_v48, %v657_v24  ;;  %v689_v28 = vsub.f32 %v1486_v44, %v651_v25 }
 0x127   : > { %v1298_v30 = vpop.eup %1297  ;;  %v713_v31 = vmul.f32 1.442695, %v691_v27  ;;  %v709_v34 = vmul.f32 1.442695, %v689_v28 }
 0x128   : > { %v1300_v38 = vpop.eup %1299  ;;  %v784_v39 = vpack.c.bf16 %v1298_v30, %v1298_v30  ;;  %v742_v40 = vsel %vm636_vm1, %v1298_v30, 0.0 }
 0x129   : > { %1301 = vpow2.f32 %v713_v31  ;;  %743 = vadd.xlane.f32.xlu1 %v742_v40  ;;  %v748_v48 = vsel %vm636_vm1, %v1300_v38, 0.0  ;;  %v786_v63 = vpack.c.bf16 %v1300_v38, %v1300_v38 }
 0x12a   : > { %1303 = vpow2.f32 %v709_v34  ;;  %1267 = vmatmul.msk.bf16.vlgmr.msra.gmra.mxu3 %vm797_vm4, %v784_v39  ;;  %749 = vadd.xlane.f32.xlu0 %v748_v48 }
 0x12b   : > { %1024 = vmatpush.bf16.msra.mxu3 %v1015_v37  ;;  %v663_v46 = vpop.xlane.xlu1 %662 }
 0x12c   : > { %v660_v44 = vpop.xlane.xlu2 %659  ;;  %v693_v51 = vsub.f32 %v1502_v56, %v663_v46  ;;  %v314_v56 = vld [vmem:[%s1538_s24 + $0x78] sm:$0x1f] }
 0x12d   : > { %v692_v43 = vsub.f32 %v1496_v49, %v660_v44  ;;  %v330_v1 = vpack.c.bf16 %v314_v56, %v314_v56 }
 0x12e   : > { %v717_v58 = vmul.f32 1.442695, %v693_v51 }
 0x12f   : > { %v1302_v52 = vpop.eup %1301  ;;  %v715_v53 = vmul.f32 1.442695, %v692_v43  ;;  %v1091_v33 = vand.u32 %v1541_v20, %v330_v1 }
 0x130   : > { %v1304_v32 = vpop.eup %1303  ;;  %v787_v55 = vpack.c.bf16 %v1302_v52, %v1302_v52  ;;  %v751_v61 = vsel %vm636_vm1, %v1302_v52, 0.0 }
 0x131   : > { %v785_v49 = vpack.c.bf16 %v1304_v32, %v1304_v32  ;;  %1305 = vpow2.f32 %v715_v53  ;;  %752 = vadd.xlane.f32.xlu1 %v751_v61  ;;  %v745_v0 = vsel %vm636_vm1, %v1304_v32, 0.0 }
 0x132   : > { %1307 = vpow2.f32 %v717_v58  ;;  %746 = vadd.xlane.f32.xlu2 %v745_v0  ;;  %1270 = vmatmul.msk.bf16.vlgmr.msrb.gmra.mxu2 %vm797_vm4, %v787_v55 }
 0x133   : > { %1268 = vmatmul.msk.bf16.vlgmr.msrb.gmra.mxu0 %vm797_vm4, %v785_v49  ;;  %1269 = vmatmul.msk.bf16.vlgmr.msrb.gmra.mxu1 %vm797_vm4, %v786_v63 }
 0x134   : > { %v669_v2 = vpop.xlane.xlu2 %668  ;;  %v672_v3 = vpop.xlane.xlu0 %671  ;;  %1081 = vmatpush.bf16.msrb.mxu2 %v1072_v54  ;;  %1043 = vmatpush.bf16.msrb.mxu0 %v1034_v62 }
 0x135   : > { %v695_v35 = vsub.f32 %v1508_v59, %v669_v2  ;;  %v696_v9 = vsub.f32 %v1510_v60, %v672_v3  ;;  %1062 = vmatpush.bf16.msrb.mxu1 %v1053_v14 }
 0x137   : > { %v1306_v11 = vpop.eup %1305  ;;  %v721_v12 = vmul.f32 1.442695, %v695_v35  ;;  %v723_v13 = vmul.f32 1.442695, %v696_v9 }
 0x138   : > { %v1308_v15 = vpop.eup %1307  ;;  %v788_v16 = vpack.c.bf16 %v1306_v11, %v1306_v11  ;;  %v754_v17 = vsel %vm636_vm1, %v1306_v11, 0.0 }
 0x139   : > { %1309 = vpow2.f32 %v721_v12  ;;  %v757_v18 = vsel %vm636_vm1, %v1308_v15, 0.0  ;;  %v789_v45 = vpack.c.bf16 %v1308_v15, %v1308_v15 }
 0x13a   : > { %1311 = vpow2.f32 %v723_v13  ;;  %755 = vadd.xlane.f32.xlu2 %v754_v17  ;;  %1271 = vmatmul.msk.bf16.vlgmr.msrb.gmra.mxu3 %vm797_vm4, %v788_v16 }
 0x13b   : > { %758 = vadd.xlane.f32.xlu0 %v757_v18  ;;  %1100 = vmatpush.bf16.msrb.mxu3 %v1091_v33 }
 0x13c   : > { %v666_v59 = vpop.xlane.xlu2 %665 }
 0x13d   : > { %v694_v60 = vsub.f32 %v1504_v57, %v666_v59 }
 0x13f   : > { %v1310_v19 = vpop.eup %1309  ;;  %v719_v21 = vmul.f32 1.442695, %v694_v60 }
 0x140   : > { %v1312_v20 = vpop.eup %1311  ;;  %v791_v36 = vpack.c.bf16 %v1310_v19, %v1310_v19  ;;  %v763_v22 = vsel %vm636_vm1, %v1310_v19, 0.0 }
 0x141   : > { %1313 = vpow2.f32 %v719_v21  ;;  %v766_v23 = vsel %vm636_vm1, %v1312_v20, 0.0  ;;  %v792_v31 = vpack.c.bf16 %v1312_v20, %v1312_v20 }
 0x142   : > { %764 = vadd.xlane.f32.xlu2 %v763_v22  ;;  %1274 = vmatmul.msk.bf16.vlgmr.msra.gmra.mxu2 %vm797_vm4, %v791_v36 }
 0x143   : > { %1272 = vmatmul.msk.bf16.vlgmr.msra.gmra.mxu0 %vm797_vm4, %v789_v45  ;;  %767 = vadd.xlane.f32.xlu0 %v766_v23 }
 0x144   : > { %v681_v24 = vpop.xlane.xlu0 %680  ;;  %v684_v25 = vpop.xlane.xlu1 %683 }
 0x145   : > { %v699_v57 = vsub.f32 %v1522_v6, %v681_v24  ;;  %v675_v26 = vpop.xlane.xlu2 %674  ;;  %v700_v30 = vsub.f32 %v1524_v7, %v684_v25 }
 0x146   : > { %v697_v27 = vsub.f32 %v1518_v4, %v675_v26 }
 0x147   : > { %v1314_v28 = vpop.eup %1313  ;;  %v729_v29 = vmul.f32 1.442695, %v699_v57  ;;  %v731_v39 = vmul.f32 1.442695, %v700_v30 }
 0x148   : > { %v790_v34 = vpack.c.bf16 %v1314_v28, %v1314_v28  ;;  %v725_v37 = vmul.f32 1.442695, %v697_v27  ;;  %v760_v38 = vsel %vm636_vm1, %v1314_v28, 0.0 }
 0x149   : > { %1315 = vpow2.f32 %v729_v29  ;;  %761 = vadd.xlane.f32.xlu1 %v760_v38 }
 0x14a   : > { %1273 = vmatmul.msk.bf16.vlgmr.msra.gmra.mxu1 %vm797_vm4, %v790_v34  ;;  %1275 = vmatmul.msk.bf16.vlgmr.msra.gmra.mxu3 %vm797_vm4, %v792_v31  ;;  %1317 = vpow2.f32 %v725_v37 }
 0x14b   : > { %1319 = vpow2.f32 %v731_v39 }
 0x14c   : > { %v678_v6 = vpop.xlane.xlu0 %677 }
 0x14d   : > { %v698_v4 = vsub.f32 %v1520_v5, %v678_v6 }
 0x14f   : > { %v1316_v40 = vpop.eup %1315  ;;  %v727_v48 = vmul.f32 1.442695, %v698_v4 }
 0x150   : > { %v795_v7 = vpack.c.bf16 %v1316_v40, %v1316_v40  ;;  %v775_v44 = vsel %vm636_vm1, %v1316_v40, 0.0  ;;  %v1318_v41 = vpop.eup %1317 }
 0x151   : > { %1321 = vpow2.f32 %v727_v48  ;;  %776 = vadd.xlane.f32.xlu0 %v775_v44  ;;  %v793_v42 = vpack.c.bf16 %v1318_v41, %v1318_v41  ;;  %v769_v43 = vsel %vm636_vm1, %v1318_v41, 0.0  ;;  %v1320_v46 = vpop.eup %1319 }
 0x152   : > { %1278 = vmatmul.msk.bf16.vlgmr.msrb.gmra.mxu2 %vm797_vm4, %v795_v7  ;;  %770 = vadd.xlane.f32.xlu1 %v769_v43  ;;  %v796_v47 = vpack.c.bf16 %v1320_v46, %v1320_v46  ;;  %v778_v52 = vsel %vm636_vm1, %v1320_v46, 0.0 }
 0x153   : > { %1276 = vmatmul.msk.bf16.vlgmr.msrb.gmra.mxu0 %vm797_vm4, %v793_v42 }
 0x157   : > { %v1322_v5 = vpop.eup %1321 }
 0x158   : > { %v794_v50 = vpack.c.bf16 %v1322_v5, %v1322_v5  ;;  %v772_v51 = vsel %vm636_vm1, %v1322_v5, 0.0 }
 0x159   : > { %773 = vadd.xlane.f32.xlu2 %v772_v51 }
 0x15a   : > { %1277 = vmatmul.msk.bf16.vlgmr.msrb.gmra.mxu1 %vm797_vm4, %v794_v50  ;;  %1279 = vmatmul.msk.bf16.vlgmr.msrb.gmra.mxu3 %vm797_vm4, %v796_v47 }
 0x15b   : > { %779 = vadd.xlane.f32.xlu1 %v778_v52 }
 0x18b   : > { %v735_v53 = vpop.xlane.xlu1 %734 }
 0x18c   : > { %1323 = vrcp.f32 %v735_v53 }
 0x192   : > { %v1324_v32 = vpop.eup %1323 }
 0x194   : > { %v741_v61 = vpop.xlane.xlu0 %740 }
 0x195   : > { %v738_v54 = vpop.xlane.xlu2 %737 }
 0x196   : > { %v817_v55 = vpop.f32.mrf.mxu0  ;;  %1325 = vrcp.f32 %v738_v54 }
 0x197   : > { %v1122_v58 = vmul.f32 %v1324_v32, %v817_v55  ;;  %1327 = vrcp.f32 %v741_v61 }
 0x199   : > { %1139 = vst.msk [vmem:[%s1626_s27] sm:$0x1f] %vm1138_vm5, %v1122_v58 }
 0x19c   : > { %v1326_v62 = vpop.eup %1325  ;;  %v744_v56 = vpop.xlane.xlu1 %743 }
 0x19d   : > { %v1328_v1 = vpop.eup %1327  ;;  %v750_v3 = vpop.xlane.xlu0 %749  ;;  %1329 = vrcp.f32 %v744_v56 }
 0x19e   : > { %v819_v63 = vpop.f32.mrf.mxu0  ;;  %1331 = vrcp.f32 %v750_v3 }
 0x1a0   : > { %v836_v49 = vpop.f32.mrf.mxu1 }
 0x1a1   : > { %v1123_v0 = vmul.f32 %v1326_v62, %v836_v49 }
 0x1a3   : > { %1140 = vst.msk [vmem:[%s1626_s27 + $0x8] sm:$0x1f] %vm1138_vm5, %v1123_v0  ;;  %v1330_v11 = vpop.eup %1329 }
 0x1a4   : > { %v753_v33 = vpop.xlane.xlu1 %752  ;;  %v1332_v13 = vpop.eup %1331 }
 0x1a5   : > { %v855_v2 = vpop.f32.mrf.mxu2  ;;  %v747_v35 = vpop.xlane.xlu2 %746 }
 0x1a6   : > { %v1124_v8 = vmul.f32 %v1328_v1, %v855_v2  ;;  %1333 = vrcp.f32 %v747_v35 }
 0x1a7   : > { %1335 = vrcp.f32 %v753_v33 }
 0x1a8   : > { %1141 = vst.msk [vmem:[%s1626_s27 + $0x10] sm:$0x1f] %vm1138_vm5, %v1124_v8  ;;  %v838_v9 = vpop.f32.mrf.mxu1 }
 0x1ac   : > { %v1334_v15 = vpop.eup %1333 }
 0x1ad   : > { %v857_v10 = vpop.f32.mrf.mxu2  ;;  %v874_v12 = vpop.f32.mrf.mxu3 }
 0x1ae   : > { %v1125_v14 = vmul.f32 %v1330_v11, %v874_v12  ;;  %v756_v60 = vpop.xlane.xlu2 %755  ;;  %v1336_v19 = vpop.eup %1335 }
 0x1af   : > { %v759_v22 = vpop.xlane.xlu0 %758  ;;  %1337 = vrcp.f32 %v756_v60 }
 0x1b0   : > { %v893_v16 = vpop.f32.mrf.mxu0  ;;  %v912_v17 = vpop.f32.mrf.mxu1  ;;  %1142 = vst.msk [vmem:[%s1626_s27 + $0x18] sm:$0x1f] %vm1138_vm5, %v1125_v14  ;;  %1339 = vrcp.f32 %v759_v22 }
 0x1b1   : > { %v1126_v18 = vmul.f32 %v1334_v15, %v893_v16  ;;  %v1127_v59 = vmul.f32 %v1332_v13, %v912_v17 }
 0x1b3   : > { %1143 = vst.msk [vmem:[%s1626_s27 + $0x20] sm:$0x1f] %vm1138_vm5, %v1126_v18 }
 0x1b4   : > { %1144 = vst.msk [vmem:[%s1626_s27 + $0x28] sm:$0x1f] %vm1138_vm5, %v1127_v59 }
 0x1b5   : > { %v931_v21 = vpop.f32.mrf.mxu2  ;;  %v876_v20 = vpop.f32.mrf.mxu3 }
 0x1b6   : > { %v1128_v36 = vmul.f32 %v1336_v19, %v931_v21  ;;  %v765_v24 = vpop.xlane.xlu2 %764  ;;  %v1338_v57 = vpop.eup %1337 }
 0x1b7   : > { %1341 = vrcp.f32 %v765_v24  ;;  %v1340_v29 = vpop.eup %1339  ;;  %v768_v34 = vpop.xlane.xlu0 %767 }
 0x1b8   : > { %1145 = vst.msk [vmem:[%s1626_s27 + $0x30] sm:$0x1f] %vm1138_vm5, %v1128_v36  ;;  %v895_v45 = vpop.f32.mrf.mxu0  ;;  %v914_v23 = vpop.f32.mrf.mxu1 }
 0x1bc   : > { %v762_v26 = vpop.xlane.xlu1 %761 }
 0x1bd   : > { %v933_v25 = vpop.f32.mrf.mxu2  ;;  %v950_v27 = vpop.f32.mrf.mxu3  ;;  %1343 = vrcp.f32 %v762_v26 }
 0x1be   : > { %v1129_v28 = vmul.f32 %v1338_v57, %v950_v27  ;;  %v1342_v37 = vpop.eup %1341  ;;  %1345 = vrcp.f32 %v768_v34 }
 0x1c0   : > { %v969_v30 = vpop.f32.mrf.mxu0  ;;  %1146 = vst.msk [vmem:[%s1626_s27 + $0x38] sm:$0x1f] %vm1138_vm5, %v1129_v28 }
 0x1c1   : > { %v1130_v31 = vmul.f32 %v1340_v29, %v969_v30 }
 0x1c3   : > { %1147 = vst.msk [vmem:[%s1626_s27 + $0x40] sm:$0x1f] %vm1138_vm5, %v1130_v31  ;;  %v1344_v4 = vpop.eup %1343 }
 0x1c4   : > { %v777_v41 = vpop.xlane.xlu0 %776  ;;  %v1346_v43 = vpop.eup %1345 }
 0x1c5   : > { %v1007_v38 = vpop.f32.mrf.mxu2  ;;  %v952_v39 = vpop.f32.mrf.mxu3 }
 0x1c6   : > { %v1132_v6 = vmul.f32 %v1342_v37, %v1007_v38  ;;  %v771_v48 = vpop.xlane.xlu1 %770 }
 0x1c7   : > { %v988_v40 = vpop.f32.mrf.mxu1  ;;  %1347 = vrcp.f32 %v771_v48 }
 0x1c8   : > { %1149 = vst.msk [vmem:[%s1626_s27 + $0x50] sm:$0x1f] %vm1138_vm5, %v1132_v6  ;;  %v971_v7 = vpop.f32.mrf.mxu0  ;;  %v1131_v44 = vmul.f32 %v1344_v4, %v988_v40  ;;  %1349 = vrcp.f32 %v777_v41 }
 0x1ca   : > { %1148 = vst.msk [vmem:[%s1626_s27 + $0x48] sm:$0x1f] %vm1138_vm5, %v1131_v44 }
 0x1cc   : > { %v774_v46 = vpop.xlane.xlu2 %773 }
 0x1cd   : > { %v1009_v42 = vpop.f32.mrf.mxu2  ;;  %v1026_v5 = vpop.f32.mrf.mxu3  ;;  %1351 = vrcp.f32 %v774_v46 }
 0x1ce   : > { %v1133_v47 = vmul.f32 %v1346_v43, %v1026_v5  ;;  %v1348_v51 = vpop.eup %1347  ;;  %v780_v32 = vpop.xlane.xlu1 %779 }
 0x1cf   : > { %v990_v50 = vpop.f32.mrf.mxu1  ;;  %v1350_v54 = vpop.eup %1349  ;;  %1353 = vrcp.f32 %v780_v32 }
 0x1d0   : > { %1150 = vst.msk [vmem:[%s1626_s27 + $0x58] sm:$0x1f] %vm1138_vm5, %v1133_v47  ;;  %v1045_v52 = vpop.f32.mrf.mxu0 }
 0x1d1   : > { %v1134_v53 = vmul.f32 %v1348_v51, %v1045_v52 }
 0x1d3   : > { %1151 = vst.msk [vmem:[%s1626_s27 + $0x60] sm:$0x1f] %vm1138_vm5, %v1134_v53  ;;  %v1352_v62 = vpop.eup %1351 }
 0x1d5   : > { %v1083_v55 = vpop.f32.mrf.mxu2  ;;  %v1028_v58 = vpop.f32.mrf.mxu3 }
 0x1d6   : > { %v1136_v61 = vmul.f32 %v1350_v54, %v1083_v55  ;;  %v1354_v1 = vpop.eup %1353 }
 0x1d7   : > { %v1064_v63 = vpop.f32.mrf.mxu1 }
 0x1d8   : > { %1153 = vst.msk [vmem:[%s1626_s27 + $0x70] sm:$0x1f] %vm1138_vm5, %v1136_v61  ;;  %v1135_v49 = vmul.f32 %v1352_v62, %v1064_v63  ;;  %v1047_v0 = vpop.f32.mrf.mxu0 }
 0x1da   : > { %1152 = vst.msk [vmem:[%s1626_s27 + $0x68] sm:$0x1f] %vm1138_vm5, %v1135_v49 }
 0x1dd   : > { %v1085_v56 = vpop.f32.mrf.mxu2  ;;  %v1102_v2 = vpop.f32.mrf.mxu3 }
 0x1de   : > { %v1137_v3 = vmul.f32 %v1354_v1, %v1102_v2 }
 0x1df   : > { %v1066_v8 = vpop.f32.mrf.mxu1 }
 0x1e0   : > { %1154 = vst.msk [vmem:[%s1626_s27 + $0x78] sm:$0x1f] %vm1138_vm5, %v1137_v3 }
 0x1e5   : > { %v1104_v35 = vpop.f32.mrf.mxu3 }
 0x1e6 PF: > { %s13_s12 = sadd.s32 1, %s1361_s12  }
 0x1e7   : > { %p10_p4 = scmp.ge.s32.totalorder %s13_s12, 4  }
 0x1e9   :  { %12 = sbr.rel (!%p10_p4) target bundleno = 1 (0x1), region = 68 }

// kernel: _lambda_.40
= control target key start
LH: loop header
LB: loop body
LE: loop exit
PB: predicated region body
PF: predicated region fallthrough
CT: control target
= control target key end

     0   :  { %vm19_vm0 = vcmask 261120   ;;  %v179_v10 = vmov 32.0   ;;  %s276_s0 = inlined_call_operand.vmem [shape: f32[34,32], index: 0, kind: input, shape index: {}]   ;;  %s277_s1 = inlined_call_operand.vmem [shape: f32[1,32], index: 1, kind: input, shape index: {}]   ;;  %s278_s2 = inlined_call_operand.vmem [shape: f32[1,32], index: 2, kind: input, shape index: {}]   ;;  %s279_s3 = inlined_call_operand.vmem [shape: f32[34,32], index: 3, kind: output, shape index: {}]  }
   0x1   :  { %v16_v0 = vld [vmem:[%s276_s0 + $0x10] sm:$0xff]  ;;  %v14_v1 = vld [vmem:[%s276_s0] sm:$0xff]  ;;  %v17_v6 = vld [vmem:[%s276_s0 + $0x18] sm:$0xff]  ;;  %167 = vrcp.f32 %v179_v10 }
   0x2   :  { %v26_v2 = vsel %vm19_vm0, %v16_v0, 0.0  ;;  %v20_v3 = vsel %vm19_vm0, %v14_v1, 0.0  ;;  %v18_v4 = vld [vmem:[%s276_s0 + $0x20] sm:$0xff]  ;;  %v15_v7 = vld [vmem:[%s276_s0 + $0x8] sm:$0xff]  ;;  %v29_v8 = vsel %vm19_vm0, %v17_v6, 0.0 }
   0x3   :  { %27 = vadd.xlane.f32.xlu1 %v26_v2  ;;  %21 = vadd.xlane.f32.xlu0 %v20_v3  ;;  %v32_v5 = vsel %vm19_vm0, %v18_v4, 0.0  ;;  %v23_v9 = vsel %vm19_vm0, %v15_v7, 0.0 }
   0x4   :  { %33 = vadd.xlane.f32.xlu2 %v32_v5 }
   0x7   :  { %v168_v11 = vpop.eup %167 }
   0x8   :  { %v36_v12 = vmul.f32 32.0, %v168_v11  ;;  %vm40_vm1 = vweird.f32 %v168_v11 }
   0xa   :  { %v37_v13 = vsub.f32 1.0, %v36_v12  ;;  %v166_v12 = vld [vmem:[%s278_s2] ss:$0 sm:$0xff] }
   0xb   :  { %30 = vadd.xlane.f32.xlu1 %v29_v8  ;;  %24 = vadd.xlane.f32.xlu0 %v23_v9 }
   0xc   :  { %v38_v14 = vmul.f32 %v168_v11, %v37_v13 }
   0xe   :  { %v39_v15 = vadd.f32 %v168_v11, %v38_v14 }
  0x10   :  { %v41_v16 = vsel %vm40_vm1, %v168_v11, %v39_v15 }
  0x76   :  { %v28_v17 = vpop.xlane.xlu1 %27  ;;  %v22_v18 = vpop.xlane.xlu0 %21 }
  0x77   :  { %v44_v19 = vmul.f32 %v41_v16, %v28_v17  ;;  %v42_v20 = vmul.f32 %v41_v16, %v22_v18  ;;  %v34_v25 = vpop.xlane.xlu2 %33 }
  0x78   :  { %v46_v32 = vmul.f32 %v41_v16, %v34_v25 }
  0x79   :  { %v220_v21 = vsub.f32 %v16_v0, %v44_v19  ;;  %v222_v22 = vsub.f32 %v14_v1, %v42_v20 }
  0x7a   :  { %v234_v35 = vsub.f32 %v18_v4, %v46_v32 }
  0x7b   :  { %v54_v23 = vmul.f32 %v220_v21, %v220_v21  ;;  %v52_v24 = vmul.f32 %v222_v22, %v222_v22 }
  0x7c   :  { %v56_v40 = vmul.f32 %v234_v35, %v234_v35 }
  0x7d   :  { %v63_v26 = vsel %vm19_vm0, %v54_v23, 0.0  ;;  %v57_v27 = vsel %vm19_vm0, %v52_v24, 0.0 }
  0x7e   :  { %64 = vadd.xlane.f32.xlu1 %v63_v26  ;;  %v31_v28 = vpop.xlane.xlu1 %30  ;;  %58 = vadd.xlane.f32.xlu2 %v57_v27  ;;  %v25_v29 = vpop.xlane.xlu0 %24  ;;  %v69_v41 = vsel %vm19_vm0, %v56_v40, 0.0 }
  0x7f   :  { %v45_v30 = vmul.f32 %v41_v16, %v31_v28  ;;  %v43_v31 = vmul.f32 %v41_v16, %v25_v29 }
  0x81   :  { %v230_v33 = vsub.f32 %v17_v6, %v45_v30  ;;  %v232_v34 = vsub.f32 %v15_v7, %v43_v31  ;;  %v165_v7 = vld [vmem:[%s277_s1] ss:$0 sm:$0xff] }
  0x83   :  { %v55_v36 = vmul.f32 %v230_v33, %v230_v33  ;;  %v53_v37 = vmul.f32 %v232_v34, %v232_v34 }
  0x85   :  { %v66_v38 = vsel %vm19_vm0, %v55_v36, 0.0  ;;  %v60_v39 = vsel %vm19_vm0, %v53_v37, 0.0 }
  0x86   :  { %67 = vadd.xlane.f32.xlu2 %v66_v38  ;;  %61 = vadd.xlane.f32.xlu0 %v60_v39 }
  0x8e   :  { %70 = vadd.xlane.f32.xlu0 %v69_v41 }
  0xf1   :  { %v65_v42 = vpop.xlane.xlu1 %64  ;;  %v59_v43 = vpop.xlane.xlu2 %58 }
  0xf2   :  { %v74_v44 = vmul.f32 %v65_v42, %v41_v16  ;;  %v72_v45 = vmul.f32 %v59_v43, %v41_v16 }
  0xf4   :  { %v79_v46 = vadd.f32 1e-06, %v74_v44  ;;  %v77_v47 = vadd.f32 1e-06, %v72_v45 }
  0xf6   :  { %169 = vrsqrt.f32 %v79_v46  ;;  %vm108_vm2 = vweird.f32 %v79_v46  ;;  %vm88_vm6 = vweird.f32 %v77_v47 }
  0xf7   :  { %171 = vrsqrt.f32 %v77_v47 }
  0xf9   :  { %v68_v48 = vpop.xlane.xlu2 %67  ;;  %v62_v49 = vpop.xlane.xlu0 %61 }
  0xfa   :  { %v75_v50 = vmul.f32 %v68_v48, %v41_v16  ;;  %v73_v51 = vmul.f32 %v62_v49, %v41_v16 }
  0xfc   :  { %v170_v52 = vpop.eup %169  ;;  %v80_v53 = vadd.f32 1e-06, %v75_v50  ;;  %v78_v54 = vadd.f32 1e-06, %v73_v51 }
  0xfd   :  { %v172_v55 = vpop.eup %171  ;;  %v103_v56 = vmul.f32 %v170_v52, %v79_v46  ;;  %vm109_vm3 = vweird.f32 %v170_v52 }
  0xfe   :  { %v83_v57 = vmul.f32 %v172_v55, %v77_v47  ;;  %173 = vrsqrt.f32 %v80_v53  ;;  %vm89_vm4 = vweird.f32 %v172_v55  ;;  %vm110_vm5 = vmor %vm108_vm2, %vm109_vm3  ;;  %vm118_vm8 = vweird.f32 %v80_v53 }
  0xff   :  { %v104_v58 = vmul.f32 %v170_v52, %v103_v56  ;;  %175 = vrsqrt.f32 %v78_v54  ;;  %vm90_vm7 = vmor %vm88_vm6, %vm89_vm4  ;;  %vm98_vm12 = vweird.f32 %v78_v54 }
 0x100   :  { %v84_v59 = vmul.f32 %v172_v55, %v83_v57 }
 0x101   :  { %v105_v60 = vmul.f32 0.5, %v104_v58  ;;  %v71_v61 = vpop.xlane.xlu0 %70 }
 0x102   :  { %v85_v62 = vmul.f32 0.5, %v84_v59  ;;  %v76_v63 = vmul.f32 %v71_v61, %v41_v16 }
 0x103   :  { %v106_v0 = vsub.f32 1.5, %v105_v60 }
 0x104   :  { %v174_v1 = vpop.eup %173  ;;  %v86_v2 = vsub.f32 1.5, %v85_v62  ;;  %v81_v3 = vadd.f32 1e-06, %v76_v63 }
 0x105   :  { %v176_v4 = vpop.eup %175  ;;  %v107_v5 = vmul.f32 %v170_v52, %v106_v0  ;;  %v113_v6 = vmul.f32 %v174_v1, %v80_v53  ;;  %vm119_vm9 = vweird.f32 %v174_v1 }
 0x106   :  { %v87_v8 = vmul.f32 %v172_v55, %v86_v2  ;;  %v93_v9 = vmul.f32 %v176_v4, %v78_v54  ;;  %177 = vrsqrt.f32 %v81_v3  ;;  %vm99_vm10 = vweird.f32 %v176_v4  ;;  %vm120_vm11 = vmor %vm118_vm8, %vm119_vm9 }
 0x107   :  { %v111_v10 = vsel %vm110_vm5, %v170_v52, %v107_v5  ;;  %v114_v11 = vmul.f32 %v174_v1, %v113_v6  ;;  %vm100_vm13 = vmor %vm98_vm12, %vm99_vm10  ;;  %vm128_vm15 = vweird.f32 %v81_v3 }
 0x108   :  { %v134_v13 = vmul.f32 %v111_v10, %v220_v21  ;;  %v91_v14 = vsel %vm90_vm7, %v172_v55, %v87_v8  ;;  %v94_v15 = vmul.f32 %v176_v4, %v93_v9 }
 0x109   :  { %v132_v16 = vmul.f32 %v91_v14, %v222_v22  ;;  %v115_v17 = vmul.f32 0.5, %v114_v11 }
 0x10a   :  { %v143_v18 = vmul.f32 %v165_v7, %v134_v13  ;;  %v95_v19 = vmul.f32 0.5, %v94_v15 }
 0x10b   :  { %v141_v20 = vmul.f32 %v165_v7, %v132_v16  ;;  %v116_v23 = vsub.f32 1.5, %v115_v17 }
 0x10c   :  { %v178_v24 = vpop.eup %177  ;;  %v152_v25 = vadd.f32 %v166_v12, %v143_v18  ;;  %v96_v26 = vsub.f32 1.5, %v95_v19 }
 0x10d   :  { %v150_v27 = vadd.f32 %v166_v12, %v141_v20  ;;  %v117_v28 = vmul.f32 %v174_v1, %v116_v23  ;;  %v123_v29 = vmul.f32 %v178_v24, %v81_v3  ;;  %vm129_vm14 = vweird.f32 %v178_v24 }
 0x10e   :  { %157 = vst.msk [vmem:[%s279_s3 + $0x10] sm:$0xff] %vm19_vm0, %v152_v25  ;;  %v97_v21 = vmul.f32 %v176_v4, %v96_v26  ;;  %vm130_vm1 = vmor %vm128_vm15, %vm129_vm14 }
 0x10f   :  { %155 = vst.msk [vmem:[%s279_s3] sm:$0xff] %vm19_vm0, %v150_v27  ;;  %v121_v22 = vsel %vm120_vm11, %v174_v1, %v117_v28  ;;  %v124_v30 = vmul.f32 %v178_v24, %v123_v29 }
 0x110   :  { %v135_v31 = vmul.f32 %v121_v22, %v230_v33  ;;  %v101_v32 = vsel %vm100_vm13, %v176_v4, %v97_v21 }
 0x111   :  { %v133_v36 = vmul.f32 %v101_v32, %v232_v34  ;;  %v125_v37 = vmul.f32 0.5, %v124_v30 }
 0x112   :  { %v144_v38 = vmul.f32 %v165_v7, %v135_v31 }
 0x113   :  { %v142_v39 = vmul.f32 %v165_v7, %v133_v36  ;;  %v126_v40 = vsub.f32 1.5, %v125_v37 }
 0x114   :  { %v153_v41 = vadd.f32 %v166_v12, %v144_v38 }
 0x115   :  { %v151_v42 = vadd.f32 %v166_v12, %v142_v39  ;;  %v127_v43 = vmul.f32 %v178_v24, %v126_v40 }
 0x116   :  { %158 = vst.msk [vmem:[%s279_s3 + $0x18] sm:$0xff] %vm19_vm0, %v153_v41 }
 0x117   :  { %156 = vst.msk [vmem:[%s279_s3 + $0x8] sm:$0xff] %vm19_vm0, %v151_v42  ;;  %v131_v33 = vsel %vm130_vm1, %v178_v24, %v127_v43 }
 0x118   :  { %v136_v34 = vmul.f32 %v131_v33, %v234_v35 }
 0x11a   :  { %v145_v44 = vmul.f32 %v165_v7, %v136_v34 }
 0x11c   :  { %v154_v45 = vadd.f32 %v166_v12, %v145_v44 }
 0x11e   :  { %159 = vst.msk [vmem:[%s279_s3 + $0x20] sm:$0xff] %vm19_vm0, %v154_v45 }

// kernel: _lambda_.41
= control target key start
LH: loop header
LB: loop body
LE: loop exit
PB: predicated region body
PF: predicated region fallthrough
CT: control target
= control target key end

     0   :  { %6 = vsyncpa [#allocation3], 0  ;;  %s419_s0 = inlined_call_operand.vmem [shape: f32[2,17,32], index: 0, kind: input, shape index: {}]   ;;  %s420_s1 = inlined_call_operand.hbm [shape: f32[2,1,32], index: 1, kind: output, shape index: {}]  }
   0x1   :  { %8 = vsyncpa [#allocation3 + $0x1], 0  ;;  %s332_s6 = smov 0   ;;  %s334_s7 = smov 0  }
   0x2   :  { %s336_s8 = smov 0   ;;  %s338_s9 = smov 0  }
   0x3 LB: > { %s353_s10 = sadd.s32 4294967295, %s319_s9   ;;  %s207_s11 = sadd.s32 4294967294, %s319_s9   ;;  %s319_s9 = sphi %s338_s9, %s426_s9   ;;  %s315_s8 = sphi %s336_s8, %s425_s8   ;;  %s311_s7 = sphi %s334_s7, %s424_s7   ;;  %s307_s6 = sphi %s332_s6, %s423_s6  }
   0x4   : > { %s357_s12 = sadd.s32 1, %s319_s9   ;;  %s47_s13 = sadd.s32 1, %s315_s8 }
   0x5   : > { %s44_s14 = ssub.s32 %s319_s9, %s357_s12  ;;  %p57_p0 = scmp.ne.s32.totalorder %s315_s8, %s311_s7 }
   0x6   : > { %p45_p1 = scmp.eq.s32.totalorder %s44_s14, 0  ;;  %p58_p2 = scmp.eq.s32.totalorder %s353_s10, 1 }
   0x7   : > { %p63_p3 = scmp.ne.s32.totalorder %s311_s7, %s307_s6  ;;  %p64_p4 = scmp.eq.s32.totalorder %s207_s11, 1 }
   0x8   : > { %s368_s15 = scalar_select %p45_p1, %s315_s8, %s47_s13  }
   0x9   : > { %p370_p5 = por %p58_p2, %p57_p0  ;;  %p374_p6 = por %p64_p4, %p63_p3 }
   0xa   : > { %p210_p7 = scmp.ge.s32.totalorder %s319_s9, 1  ;;  %p90_p8 = scmp.lt.s32.totalorder %s319_s9, 3 }
   0xc   : > { %p91_p9 = pnand %p210_p7, %p90_p8 }
   0xd   : > { %p109_p10 = scmp.lt.s32.totalorder (!%p91_p9), %s353_s10, 1  ;;  %s107_s23 = sand.u32 (!%p91_p9), 1, %s311_s7  }
   0xe   : > { %94 = sbr.rel (%p91_p9) target bundleno = 47 (0x2f), region = 24  ;;  %s148_s26 = scalar_lea.hbm (!%p91_p9), %s420_s1, %s353_s10 }
   0xf   : > { %s108_s27 = scalar_lea.vmem (!%p91_p9), [#allocation2], %s107_s23  ;;  %s152_s29 = sshll.u32 (!%p91_p9), %s148_s26, 4  ;;  %s153_s29 = int_to_ptr.hbm [resolvable:$true] %s152_s29 }
  0x10   : > { %s150_s28 = sshll.u32 (!%p91_p9), %s108_s27, 4  ;;  %s140_s30 = scalar_lea.sflag (!%p91_p9), [#allocation3], %s107_s23  ;;  %s151_s28 = int_to_ptr.vmem [resolvable:$true] %s150_s28 }
  0x11   : > { %s271_s2 = sshra.s32 (!%p91_p9), %s153_s29, 4  ;;  %s272_s2 = int_to_ptr.hbm [resolvable:$true] %s271_s2 }
  0x12   : > { %s273_s3 = scalar_lea.hbm (!%p91_p9), %s272_s2, 1  ;;  %p278_p0 = scmp.lt.s32.totalorder (!%p91_p9), %s272_s2, %s420_s1 }
  0x13   : > { %v321_v0 = vmov 17.0   ;;  %s110_s18 = scalar_select %p109_p10, %s353_s10, 1  ;;  %vm117_vm0 = vcmask 261120   ;;  %vm121_vm1 = vcmask 253952  }
  0x14   : > { %255 = vrcp.f32 %v321_v0  ;;  %p274_p11 = scmp.ne.s32.totalorder %s272_s2, %s273_s3  ;;  %s277_s10 = scalar_lea.hbm %s420_s1, 2 }
  0x15   : > { %s214_s19 = smul.u32 24, %s110_s18  ;;  %p279_p1 = scmp.lt.s32.totalorder %s277_s10, %s273_s3 }
  0x16   : > { %p275_p12 = pnand %p274_p11, %p370_p5 }
  0x17   : > { %s113_s22 = scalar_lea.vmem %s419_s0, %s214_s19  ;;  %p280_p2 = por %p279_p1, %p278_p0 }
  0x18   : > { %v114_v2 = vld [vmem:[%s113_s22] sm:$0xff]  ;;  %v115_v3 = vld [vmem:[%s113_s22 + $0x8] sm:$0xff]  ;;  %v116_v4 = vld [vmem:[%s113_s22 + $0x10] sm:$0x1]  ;;  %p276_p13 = pneg %p275_p12 }
  0x19   : > { %v118_v5 = vsel %vm117_vm0, %v114_v2, 0.0  ;;  %v119_v6 = vsel %vm117_vm0, %v115_v3, 0.0  ;;  %v122_v7 = vsel %vm121_vm1, %v116_v4, 0.0 }
  0x1a   : > { %v256_v1 = vpop.eup %255  ;;  %v120_v9 = vadd.f32 %v119_v6, %v118_v5  ;;  %p281_p3 = pnand %p280_p2, %p276_p13 }
  0x1b   : > { %v131_v8 = vmul.f32 17.0, %v256_v1  ;;  %vm135_vm2 = vweird.f32 %v256_v1 }
  0x1c   : > { %v123_v11 = vadd.f32 %v122_v7, %v120_v9 }
  0x1d   : > { %v132_v10 = vsub.f32 1.0, %v131_v8 }
  0x1e   : > { %v124_v12 = vrot.slane %v123_v11, 4 }
  0x1f   : > { %v133_v13 = vmul.f32 %v256_v1, %v132_v10 }
  0x20   : > { %v125_v14 = vadd.f32 %v124_v12, %v123_v11 }
  0x21   : > { %v134_v16 = vadd.f32 %v256_v1, %v133_v13 }
  0x22   : > { %v126_v15 = vrot.slane %v125_v14, 2 }
  0x23   : > { %v136_v19 = vsel %vm135_vm2, %v256_v1, %v134_v16 }
  0x24   : > { %v127_v17 = vadd.f32 %v126_v15, %v125_v14 }
  0x26   : > { %v128_v18 = vrot.slane %v127_v17, 1 }
  0x28   : > { %v129_v20 = vadd.f32 %v128_v18, %v127_v17 }
  0x2a   : > { %v137_v21 = vmul.f32 %v136_v19, %v129_v20 }
  0x2c   : > { %138 = vst.msk [vmem:[%s108_s27] sm:$0x1] %vm121_vm1, %v137_v21 }
  0x2d   : > { %284 = shalt.err (!%p281_p3)
}
  0x2e   : > { %215 = dma.vmem_to_hbm [thread:$0]  (%p370_p5), %s151_s28, 16, %s153_s29, %s140_s30  }
  0x2f PF: > { %p221_p4 = scmp.ge.s32.totalorder %s319_s9, 2  ;;  %s164_s14 = sand.u32 1, %s307_s6  }
  0x30   : > { %s165_s18 = scalar_lea.sflag [#allocation3], %s164_s14 }
  0x31   : > { %p218_p7 = pnand %p221_p4, %p374_p6 }
  0x33   : > { %p219_p8 = pneg %p218_p7 }
  0x35   : > { %302 = dma.done.wait (%p219_p8), %s165_s18, 16  }
  0x36   : > { %304 = vsyncadd (%p219_p8), %s165_s18, 4294967280  ;;  %p11_p9 = scmp.ge.s32.totalorder %s357_s12, 4   ;;  %s423_s6 = smov %s311_s7 }
  0x37   : > { %s424_s7 = smov %s315_s8  ;;  %s425_s8 = smov %s368_s15 }
  0x38   : > { %s426_s9 = smov %s357_s12  ;;  %13 = sbr.rel (!%p11_p9) target bundleno = 3 (0x3), region = 59 }
  0x3d   :  { %170 = vsyncpa [#allocation3], 1 }
  0x3e   :  { %172 = vsyncpa [#allocation3 + $0x1], 1 }

</bundles_post_ra>
